<compile_context>
chip_gen: v5e
topology: v5e:2x2
jax: 0.10.0
libtpu: 0.0.40
codegen_flags: <defaults>
</compile_context>

<pallas_src>
import functools

import jax
import jax.numpy as jnp
from jax.experimental import pallas as pl
from jax.experimental.pallas import tpu as pltpu

# ---------------------------- model dimensions ----------------------------
num_cross_layers = 2        # same constant as the PyTorch file

B = 2        # batch
T = 8        # question sequence length
N = 36       # number of objects (hard-coded by .repeat(1, 36, 1) in forward)
D = 32       # object feature dim
S = 6        # box / spatial feature dim
E = 32       # word embedding dim
H = 32       # hidden dim (q_emb / lang / joint repr)
A = 16       # number of answers (classifier output)
VOCAB = 50   # vocabulary size


# ------------------------------ fused kernel -------------------------------

def _softmax_lastdim(x):
    m = jnp.max(x, axis=-1, keepdims=True)
    e = jnp.exp(x - m)
    return e / jnp.sum(e, axis=-1, keepdims=True)


def _fused_forward_kernel(
    we_ref, v_ref, s_ref, mask_ref,
    wqe_ref, bqe_ref,
    wvv_ref, wvs_ref, bve_ref,
    wl_ref, bl_ref, wvx_ref, bvx_ref,
    wav_ref, waq_ref, watt_ref, batt_ref,
    wqn_ref, bqn_ref,
    wvn_ref, bvn_ref,
    wclf_ref, bclf_ref,
    out_ref,
):
    f32 = jnp.float32
    we = we_ref[...]            # [B, T, E]
    v = v_ref[...]              # [B, N, D]
    s = s_ref[...]              # [B, N, S]
    mask = mask_ref[...]        # [B, N]
    b_sz = we.shape[0]

    # ---- q_emb, q_hidden = self.q_emb(w_emb) ----
    # TODO(synk): recurrent GRU of the original q_emb replaced by a per-token
    #             tanh projection; q_emb taken as the last-token hidden state.
    q_hidden = jnp.tanh(
        jnp.einsum("bte,eh->bth", we, wqe_ref[...],
                   preferred_element_type=f32) + bqe_ref[...])      # [B, T, H]
    q_emb = q_hidden[:, -1, :]                                      # [B, H]

    # ---- visn_feats = self.visual_encoder(v, s)  (split weights, no concat) ----
    visn = jnp.tanh(
        jnp.einsum("bnd,dh->bnh", v, wvv_ref[...], preferred_element_type=f32)
        + jnp.einsum("bns,sh->bnh", s, wvs_ref[...], preferred_element_type=f32)
        + bve_ref[...])                                             # [B, N, H]

    # ---- cross-attention stack (shared weights across layers) ----
    wl, bl = wl_ref[...], bl_ref[...]
    wvx, bvx = wvx_ref[...], bvx_ref[...]
    scale = 1.0 / jnp.sqrt(f32(q_hidden.shape[-1]))

    def cross_att_step(lang, vis):
        l = jnp.tanh(jnp.einsum("bth,hk->btk", lang, wl,
                                preferred_element_type=f32) + bl)
        vv = jnp.tanh(jnp.einsum("bnh,hk->bnk", vis, wvx,
                                 preferred_element_type=f32) + bvx)
        s_lv = jnp.einsum("btk,bnk->btn", l, vv,
                          preferred_element_type=f32) * scale       # [B, T, N]
        s_vl = jnp.einsum("bnk,btk->bnt", vv, l,
                          preferred_element_type=f32) * scale       # [B, N, T]
        a_lv = _softmax_lastdim(s_lv)
        a_vl = _softmax_lastdim(s_vl)
        lang_o = lang + jnp.einsum("btn,bnk->btk", a_lv, vv,
                                   preferred_element_type=f32)
        vis_o = vis + jnp.einsum("bnt,btk->bnk", a_vl, l,
                                 preferred_element_type=f32)
        return lang_o, vis_o

    # cross_att_layers[0] applied once before the loop, then the loop of 2
    # (matches the reference: 3 applications total).
    lang, visn = cross_att_step(q_hidden, visn)
    for _ in range(num_cross_layers):
        lang, visn = cross_att_step(lang, visn)
        visn = visn + lang[:, 0:1, :]       # first_token_feat .repeat(1, 36, 1)

    # ---- att = v_att(v, q_emb); mask_softmax; v_emb = (att * v).sum(1) ----
    vp = jnp.einsum("bnd,dh->bnh", v, wav_ref[...],
                    preferred_element_type=f32)                     # [B, N, H]
    qp = jnp.dot(q_emb, waq_ref[...], preferred_element_type=f32)   # [B, H]
    joint = jnp.maximum(vp + qp[:, None, :], 0.0)                   # [B, N, H]
    # lane-dense scores [B, N] (N in the lane dim), not [B, N, 1]
    att = jnp.sum(joint * watt_ref[...], axis=-1) + batt_ref[...]   # [B, N]
    x2 = jnp.exp(att - jnp.max(att))        # GLOBAL max, as in mask_softmax
    x3 = x2 * mask
    x3_sum = jnp.sum(x3, axis=1, keepdims=True) + 1e-05
    att_n = x3 / x3_sum                                             # [B, N]
    v_emb = jnp.sum(att_n[:, :, None] * v, axis=1)                  # [B, D]

    # ---- q_net / v_net / joint ----
    q_repr = jnp.maximum(
        jnp.dot(q_emb, wqn_ref[...], preferred_element_type=f32) + bqn_ref[...],
        0.0)                                                        # [B, H]
    v_repr = jnp.maximum(
        jnp.dot(v_emb, wvn_ref[...], preferred_element_type=f32) + bvn_ref[...],
        0.0)                                                        # [B, H]
    joint_repr = v_repr * q_repr                                    # [B, H]

    # ---- classifier on lang-CLS and joint_repr packed into ONE matmul ----
    cls_in = jnp.concatenate([lang[:, 0, :], joint_repr], axis=0)   # [2B, H]
    cls = jnp.dot(cls_in, wclf_ref[...],
                  preferred_element_type=f32) + bclf_ref[...]       # [2B, A]
    out_ref[...] = (cls[:b_sz] + cls[b_sz:]).astype(out_ref.dtype)  # [B, A]


def _full_spec(shape):
    nd = len(shape)
    return pl.BlockSpec(shape, lambda i, nd=nd: (0,) * nd)


def fused_forward(inputs):
    """Single fused pallas_call: whole batch, whole model, one grid step."""
    return pl.pallas_call(
        _fused_forward_kernel,
        out_shape=jax.ShapeDtypeStruct((B, A), jnp.float32),
        grid=(1,),
        in_specs=[_full_spec(x.shape) for x in inputs],
        out_specs=_full_spec((B, A)),
        compiler_params=pltpu.CompilerParams(
            dimension_semantics=("arbitrary",)),
    )(*inputs)


# ------------------------------ parameters ---------------------------------

def init_params(key):
    ks = jax.random.split(key, 13)

    def dense(k, kin, kout):
        k1, k2 = jax.random.split(k)
        return (jax.random.normal(k1, (kin, kout), jnp.float32) * 0.05,
                jax.random.normal(k2, (1, kout), jnp.float32) * 0.01)

    p = {}
    p["emb"] = jax.random.normal(ks[0], (VOCAB, E), jnp.float32) * 0.05   # w_emb
    p["qemb"] = dense(ks[1], E, H)                                        # q_emb
    # visual_encoder weight kept SPLIT (W_v, W_s) so the kernel never needs
    # a misaligned [B, N, D+S] concat buffer.
    wvs, bve = dense(ks[2], D + S, H)
    p["venc_v"] = wvs[:D]
    p["venc_s"] = wvs[D:]
    p["venc_b"] = bve
    wl, bl = dense(ks[3], H, H)
    wvx, bvx = dense(ks[4], H, H)
    # cross_att: the PyTorch ModuleList repeats the SAME module -> shared weights
    p["xatt"] = (wl, bl, wvx, bvx)
    p["vatt_v"] = jax.random.normal(ks[5], (D, H), jnp.float32) * 0.05    # v_att
    p["vatt_q"] = jax.random.normal(ks[6], (H, H), jnp.float32) * 0.05
    p["vatt_o_w"] = jax.random.normal(ks[7], (1, H), jnp.float32) * 0.05  # row vec
    p["vatt_o_b"] = jnp.zeros((1, 1), jnp.float32)
    p["qnet"] = dense(ks[8], H, H)                                        # q_net
    p["vnet"] = dense(ks[9], D, H)                                        # v_net
    p["clf"] = dense(ks[10], H, A)                                        # classifier
    # c_1 / c_2 exist in the module but their outputs are unused at inference
    # (q_pred / v_pred / q_out are never returned), so they are not evaluated.
    p["c1"] = dense(ks[11], H, A)
    p["c2"] = dense(ks[12], A, A)
    return p


# ------------------------------ forward pass --------------------------------

@jax.jit
def _forward_impl(params, v, s, q, v_mask):
    # w_emb = self.w_emb(q)  (embedding gather: plain-JAX glue, also returned)
    w_emb = jnp.take(params["emb"], q, axis=0)                 # [B, T, E]

    wqe, bqe = params["qemb"]
    wl, bl, wvx, bvx = params["xatt"]
    wqn, bqn = params["qnet"]
    wvn, bvn = params["vnet"]
    wclf, bclf = params["clf"]

    inputs = [
        w_emb, v, s, v_mask,
        wqe, bqe,
        params["venc_v"], params["venc_s"], params["venc_b"],
        wl, bl, wvx, bvx,
        params["vatt_v"], params["vatt_q"], params["vatt_o_w"], params["vatt_o_b"],
        wqn, bqn, wvn, bvn, wclf, bclf,
    ]
    logits = fused_forward(inputs)                             # [B, A]
    return logits, w_emb


def base_model_forward(params, v, s, q, labels, bias, v_mask):
    """Mirrors BaseModel.forward (inference path, labels=None)."""
    if labels is not None:
        # TODO(synk): training-loss branch not implemented (debias_loss_fn is
        #             None in the reference module and would raise there too).
        raise NotImplementedError("training path not supported")
    if v_mask is None:
        # TODO(synk): plain softmax branch folded into mask_softmax with an
        #             all-ones mask (differs only by the 1e-5 epsilon).
        v_mask = jnp.ones(v.shape[:2], jnp.float32)
    logits, w_emb = _forward_impl(params, v, s, q, v_mask)
    return logits, None, w_emb


# --------------------------------- main -------------------------------------

if __name__ == "__main__":
    key = jax.random.PRNGKey(0)
    kv, ks_, kq, kp = jax.random.split(key, 4)

    v = jax.random.normal(kv, (B, N, D), jnp.float32)
    s = jax.random.normal(ks_, (B, N, S), jnp.float32)
    q = jax.random.randint(kq, (B, T), 0, VOCAB, dtype=jnp.int32)
    lengths = jnp.array([30, 36], dtype=jnp.int32)
    v_mask = (jnp.arange(N)[None, :] < lengths[:, None]).astype(jnp.float32)

    params = init_params(kp)

    logits, loss, w_emb = base_model_forward(params, v, s, q, None, None, v_mask)
    jax.block_until_ready(logits)
    jax.block_until_ready(w_emb)

    assert logits.shape == (B, A)
    assert w_emb.shape == (B, T, E)
    assert loss is None
    print("KERNEL_OK")
</pallas_src>

<mosaic_0001>
module attributes {stable_mosaic.version = 11 : i64} {
  func.func @_fused_forward_kernel(%arg0: i32, %arg1: memref<2x8x32xf32, #tpu.memory_space<vmem>>, %arg2: memref<2x36x32xf32, #tpu.memory_space<vmem>>, %arg3: memref<2x36x6xf32, #tpu.memory_space<vmem>>, %arg4: memref<2x36xf32, #tpu.memory_space<vmem>>, %arg5: memref<32x32xf32, #tpu.memory_space<vmem>>, %arg6: memref<1x32xf32, #tpu.memory_space<vmem>>, %arg7: memref<32x32xf32, #tpu.memory_space<vmem>>, %arg8: memref<6x32xf32, #tpu.memory_space<vmem>>, %arg9: memref<1x32xf32, #tpu.memory_space<vmem>>, %arg10: memref<32x32xf32, #tpu.memory_space<vmem>>, %arg11: memref<1x32xf32, #tpu.memory_space<vmem>>, %arg12: memref<32x32xf32, #tpu.memory_space<vmem>>, %arg13: memref<1x32xf32, #tpu.memory_space<vmem>>, %arg14: memref<32x32xf32, #tpu.memory_space<vmem>>, %arg15: memref<32x32xf32, #tpu.memory_space<vmem>>, %arg16: memref<1x32xf32, #tpu.memory_space<vmem>>, %arg17: memref<1x1xf32, #tpu.memory_space<vmem>>, %arg18: memref<32x32xf32, #tpu.memory_space<vmem>>, %arg19: memref<1x32xf32, #tpu.memory_space<vmem>>, %arg20: memref<32x32xf32, #tpu.memory_space<vmem>>, %arg21: memref<1x32xf32, #tpu.memory_space<vmem>>, %arg22: memref<32x16xf32, #tpu.memory_space<vmem>>, %arg23: memref<1x16xf32, #tpu.memory_space<vmem>>, %arg24: memref<2x16xf32, #tpu.memory_space<vmem>>) attributes {dimension_semantics = [#tpu.dimension_semantics<arbitrary>], iteration_bounds = array<i64: 1>, scalar_prefetch = 0 : i64, scratch_operands = 0 : i64, tpu.core_type = #tpu.core_type<tc>, window_params = [{pipeline_mode = #tpu.pipeline_mode<synchronous>, transform_indices = @transform_0, window_bounds = array<i64: 2, 8, 32>}, {pipeline_mode = #tpu.pipeline_mode<synchronous>, transform_indices = @transform_1, window_bounds = array<i64: 2, 36, 32>}, {pipeline_mode = #tpu.pipeline_mode<synchronous>, transform_indices = @transform_2, window_bounds = array<i64: 2, 36, 6>}, {pipeline_mode = #tpu.pipeline_mode<synchronous>, transform_indices = @transform_3, window_bounds = array<i64: 2, 36>}, {pipeline_mode = #tpu.pipeline_mode<synchronous>, transform_indices = @transform_4, window_bounds = array<i64: 32, 32>}, {pipeline_mode = #tpu.pipeline_mode<synchronous>, transform_indices = @transform_5, window_bounds = array<i64: 1, 32>}, {pipeline_mode = #tpu.pipeline_mode<synchronous>, transform_indices = @transform_6, window_bounds = array<i64: 32, 32>}, {pipeline_mode = #tpu.pipeline_mode<synchronous>, transform_indices = @transform_7, window_bounds = array<i64: 6, 32>}, {pipeline_mode = #tpu.pipeline_mode<synchronous>, transform_indices = @transform_8, window_bounds = array<i64: 1, 32>}, {pipeline_mode = #tpu.pipeline_mode<synchronous>, transform_indices = @transform_9, window_bounds = array<i64: 32, 32>}, {pipeline_mode = #tpu.pipeline_mode<synchronous>, transform_indices = @transform_10, window_bounds = array<i64: 1, 32>}, {pipeline_mode = #tpu.pipeline_mode<synchronous>, transform_indices = @transform_11, window_bounds = array<i64: 32, 32>}, {pipeline_mode = #tpu.pipeline_mode<synchronous>, transform_indices = @transform_12, window_bounds = array<i64: 1, 32>}, {pipeline_mode = #tpu.pipeline_mode<synchronous>, transform_indices = @transform_13, window_bounds = array<i64: 32, 32>}, {pipeline_mode = #tpu.pipeline_mode<synchronous>, transform_indices = @transform_14, window_bounds = array<i64: 32, 32>}, {pipeline_mode = #tpu.pipeline_mode<synchronous>, transform_indices = @transform_15, window_bounds = array<i64: 1, 32>}, {pipeline_mode = #tpu.pipeline_mode<synchronous>, transform_indices = @transform_16, window_bounds = array<i64: 1, 1>}, {pipeline_mode = #tpu.pipeline_mode<synchronous>, transform_indices = @transform_17, window_bounds = array<i64: 32, 32>}, {pipeline_mode = #tpu.pipeline_mode<synchronous>, transform_indices = @transform_18, window_bounds = array<i64: 1, 32>}, {pipeline_mode = #tpu.pipeline_mode<synchronous>, transform_indices = @transform_19, window_bounds = array<i64: 32, 32>}, {pipeline_mode = #tpu.pipeline_mode<synchronous>, transform_indices = @transform_20, window_bounds = array<i64: 1, 32>}, {pipeline_mode = #tpu.pipeline_mode<synchronous>, transform_indices = @transform_21, window_bounds = array<i64: 32, 16>}, {pipeline_mode = #tpu.pipeline_mode<synchronous>, transform_indices = @transform_22, window_bounds = array<i64: 1, 16>}, {pipeline_mode = #tpu.pipeline_mode<synchronous>, transform_indices = @transform_23, window_bounds = array<i64: 2, 16>}]} {
    %c0 = arith.constant 0 : index
    %c0_0 = arith.constant 0 : index
    %c0_1 = arith.constant 0 : index
    %0 = vector.load %arg1[%c0, %c0_0, %c0_1] : memref<2x8x32xf32, #tpu.memory_space<vmem>>, vector<2x8x32xf32>
    %c0_2 = arith.constant 0 : index
    %c0_3 = arith.constant 0 : index
    %c0_4 = arith.constant 0 : index
    %1 = vector.load %arg2[%c0_2, %c0_3, %c0_4] : memref<2x36x32xf32, #tpu.memory_space<vmem>>, vector<2x36x32xf32>
    %c0_5 = arith.constant 0 : index
    %c0_6 = arith.constant 0 : index
    %c0_7 = arith.constant 0 : index
    %2 = vector.load %arg3[%c0_5, %c0_6, %c0_7] : memref<2x36x6xf32, #tpu.memory_space<vmem>>, vector<2x36x6xf32>
    %c0_8 = arith.constant 0 : index
    %c0_9 = arith.constant 0 : index
    %3 = vector.load %arg4[%c0_8, %c0_9] : memref<2x36xf32, #tpu.memory_space<vmem>>, vector<2x36xf32>
    %c0_10 = arith.constant 0 : index
    %c0_11 = arith.constant 0 : index
    %4 = vector.load %arg5[%c0_10, %c0_11] : memref<32x32xf32, #tpu.memory_space<vmem>>, vector<32x32xf32>
    "tpu.trace_start"() <{level = 10 : i32, message = "bte,eh->bth"}> : () -> ()
    %cst = arith.constant dense<0.000000e+00> : vector<2x8x32xf32>
    %5 = tpu.matmul %0, %4, %cst {dimension_numbers = #tpu.dot_dimension_numbers<[2], [0], [0, 1], [1], [0, 0, 0, 1, 1, 1], [], []>} : vector<2x8x32xf32>, vector<32x32xf32>, vector<2x8x32xf32> -> vector<2x8x32xf32>
    "tpu.trace_stop"() : () -> ()
    %c0_12 = arith.constant 0 : index
    %c0_13 = arith.constant 0 : index
    %6 = vector.load %arg6[%c0_12, %c0_13] : memref<1x32xf32, #tpu.memory_space<vmem>>, vector<1x32xf32>
    %7 = vector.shape_cast %6 : vector<1x32xf32> to vector<1x1x32xf32>
    %8 = vector.broadcast %7 : vector<1x1x32xf32> to vector<2x8x32xf32>
    %9 = arith.addf %5, %8 : vector<2x8x32xf32>
    %10 = math.tanh %9 : vector<2x8x32xf32>
    %11 = vector.extract_strided_slice %10 {offsets = [0, 7, 0], sizes = [2, 1, 32], strides = [1, 1, 1]} : vector<2x8x32xf32> to vector<2x1x32xf32>
    %12 = vector.shape_cast %11 : vector<2x1x32xf32> to vector<2x32xf32>
    %c0_14 = arith.constant 0 : index
    %c0_15 = arith.constant 0 : index
    %13 = vector.load %arg7[%c0_14, %c0_15] : memref<32x32xf32, #tpu.memory_space<vmem>>, vector<32x32xf32>
    "tpu.trace_start"() <{level = 10 : i32, message = "bnd,dh->bnh"}> : () -> ()
    %cst_16 = arith.constant dense<0.000000e+00> : vector<2x36x32xf32>
    %14 = tpu.matmul %1, %13, %cst_16 {dimension_numbers = #tpu.dot_dimension_numbers<[2], [0], [0, 1], [1], [0, 0, 0, 1, 1, 1], [], []>} : vector<2x36x32xf32>, vector<32x32xf32>, vector<2x36x32xf32> -> vector<2x36x32xf32>
    "tpu.trace_stop"() : () -> ()
    %c0_17 = arith.constant 0 : index
    %c0_18 = arith.constant 0 : index
    %15 = vector.load %arg8[%c0_17, %c0_18] : memref<6x32xf32, #tpu.memory_space<vmem>>, vector<6x32xf32>
    "tpu.trace_start"() <{level = 10 : i32, message = "bns,sh->bnh"}> : () -> ()
    %cst_19 = arith.constant dense<0.000000e+00> : vector<2x36x32xf32>
    %16 = tpu.matmul %2, %15, %cst_19 {dimension_numbers = #tpu.dot_dimension_numbers<[2], [0], [0, 1], [1], [0, 0, 0, 1, 1, 1], [], []>} : vector<2x36x6xf32>, vector<6x32xf32>, vector<2x36x32xf32> -> vector<2x36x32xf32>
    "tpu.trace_stop"() : () -> ()
    %17 = arith.addf %14, %16 : vector<2x36x32xf32>
    %c0_20 = arith.constant 0 : index
    %c0_21 = arith.constant 0 : index
    %18 = vector.load %arg9[%c0_20, %c0_21] : memref<1x32xf32, #tpu.memory_space<vmem>>, vector<1x32xf32>
    %19 = vector.shape_cast %18 : vector<1x32xf32> to vector<1x1x32xf32>
    %20 = vector.broadcast %19 : vector<1x1x32xf32> to vector<2x36x32xf32>
    %21 = arith.addf %17, %20 : vector<2x36x32xf32>
    %22 = math.tanh %21 : vector<2x36x32xf32>
    %c0_22 = arith.constant 0 : index
    %c0_23 = arith.constant 0 : index
    %23 = vector.load %arg10[%c0_22, %c0_23] : memref<32x32xf32, #tpu.memory_space<vmem>>, vector<32x32xf32>
    %c0_24 = arith.constant 0 : index
    %c0_25 = arith.constant 0 : index
    %24 = vector.load %arg11[%c0_24, %c0_25] : memref<1x32xf32, #tpu.memory_space<vmem>>, vector<1x32xf32>
    %c0_26 = arith.constant 0 : index
    %c0_27 = arith.constant 0 : index
    %25 = vector.load %arg12[%c0_26, %c0_27] : memref<32x32xf32, #tpu.memory_space<vmem>>, vector<32x32xf32>
    %c0_28 = arith.constant 0 : index
    %c0_29 = arith.constant 0 : index
    %26 = vector.load %arg13[%c0_28, %c0_29] : memref<1x32xf32, #tpu.memory_space<vmem>>, vector<1x32xf32>
    %cst_30 = arith.constant 3.200000e+01 : f32
    %27 = math.sqrt %cst_30 : f32
    %cst_31 = arith.constant 1.000000e+00 : f32
    %28 = arith.divf %cst_31, %27 : f32
    "tpu.trace_start"() <{level = 10 : i32, message = "bth,hk->btk"}> : () -> ()
    %cst_32 = arith.constant dense<0.000000e+00> : vector<2x8x32xf32>
    %29 = tpu.matmul %10, %23, %cst_32 {dimension_numbers = #tpu.dot_dimension_numbers<[2], [0], [0, 1], [1], [0, 0, 0, 1, 1, 1], [], []>} : vector<2x8x32xf32>, vector<32x32xf32>, vector<2x8x32xf32> -> vector<2x8x32xf32>
    "tpu.trace_stop"() : () -> ()
    %30 = vector.shape_cast %24 : vector<1x32xf32> to vector<1x1x32xf32>
    %31 = vector.broadcast %30 : vector<1x1x32xf32> to vector<2x8x32xf32>
    %32 = arith.addf %29, %31 : vector<2x8x32xf32>
    %33 = math.tanh %32 : vector<2x8x32xf32>
    "tpu.trace_start"() <{level = 10 : i32, message = "bnh,hk->bnk"}> : () -> ()
    %cst_33 = arith.constant dense<0.000000e+00> : vector<2x36x32xf32>
    %34 = tpu.matmul %22, %25, %cst_33 {dimension_numbers = #tpu.dot_dimension_numbers<[2], [0], [0, 1], [1], [0, 0, 0, 1, 1, 1], [], []>} : vector<2x36x32xf32>, vector<32x32xf32>, vector<2x36x32xf32> -> vector<2x36x32xf32>
    "tpu.trace_stop"() : () -> ()
    %35 = vector.shape_cast %26 : vector<1x32xf32> to vector<1x1x32xf32>
    %36 = vector.broadcast %35 : vector<1x1x32xf32> to vector<2x36x32xf32>
    %37 = arith.addf %34, %36 : vector<2x36x32xf32>
    %38 = math.tanh %37 : vector<2x36x32xf32>
    "tpu.trace_start"() <{level = 10 : i32, message = "btk,bnk->btn"}> : () -> ()
    %cst_34 = arith.constant dense<0.000000e+00> : vector<2x8x36xf32>
    %39 = tpu.matmul %33, %38, %cst_34 {dimension_numbers = #tpu.dot_dimension_numbers<[2], [2], [1], [1], [0, 0, 0, 1, 1, 1], [0], [0]>} : vector<2x8x32xf32>, vector<2x36x32xf32>, vector<2x8x36xf32> -> vector<2x8x36xf32>
    "tpu.trace_stop"() : () -> ()
    %40 = vector.broadcast %28 : f32 to vector<2x8x36xf32>
    %41 = arith.mulf %39, %40 : vector<2x8x36xf32>
    "tpu.trace_start"() <{level = 10 : i32, message = "bnk,btk->bnt"}> : () -> ()
    %cst_35 = arith.constant dense<0.000000e+00> : vector<2x36x8xf32>
    %42 = tpu.matmul %38, %33, %cst_35 {dimension_numbers = #tpu.dot_dimension_numbers<[2], [2], [1], [1], [0, 0, 0, 1, 1, 1], [0], [0]>} : vector<2x36x32xf32>, vector<2x8x32xf32>, vector<2x36x8xf32> -> vector<2x36x8xf32>
    "tpu.trace_stop"() : () -> ()
    %43 = vector.broadcast %28 : f32 to vector<2x36x8xf32>
    %44 = arith.mulf %42, %43 : vector<2x36x8xf32>
    %cst_36 = arith.constant dense<0xFF800000> : vector<2x8xf32>
    %45 = vector.multi_reduction <maximumf>, %41, %cst_36 [2] : vector<2x8x36xf32> to vector<2x8xf32>
    %46 = vector.shape_cast %45 : vector<2x8xf32> to vector<2x8x1xf32>
    %47 = vector.broadcast %46 : vector<2x8x1xf32> to vector<2x8x36xf32>
    %48 = arith.subf %41, %47 : vector<2x8x36xf32>
    %49 = math.exp %48 : vector<2x8x36xf32>
    %cst_37 = arith.constant dense<0.000000e+00> : vector<2x8xf32>
    %50 = vector.multi_reduction <add>, %49, %cst_37 [2] : vector<2x8x36xf32> to vector<2x8xf32>
    %51 = vector.shape_cast %50 : vector<2x8xf32> to vector<2x8x1xf32>
    %52 = vector.broadcast %51 : vector<2x8x1xf32> to vector<2x8x36xf32>
    %53 = arith.divf %49, %52 : vector<2x8x36xf32>
    %cst_38 = arith.constant dense<0xFF800000> : vector<2x36xf32>
    %54 = vector.multi_reduction <maximumf>, %44, %cst_38 [2] : vector<2x36x8xf32> to vector<2x36xf32>
    %55 = vector.shape_cast %54 : vector<2x36xf32> to vector<2x36x1xf32>
    %56 = vector.broadcast %55 : vector<2x36x1xf32> to vector<2x36x8xf32>
    %57 = arith.subf %44, %56 : vector<2x36x8xf32>
    %58 = math.exp %57 : vector<2x36x8xf32>
    %cst_39 = arith.constant dense<0.000000e+00> : vector<2x36xf32>
    %59 = vector.multi_reduction <add>, %58, %cst_39 [2] : vector<2x36x8xf32> to vector<2x36xf32>
    %60 = vector.shape_cast %59 : vector<2x36xf32> to vector<2x36x1xf32>
    %61 = vector.broadcast %60 : vector<2x36x1xf32> to vector<2x36x8xf32>
    %62 = arith.divf %58, %61 : vector<2x36x8xf32>
    "tpu.trace_start"() <{level = 10 : i32, message = "btn,bnk->btk"}> : () -> ()
    %cst_40 = arith.constant dense<0.000000e+00> : vector<2x8x32xf32>
    %63 = tpu.matmul %53, %38, %cst_40 {dimension_numbers = #tpu.dot_dimension_numbers<[2], [1], [1], [2], [0, 0, 0, 1, 1, 2], [0], [0]>} : vector<2x8x36xf32>, vector<2x36x32xf32>, vector<2x8x32xf32> -> vector<2x8x32xf32>
    "tpu.trace_stop"() : () -> ()
    %64 = arith.addf %10, %63 : vector<2x8x32xf32>
    "tpu.trace_start"() <{level = 10 : i32, message = "bnt,btk->bnk"}> : () -> ()
    %cst_41 = arith.constant dense<0.000000e+00> : vector<2x36x32xf32>
    %65 = tpu.matmul %62, %33, %cst_41 {dimension_numbers = #tpu.dot_dimension_numbers<[2], [1], [1], [2], [0, 0, 0, 1, 1, 2], [0], [0]>} : vector<2x36x8xf32>, vector<2x8x32xf32>, vector<2x36x32xf32> -> vector<2x36x32xf32>
    "tpu.trace_stop"() : () -> ()
    %66 = arith.addf %22, %65 : vector<2x36x32xf32>
    "tpu.trace_start"() <{level = 10 : i32, message = "bth,hk->btk"}> : () -> ()
    %cst_42 = arith.constant dense<0.000000e+00> : vector<2x8x32xf32>
    %67 = tpu.matmul %64, %23, %cst_42 {dimension_numbers = #tpu.dot_dimension_numbers<[2], [0], [0, 1], [1], [0, 0, 0, 1, 1, 1], [], []>} : vector<2x8x32xf32>, vector<32x32xf32>, vector<2x8x32xf32> -> vector<2x8x32xf32>
    "tpu.trace_stop"() : () -> ()
    %68 = vector.shape_cast %24 : vector<1x32xf32> to vector<1x1x32xf32>
    %69 = vector.broadcast %68 : vector<1x1x32xf32> to vector<2x8x32xf32>
    %70 = arith.addf %67, %69 : vector<2x8x32xf32>
    %71 = math.tanh %70 : vector<2x8x32xf32>
    "tpu.trace_start"() <{level = 10 : i32, message = "bnh,hk->bnk"}> : () -> ()
    %cst_43 = arith.constant dense<0.000000e+00> : vector<2x36x32xf32>
    %72 = tpu.matmul %66, %25, %cst_43 {dimension_numbers = #tpu.dot_dimension_numbers<[2], [0], [0, 1], [1], [0, 0, 0, 1, 1, 1], [], []>} : vector<2x36x32xf32>, vector<32x32xf32>, vector<2x36x32xf32> -> vector<2x36x32xf32>
    "tpu.trace_stop"() : () -> ()
    %73 = vector.shape_cast %26 : vector<1x32xf32> to vector<1x1x32xf32>
    %74 = vector.broadcast %73 : vector<1x1x32xf32> to vector<2x36x32xf32>
    %75 = arith.addf %72, %74 : vector<2x36x32xf32>
    %76 = math.tanh %75 : vector<2x36x32xf32>
    "tpu.trace_start"() <{level = 10 : i32, message = "btk,bnk->btn"}> : () -> ()
    %cst_44 = arith.constant dense<0.000000e+00> : vector<2x8x36xf32>
    %77 = tpu.matmul %71, %76, %cst_44 {dimension_numbers = #tpu.dot_dimension_numbers<[2], [2], [1], [1], [0, 0, 0, 1, 1, 1], [0], [0]>} : vector<2x8x32xf32>, vector<2x36x32xf32>, vector<2x8x36xf32> -> vector<2x8x36xf32>
    "tpu.trace_stop"() : () -> ()
    %78 = vector.broadcast %28 : f32 to vector<2x8x36xf32>
    %79 = arith.mulf %77, %78 : vector<2x8x36xf32>
    "tpu.trace_start"() <{level = 10 : i32, message = "bnk,btk->bnt"}> : () -> ()
    %cst_45 = arith.constant dense<0.000000e+00> : vector<2x36x8xf32>
    %80 = tpu.matmul %76, %71, %cst_45 {dimension_numbers = #tpu.dot_dimension_numbers<[2], [2], [1], [1], [0, 0, 0, 1, 1, 1], [0], [0]>} : vector<2x36x32xf32>, vector<2x8x32xf32>, vector<2x36x8xf32> -> vector<2x36x8xf32>
    "tpu.trace_stop"() : () -> ()
    %81 = vector.broadcast %28 : f32 to vector<2x36x8xf32>
    %82 = arith.mulf %80, %81 : vector<2x36x8xf32>
    %cst_46 = arith.constant dense<0xFF800000> : vector<2x8xf32>
    %83 = vector.multi_reduction <maximumf>, %79, %cst_46 [2] : vector<2x8x36xf32> to vector<2x8xf32>
    %84 = vector.shape_cast %83 : vector<2x8xf32> to vector<2x8x1xf32>
    %85 = vector.broadcast %84 : vector<2x8x1xf32> to vector<2x8x36xf32>
    %86 = arith.subf %79, %85 : vector<2x8x36xf32>
    %87 = math.exp %86 : vector<2x8x36xf32>
    %cst_47 = arith.constant dense<0.000000e+00> : vector<2x8xf32>
    %88 = vector.multi_reduction <add>, %87, %cst_47 [2] : vector<2x8x36xf32> to vector<2x8xf32>
    %89 = vector.shape_cast %88 : vector<2x8xf32> to vector<2x8x1xf32>
    %90 = vector.broadcast %89 : vector<2x8x1xf32> to vector<2x8x36xf32>
    %91 = arith.divf %87, %90 : vector<2x8x36xf32>
    %cst_48 = arith.constant dense<0xFF800000> : vector<2x36xf32>
    %92 = vector.multi_reduction <maximumf>, %82, %cst_48 [2] : vector<2x36x8xf32> to vector<2x36xf32>
    %93 = vector.shape_cast %92 : vector<2x36xf32> to vector<2x36x1xf32>
    %94 = vector.broadcast %93 : vector<2x36x1xf32> to vector<2x36x8xf32>
    %95 = arith.subf %82, %94 : vector<2x36x8xf32>
    %96 = math.exp %95 : vector<2x36x8xf32>
    %cst_49 = arith.constant dense<0.000000e+00> : vector<2x36xf32>
    %97 = vector.multi_reduction <add>, %96, %cst_49 [2] : vector<2x36x8xf32> to vector<2x36xf32>
    %98 = vector.shape_cast %97 : vector<2x36xf32> to vector<2x36x1xf32>
    %99 = vector.broadcast %98 : vector<2x36x1xf32> to vector<2x36x8xf32>
    %100 = arith.divf %96, %99 : vector<2x36x8xf32>
    "tpu.trace_start"() <{level = 10 : i32, message = "btn,bnk->btk"}> : () -> ()
    %cst_50 = arith.constant dense<0.000000e+00> : vector<2x8x32xf32>
    %101 = tpu.matmul %91, %76, %cst_50 {dimension_numbers = #tpu.dot_dimension_numbers<[2], [1], [1], [2], [0, 0, 0, 1, 1, 2], [0], [0]>} : vector<2x8x36xf32>, vector<2x36x32xf32>, vector<2x8x32xf32> -> vector<2x8x32xf32>
    "tpu.trace_stop"() : () -> ()
    %102 = arith.addf %64, %101 : vector<2x8x32xf32>
    "tpu.trace_start"() <{level = 10 : i32, message = "bnt,btk->bnk"}> : () -> ()
    %cst_51 = arith.constant dense<0.000000e+00> : vector<2x36x32xf32>
    %103 = tpu.matmul %100, %71, %cst_51 {dimension_numbers = #tpu.dot_dimension_numbers<[2], [1], [1], [2], [0, 0, 0, 1, 1, 2], [0], [0]>} : vector<2x36x8xf32>, vector<2x8x32xf32>, vector<2x36x32xf32> -> vector<2x36x32xf32>
    "tpu.trace_stop"() : () -> ()
    %104 = arith.addf %66, %103 : vector<2x36x32xf32>
    %105 = vector.extract_strided_slice %102 {offsets = [0, 0, 0], sizes = [2, 1, 32], strides = [1, 1, 1]} : vector<2x8x32xf32> to vector<2x1x32xf32>
    %106 = vector.broadcast %105 : vector<2x1x32xf32> to vector<2x36x32xf32>
    %107 = arith.addf %104, %106 : vector<2x36x32xf32>
    "tpu.trace_start"() <{level = 10 : i32, message = "bth,hk->btk"}> : () -> ()
    %cst_52 = arith.constant dense<0.000000e+00> : vector<2x8x32xf32>
    %108 = tpu.matmul %102, %23, %cst_52 {dimension_numbers = #tpu.dot_dimension_numbers<[2], [0], [0, 1], [1], [0, 0, 0, 1, 1, 1], [], []>} : vector<2x8x32xf32>, vector<32x32xf32>, vector<2x8x32xf32> -> vector<2x8x32xf32>
    "tpu.trace_stop"() : () -> ()
    %109 = vector.shape_cast %24 : vector<1x32xf32> to vector<1x1x32xf32>
    %110 = vector.broadcast %109 : vector<1x1x32xf32> to vector<2x8x32xf32>
    %111 = arith.addf %108, %110 : vector<2x8x32xf32>
    %112 = math.tanh %111 : vector<2x8x32xf32>
    "tpu.trace_start"() <{level = 10 : i32, message = "bnh,hk->bnk"}> : () -> ()
    %cst_53 = arith.constant dense<0.000000e+00> : vector<2x36x32xf32>
    %113 = tpu.matmul %107, %25, %cst_53 {dimension_numbers = #tpu.dot_dimension_numbers<[2], [0], [0, 1], [1], [0, 0, 0, 1, 1, 1], [], []>} : vector<2x36x32xf32>, vector<32x32xf32>, vector<2x36x32xf32> -> vector<2x36x32xf32>
    "tpu.trace_stop"() : () -> ()
    %114 = vector.shape_cast %26 : vector<1x32xf32> to vector<1x1x32xf32>
    %115 = vector.broadcast %114 : vector<1x1x32xf32> to vector<2x36x32xf32>
    %116 = arith.addf %113, %115 : vector<2x36x32xf32>
    %117 = math.tanh %116 : vector<2x36x32xf32>
    "tpu.trace_start"() <{level = 10 : i32, message = "btk,bnk->btn"}> : () -> ()
    %cst_54 = arith.constant dense<0.000000e+00> : vector<2x8x36xf32>
    %118 = tpu.matmul %112, %117, %cst_54 {dimension_numbers = #tpu.dot_dimension_numbers<[2], [2], [1], [1], [0, 0, 0, 1, 1, 1], [0], [0]>} : vector<2x8x32xf32>, vector<2x36x32xf32>, vector<2x8x36xf32> -> vector<2x8x36xf32>
    "tpu.trace_stop"() : () -> ()
    %119 = vector.broadcast %28 : f32 to vector<2x8x36xf32>
    %120 = arith.mulf %118, %119 : vector<2x8x36xf32>
    %cst_55 = arith.constant dense<0xFF800000> : vector<2x8xf32>
    %121 = vector.multi_reduction <maximumf>, %120, %cst_55 [2] : vector<2x8x36xf32> to vector<2x8xf32>
    %122 = vector.shape_cast %121 : vector<2x8xf32> to vector<2x8x1xf32>
    %123 = vector.broadcast %122 : vector<2x8x1xf32> to vector<2x8x36xf32>
    %124 = arith.subf %120, %123 : vector<2x8x36xf32>
    %125 = math.exp %124 : vector<2x8x36xf32>
    %cst_56 = arith.constant dense<0.000000e+00> : vector<2x8xf32>
    %126 = vector.multi_reduction <add>, %125, %cst_56 [2] : vector<2x8x36xf32> to vector<2x8xf32>
    %127 = vector.shape_cast %126 : vector<2x8xf32> to vector<2x8x1xf32>
    %128 = vector.broadcast %127 : vector<2x8x1xf32> to vector<2x8x36xf32>
    %129 = arith.divf %125, %128 : vector<2x8x36xf32>
    "tpu.trace_start"() <{level = 10 : i32, message = "btn,bnk->btk"}> : () -> ()
    %cst_57 = arith.constant dense<0.000000e+00> : vector<2x8x32xf32>
    %130 = tpu.matmul %129, %117, %cst_57 {dimension_numbers = #tpu.dot_dimension_numbers<[2], [1], [1], [2], [0, 0, 0, 1, 1, 2], [0], [0]>} : vector<2x8x36xf32>, vector<2x36x32xf32>, vector<2x8x32xf32> -> vector<2x8x32xf32>
    "tpu.trace_stop"() : () -> ()
    %131 = arith.addf %102, %130 : vector<2x8x32xf32>
    %c0_58 = arith.constant 0 : index
    %c0_59 = arith.constant 0 : index
    %132 = vector.load %arg14[%c0_58, %c0_59] : memref<32x32xf32, #tpu.memory_space<vmem>>, vector<32x32xf32>
    "tpu.trace_start"() <{level = 10 : i32, message = "bnd,dh->bnh"}> : () -> ()
    %cst_60 = arith.constant dense<0.000000e+00> : vector<2x36x32xf32>
    %133 = tpu.matmul %1, %132, %cst_60 {dimension_numbers = #tpu.dot_dimension_numbers<[2], [0], [0, 1], [1], [0, 0, 0, 1, 1, 1], [], []>} : vector<2x36x32xf32>, vector<32x32xf32>, vector<2x36x32xf32> -> vector<2x36x32xf32>
    "tpu.trace_stop"() : () -> ()
    %c0_61 = arith.constant 0 : index
    %c0_62 = arith.constant 0 : index
    %134 = vector.load %arg15[%c0_61, %c0_62] : memref<32x32xf32, #tpu.memory_space<vmem>>, vector<32x32xf32>
    %cst_63 = arith.constant dense<0.000000e+00> : vector<2x32xf32>
    %135 = tpu.matmul %12, %134, %cst_63 {dimension_numbers = #tpu.dot_dimension_numbers<[1], [0], [0], [1], [0, 0, 1, 1], [], []>} : vector<2x32xf32>, vector<32x32xf32>, vector<2x32xf32> -> vector<2x32xf32>
    %136 = vector.shape_cast %135 : vector<2x32xf32> to vector<2x1x32xf32>
    %137 = vector.broadcast %136 : vector<2x1x32xf32> to vector<2x36x32xf32>
    %138 = arith.addf %133, %137 : vector<2x36x32xf32>
    %cst_64 = arith.constant 0.000000e+00 : f32
    %139 = vector.broadcast %cst_64 : f32 to vector<2x36x32xf32>
    %140 = arith.maximumf %138, %139 : vector<2x36x32xf32>
    %c0_65 = arith.constant 0 : index
    %c0_66 = arith.constant 0 : index
    %141 = vector.load %arg16[%c0_65, %c0_66] : memref<1x32xf32, #tpu.memory_space<vmem>>, vector<1x32xf32>
    %142 = vector.shape_cast %141 : vector<1x32xf32> to vector<1x1x32xf32>
    %143 = vector.broadcast %142 : vector<1x1x32xf32> to vector<2x36x32xf32>
    %144 = arith.mulf %140, %143 : vector<2x36x32xf32>
    %cst_67 = arith.constant dense<0.000000e+00> : vector<2x36xf32>
    %145 = vector.multi_reduction <add>, %144, %cst_67 [2] : vector<2x36x32xf32> to vector<2x36xf32>
    %c0_68 = arith.constant 0 : index
    %c0_69 = arith.constant 0 : index
    %146 = vector.load %arg17[%c0_68, %c0_69] : memref<1x1xf32, #tpu.memory_space<vmem>>, vector<1x1xf32>
    %147 = vector.broadcast %146 : vector<1x1xf32> to vector<2x36xf32>
    %148 = arith.addf %145, %147 : vector<2x36xf32>
    %149 = vector.shape_cast %148 : vector<2x36xf32> to vector<1x2x36xf32>
    %cst_70 = arith.constant dense<0xFF800000> : vector<1xf32>
    %150 = vector.multi_reduction <maximumf>, %149, %cst_70 [1, 2] : vector<1x2x36xf32> to vector<1xf32>
    %151 = vector.shape_cast %150 : vector<1xf32> to vector<1x1x1xf32>
    %152 = vector.extract %151[0, 0, 0] : f32 from vector<1x1x1xf32>
    %153 = vector.broadcast %152 : f32 to vector<2x36xf32>
    %154 = arith.subf %148, %153 : vector<2x36xf32>
    %155 = math.exp %154 : vector<2x36xf32>
    %156 = arith.mulf %155, %3 : vector<2x36xf32>
    %cst_71 = arith.constant dense<0.000000e+00> : vector<2xf32>
    %157 = vector.multi_reduction <add>, %156, %cst_71 [1] : vector<2x36xf32> to vector<2xf32>
    %158 = vector.shape_cast %157 : vector<2xf32> to vector<2x1xf32>
    %cst_72 = arith.constant 9.99999974E-6 : f32
    %159 = vector.broadcast %cst_72 : f32 to vector<2x1xf32>
    %160 = arith.addf %158, %159 : vector<2x1xf32>
    %161 = vector.broadcast %160 : vector<2x1xf32> to vector<2x36xf32>
    %162 = arith.divf %156, %161 : vector<2x36xf32>
    %163 = vector.shape_cast %162 : vector<2x36xf32> to vector<2x36x1xf32>
    %164 = vector.broadcast %163 : vector<2x36x1xf32> to vector<2x36x32xf32>
    %165 = arith.mulf %164, %1 : vector<2x36x32xf32>
    %cst_73 = arith.constant dense<0.000000e+00> : vector<2x32xf32>
    %166 = vector.multi_reduction <add>, %165, %cst_73 [1] : vector<2x36x32xf32> to vector<2x32xf32>
    %c0_74 = arith.constant 0 : index
    %c0_75 = arith.constant 0 : index
    %167 = vector.load %arg18[%c0_74, %c0_75] : memref<32x32xf32, #tpu.memory_space<vmem>>, vector<32x32xf32>
    %cst_76 = arith.constant dense<0.000000e+00> : vector<2x32xf32>
    %168 = tpu.matmul %12, %167, %cst_76 {dimension_numbers = #tpu.dot_dimension_numbers<[1], [0], [0], [1], [0, 0, 1, 1], [], []>} : vector<2x32xf32>, vector<32x32xf32>, vector<2x32xf32> -> vector<2x32xf32>
    %c0_77 = arith.constant 0 : index
    %c0_78 = arith.constant 0 : index
    %169 = vector.load %arg19[%c0_77, %c0_78] : memref<1x32xf32, #tpu.memory_space<vmem>>, vector<1x32xf32>
    %170 = vector.broadcast %169 : vector<1x32xf32> to vector<2x32xf32>
    %171 = arith.addf %168, %170 : vector<2x32xf32>
    %cst_79 = arith.constant 0.000000e+00 : f32
    %172 = vector.broadcast %cst_79 : f32 to vector<2x32xf32>
    %173 = arith.maximumf %171, %172 : vector<2x32xf32>
    %c0_80 = arith.constant 0 : index
    %c0_81 = arith.constant 0 : index
    %174 = vector.load %arg20[%c0_80, %c0_81] : memref<32x32xf32, #tpu.memory_space<vmem>>, vector<32x32xf32>
    %cst_82 = arith.constant dense<0.000000e+00> : vector<2x32xf32>
    %175 = tpu.matmul %166, %174, %cst_82 {dimension_numbers = #tpu.dot_dimension_numbers<[1], [0], [0], [1], [0, 0, 1, 1], [], []>} : vector<2x32xf32>, vector<32x32xf32>, vector<2x32xf32> -> vector<2x32xf32>
    %c0_83 = arith.constant 0 : index
    %c0_84 = arith.constant 0 : index
    %176 = vector.load %arg21[%c0_83, %c0_84] : memref<1x32xf32, #tpu.memory_space<vmem>>, vector<1x32xf32>
    %177 = vector.broadcast %176 : vector<1x32xf32> to vector<2x32xf32>
    %178 = arith.addf %175, %177 : vector<2x32xf32>
    %cst_85 = arith.constant 0.000000e+00 : f32
    %179 = vector.broadcast %cst_85 : f32 to vector<2x32xf32>
    %180 = arith.maximumf %178, %179 : vector<2x32xf32>
    %181 = arith.mulf %180, %173 : vector<2x32xf32>
    %182 = vector.extract_strided_slice %131 {offsets = [0, 0, 0], sizes = [2, 1, 32], strides = [1, 1, 1]} : vector<2x8x32xf32> to vector<2x1x32xf32>
    %183 = vector.shape_cast %182 : vector<2x1x32xf32> to vector<2x32xf32>
    %184 = tpu.concatenate %183, %181 in 0 : vector<2x32xf32>, vector<2x32xf32> -> vector<4x32xf32>
    %c0_86 = arith.constant 0 : index
    %c0_87 = arith.constant 0 : index
    %185 = vector.load %arg22[%c0_86, %c0_87] : memref<32x16xf32, #tpu.memory_space<vmem>>, vector<32x16xf32>
    %cst_88 = arith.constant dense<0.000000e+00> : vector<4x16xf32>
    %186 = tpu.matmul %184, %185, %cst_88 {dimension_numbers = #tpu.dot_dimension_numbers<[1], [0], [0], [1], [0, 0, 1, 1], [], []>} : vector<4x32xf32>, vector<32x16xf32>, vector<4x16xf32> -> vector<4x16xf32>
    %c0_89 = arith.constant 0 : index
    %c0_90 = arith.constant 0 : index
    %187 = vector.load %arg23[%c0_89, %c0_90] : memref<1x16xf32, #tpu.memory_space<vmem>>, vector<1x16xf32>
    %188 = vector.broadcast %187 : vector<1x16xf32> to vector<4x16xf32>
    %189 = arith.addf %186, %188 : vector<4x16xf32>
    %190 = vector.extract_strided_slice %189 {offsets = [0, 0], sizes = [2, 16], strides = [1, 1]} : vector<4x16xf32> to vector<2x16xf32>
    %191 = vector.extract_strided_slice %189 {offsets = [2, 0], sizes = [2, 16], strides = [1, 1]} : vector<4x16xf32> to vector<2x16xf32>
    %192 = arith.addf %190, %191 : vector<2x16xf32>
    %c0_91 = arith.constant 0 : index
    %c0_92 = arith.constant 0 : index
    %193 = vector.load %arg24[%c0_91, %c0_92] : memref<2x16xf32, #tpu.memory_space<vmem>>, vector<2x16xf32>
    tpu.vector_store %arg24[%c0_91, %c0_92], %192 {strides = array<i32>} : memref<2x16xf32, #tpu.memory_space<vmem>>, vector<2x16xf32>,
    return
  }
  func.func @transform_0(%arg0: i32) -> (i32, i32, i32) {
    %c0_i32 = arith.constant 0 : i32
    %c0_i32_0 = arith.constant 0 : i32
    %c0_i32_1 = arith.constant 0 : i32
    %c0_i32_2 = arith.constant 0 : i32
    return %c0_i32, %c0_i32_0, %c0_i32_1 : i32, i32, i32
  }
  func.func @transform_1(%arg0: i32) -> (i32, i32, i32) {
    %c0_i32 = arith.constant 0 : i32
    %c0_i32_0 = arith.constant 0 : i32
    %c0_i32_1 = arith.constant 0 : i32
    %c0_i32_2 = arith.constant 0 : i32
    return %c0_i32, %c0_i32_0, %c0_i32_1 : i32, i32, i32
  }
  func.func @transform_2(%arg0: i32) -> (i32, i32, i32) {
    %c0_i32 = arith.constant 0 : i32
    %c0_i32_0 = arith.constant 0 : i32
    %c0_i32_1 = arith.constant 0 : i32
    %c0_i32_2 = arith.constant 0 : i32
    return %c0_i32, %c0_i32_0, %c0_i32_1 : i32, i32, i32
  }
  func.func @transform_3(%arg0: i32) -> (i32, i32) {
    %c0_i32 = arith.constant 0 : i32
    %c0_i32_0 = arith.constant 0 : i32
    %c0_i32_1 = arith.constant 0 : i32
    return %c0_i32, %c0_i32_0 : i32, i32
  }
  func.func @transform_4(%arg0: i32) -> (i32, i32) {
    %c0_i32 = arith.constant 0 : i32
    %c0_i32_0 = arith.constant 0 : i32
    %c0_i32_1 = arith.constant 0 : i32
    return %c0_i32, %c0_i32_0 : i32, i32
  }
  func.func @transform_5(%arg0: i32) -> (i32, i32) {
    %c0_i32 = arith.constant 0 : i32
    %c0_i32_0 = arith.constant 0 : i32
    %c0_i32_1 = arith.constant 0 : i32
    return %c0_i32, %c0_i32_0 : i32, i32
  }
  func.func @transform_6(%arg0: i32) -> (i32, i32) {
    %c0_i32 = arith.constant 0 : i32
    %c0_i32_0 = arith.constant 0 : i32
    %c0_i32_1 = arith.constant 0 : i32
    return %c0_i32, %c0_i32_0 : i32, i32
  }
  func.func @transform_7(%arg0: i32) -> (i32, i32) {
    %c0_i32 = arith.constant 0 : i32
    %c0_i32_0 = arith.constant 0 : i32
    %c0_i32_1 = arith.constant 0 : i32
    return %c0_i32, %c0_i32_0 : i32, i32
  }
  func.func @transform_8(%arg0: i32) -> (i32, i32) {
    %c0_i32 = arith.constant 0 : i32
    %c0_i32_0 = arith.constant 0 : i32
    %c0_i32_1 = arith.constant 0 : i32
    return %c0_i32, %c0_i32_0 : i32, i32
  }
  func.func @transform_9(%arg0: i32) -> (i32, i32) {
    %c0_i32 = arith.constant 0 : i32
    %c0_i32_0 = arith.constant 0 : i32
    %c0_i32_1 = arith.constant 0 : i32
    return %c0_i32, %c0_i32_0 : i32, i32
  }
  func.func @transform_10(%arg0: i32) -> (i32, i32) {
    %c0_i32 = arith.constant 0 : i32
    %c0_i32_0 = arith.constant 0 : i32
    %c0_i32_1 = arith.constant 0 : i32
    return %c0_i32, %c0_i32_0 : i32, i32
  }
  func.func @transform_11(%arg0: i32) -> (i32, i32) {
    %c0_i32 = arith.constant 0 : i32
    %c0_i32_0 = arith.constant 0 : i32
    %c0_i32_1 = arith.constant 0 : i32
    return %c0_i32, %c0_i32_0 : i32, i32
  }
  func.func @transform_12(%arg0: i32) -> (i32, i32) {
    %c0_i32 = arith.constant 0 : i32
    %c0_i32_0 = arith.constant 0 : i32
    %c0_i32_1 = arith.constant 0 : i32
    return %c0_i32, %c0_i32_0 : i32, i32
  }
  func.func @transform_13(%arg0: i32) -> (i32, i32) {
    %c0_i32 = arith.constant 0 : i32
    %c0_i32_0 = arith.constant 0 : i32
    %c0_i32_1 = arith.constant 0 : i32
    return %c0_i32, %c0_i32_0 : i32, i32
  }
  func.func @transform_14(%arg0: i32) -> (i32, i32) {
    %c0_i32 = arith.constant 0 : i32
    %c0_i32_0 = arith.constant 0 : i32
    %c0_i32_1 = arith.constant 0 : i32
    return %c0_i32, %c0_i32_0 : i32, i32
  }
  func.func @transform_15(%arg0: i32) -> (i32, i32) {
    %c0_i32 = arith.constant 0 : i32
    %c0_i32_0 = arith.constant 0 : i32
    %c0_i32_1 = arith.constant 0 : i32
    return %c0_i32, %c0_i32_0 : i32, i32
  }
  func.func @transform_16(%arg0: i32) -> (i32, i32) {
    %c0_i32 = arith.constant 0 : i32
    %c0_i32_0 = arith.constant 0 : i32
    %c0_i32_1 = arith.constant 0 : i32
    return %c0_i32, %c0_i32_0 : i32, i32
  }
  func.func @transform_17(%arg0: i32) -> (i32, i32) {
    %c0_i32 = arith.constant 0 : i32
    %c0_i32_0 = arith.constant 0 : i32
    %c0_i32_1 = arith.constant 0 : i32
    return %c0_i32, %c0_i32_0 : i32, i32
  }
  func.func @transform_18(%arg0: i32) -> (i32, i32) {
    %c0_i32 = arith.constant 0 : i32
    %c0_i32_0 = arith.constant 0 : i32
    %c0_i32_1 = arith.constant 0 : i32
    return %c0_i32, %c0_i32_0 : i32, i32
  }
  func.func @transform_19(%arg0: i32) -> (i32, i32) {
    %c0_i32 = arith.constant 0 : i32
    %c0_i32_0 = arith.constant 0 : i32
    %c0_i32_1 = arith.constant 0 : i32
    return %c0_i32, %c0_i32_0 : i32, i32
  }
  func.func @transform_20(%arg0: i32) -> (i32, i32) {
    %c0_i32 = arith.constant 0 : i32
    %c0_i32_0 = arith.constant 0 : i32
    %c0_i32_1 = arith.constant 0 : i32
    return %c0_i32, %c0_i32_0 : i32, i32
  }
  func.func @transform_21(%arg0: i32) -> (i32, i32) {
    %c0_i32 = arith.constant 0 : i32
    %c0_i32_0 = arith.constant 0 : i32
    %c0_i32_1 = arith.constant 0 : i32
    return %c0_i32, %c0_i32_0 : i32, i32
  }
  func.func @transform_22(%arg0: i32) -> (i32, i32) {
    %c0_i32 = arith.constant 0 : i32
    %c0_i32_0 = arith.constant 0 : i32
    %c0_i32_1 = arith.constant 0 : i32
    return %c0_i32, %c0_i32_0 : i32, i32
  }
  func.func @transform_23(%arg0: i32) -> (i32, i32) {
    %c0_i32 = arith.constant 0 : i32
    %c0_i32_0 = arith.constant 0 : i32
    %c0_i32_1 = arith.constant 0 : i32
    return %c0_i32, %c0_i32_0 : i32, i32
  }
}

</mosaic_0001>

<bundles_post_ra>
// kernel: _forward_impl.1
= control target key start
LH: loop header
LB: loop body
LE: loop exit
PB: predicated region body
PF: predicated region fallthrough
CT: control target
= control target key end

     0   :  { %s6028_s0 = inlined_call_operand.vmem [shape: f32[2,8,32], index: 0, kind: input, shape index: {}]   ;;  %s6029_s1 = inlined_call_operand.vmem [shape: f32[2,36,32], index: 1, kind: input, shape index: {}]   ;;  %s6030_s2 = inlined_call_operand.vmem [shape: f32[2,36,6], index: 2, kind: input, shape index: {}]   ;;  %s6031_s3 = inlined_call_operand.vmem [shape: f32[2,36], index: 3, kind: input, shape index: {}]   ;;  %s6032_s4 = inlined_call_operand.vmem [shape: f32[32,32], index: 4, kind: input, shape index: {}]   ;;  %s6033_s5 = inlined_call_operand.vmem [shape: f32[1,32], index: 5, kind: input, shape index: {}]   ;;  %s6034_s6 = inlined_call_operand.vmem [shape: f32[32,32], index: 6, kind: input, shape index: {}]   ;;  %s6035_s7 = inlined_call_operand.vmem [shape: f32[6,32], index: 7, kind: input, shape index: {}]   ;;  %s6036_s8 = inlined_call_operand.vmem [shape: f32[1,32], index: 8, kind: input, shape index: {}]   ;;  %s6037_s9 = inlined_call_operand.vmem [shape: f32[32,32], index: 9, kind: input, shape index: {}]   ;;  %s6038_s10 = inlined_call_operand.vmem [shape: f32[1,32], index: 10, kind: input, shape index: {}]   ;;  %s6039_s11 = inlined_call_operand.vmem [shape: f32[32,32], index: 11, kind: input, shape index: {}]   ;;  %s6040_s12 = inlined_call_operand.vmem [shape: f32[1,32], index: 12, kind: input, shape index: {}]   ;;  %s6041_s13 = inlined_call_operand.vmem [shape: f32[32,32], index: 13, kind: input, shape index: {}]   ;;  %s6042_s14 = inlined_call_operand.vmem [shape: f32[32,32], index: 14, kind: input, shape index: {}]   ;;  %s6043_s15 = inlined_call_operand.vmem [shape: f32[1,32], index: 15, kind: input, shape index: {}]   ;;  %s6044_s16 = inlined_call_operand.<no memory space> [shape: f32[1,1], index: 16, kind: input, shape index: {}]   ;;  %s6045_s17 = inlined_call_operand.vmem [shape: f32[32,32], index: 17, kind: input, shape index: {}]   ;;  %s6046_s18 = inlined_call_operand.vmem [shape: f32[1,32], index: 18, kind: input, shape index: {}]   ;;  %s6047_s19 = inlined_call_operand.vmem [shape: f32[32,32], index: 19, kind: input, shape index: {}]   ;;  %s6048_s20 = inlined_call_operand.vmem [shape: f32[1,32], index: 20, kind: input, shape index: {}]   ;;  %s6049_s21 = inlined_call_operand.vmem [shape: f32[32,16], index: 21, kind: input, shape index: {}]   ;;  %s6050_s22 = inlined_call_operand.vmem [shape: f32[1,16], index: 22, kind: input, shape index: {}]   ;;  %s6051_s23 = inlined_call_operand.hbm [shape: f32[2,16], index: 23, kind: output, shape index: {}]  }
   0x1   :  { %6077 = sst [smem:[#allocation12_spill]] %s6028_s0  ;;  %v28_v0 = vstv %s6044_s16 }
   0x2   :  { %6078 = sst [smem:[#allocation13_spill]] %s6029_s1  ;;  %29 = vst [vmem:[#allocation2] sm:$0x1] %v28_v0 }
   0x3   :  { %6079 = sst [smem:[#allocation14_spill]] %s6030_s2 }
   0x4   :  { %6080 = sst [smem:[#allocation15_spill]] %s6031_s3 }
   0x5   :  { %6081 = sst [smem:[#allocation16_spill]] %s6032_s4 }
   0x6   :  { %6082 = sst [smem:[#allocation17_spill]] %s6033_s5 }
   0x7   :  { %6083 = sst [smem:[#allocation18_spill]] %s6034_s6 }
   0x8   :  { %6084 = sst [smem:[#allocation19_spill]] %s6035_s7 }
   0x9   :  { %s6085_s5 = sld [smem:[#allocation19_spill]]  ;;  %vm216_vm0 = vcmask 1045504   ;;  %vm197_vm1 = vcmask 48128  }
   0xa   :  { %s6086_s2 = sld [smem:[#allocation14_spill]] }
   0xb   :  { %s6087_s7 = sld [smem:[#allocation18_spill]] }
   0xf   :  { %v144_v1 = vld [vmem:[%s6085_s5] sm:$0x3f] }
  0x10   :  { %v89_v2 = vld [vmem:[%s6086_s2] sm:$0xff]  ;;  %4035 = vmatpush.msk.msra.mxu2 %vm216_vm0, %v144_v1  ;;  %3878 = vmatpush.msk.msra.mxu1 %vm216_vm0, %v144_v1  ;;  %v90_v7 = vld [vmem:[%s6086_s2 + $0x8] sm:$0xff]  ;;  %v91_v8 = vld [vmem:[%s6086_s2 + $0x10] sm:$0xff] }
  0x11   :  { %v155_v3 = vrot.slane %v89_v2, 4  ;;  %163 = vst [vmem:[#allocation1] ss:$2 sm:$0xff] %v89_v2  ;;  %v143_v4 = vld [vmem:[%s6087_s7 + $0x18] sm:$0xff]  ;;  %v142_v5 = vld [vmem:[%s6087_s7 + $0x10] sm:$0xff]  ;;  %v141_v6 = vld [vmem:[%s6087_s7 + $0x8] sm:$0xff] }
  0x12   :  { %346 = vmatpush.msrb.mxu2 %v143_v4  ;;  %v156_v9 = vrot.slane %v90_v7, 4  ;;  %167 = vst [vmem:[#allocation1 + $0x10] ss:$2 sm:$0xff] %v90_v7  ;;  %v157_v10 = vrot.slane %v91_v8, 4  ;;  %v93_v11 = vld [vmem:[%s6086_s2 + $0x20] sm:$0xf] }
  0x13   :  { %165 = vst [vmem:[#allocation1 + $0x1] ss:$2 sm:$0xff] %v155_v3  ;;  %v140_v12 = vld [vmem:[%s6087_s7] sm:$0xff]  ;;  %v92_v13 = vld [vmem:[%s6086_s2 + $0x18] sm:$0xff]  ;;  %v94_v14 = vld [vmem:[%s6086_s2 + $0x28] sm:$0xff] }
  0x14   :  { %347 = vmatpush.msrb.mxu2 %v142_v5  ;;  %171 = vst [vmem:[#allocation1 + $0x20] ss:$2 sm:$0xff] %v91_v8  ;;  %v158_v15 = vrot.slane %v92_v13, 4  ;;  %v159_v17 = vrot.slane %v94_v14, 4  ;;  %v95_v18 = vld [vmem:[%s6086_s2 + $0x30] sm:$0xff]  ;;  %v97_v19 = vld [vmem:[%s6086_s2 + $0x40] sm:$0xff] }
  0x15   :  { %169 = vst [vmem:[#allocation1 + $0x11] ss:$2 sm:$0xff] %v156_v9  ;;  %v160_v20 = vrot.slane %v95_v18, 4 }
  0x16   :  { %348 = vmatpush.msrb.mxu2 %v141_v6  ;;  %173 = vst [vmem:[#allocation1 + $0x21] ss:$2 sm:$0xff] %v157_v10 }
  0x17   :  { %175 = vst [vmem:[#allocation1 + $0x30] ss:$2 sm:$0xff] %v92_v13 }
  0x18   :  { %349 = vmatpush.msrb.mxu2 %v140_v12  ;;  %177 = vst [vmem:[#allocation1 + $0x31] ss:$2 sm:$0xff] %v158_v15 }
  0x1a   :  { %v178_v16 = vld.sshfl [vmem:[#allocation1] sm:$0xff pattern:$0x75316420] }
  0x1b   :  { %182 = vst [vmem:[#allocation1] ss:$2 sm:$0xff] %v93_v11  ;;  %3879 = vmatmul.msk.f32.vlgmr.msra.gmra.mxu1 %vm197_vm1, %v178_v16 }
  0x1c   :  { %183 = vst [vmem:[#allocation1 + $0x1] ss:$2 sm:$0xff] %v94_v14 }
  0x1d   :  { %30 = vsyncpa [#allocation4], 0  ;;  %v179_v21 = vld.sshfl [vmem:[#allocation1 + $0x10] sm:$0xff pattern:$0x75316420]  ;;  %v96_v22 = vld [vmem:[%s6086_s2 + $0x38] sm:$0xff] }
  0x1e   :  { %184 = vst [vmem:[#allocation1 + $0x10] ss:$2 sm:$0xff] %v159_v17  ;;  %v161_v23 = vrot.slane %v96_v22, 4  ;;  %v180_v24 = vld.sshfl [vmem:[#allocation1 + $0x20] sm:$0xff pattern:$0x75316420] }
  0x1f   :  { %v162_v25 = vrot.slane %v97_v19, 4  ;;  %185 = vst [vmem:[#allocation1 + $0x11] ss:$2 sm:$0xff] %v95_v18  ;;  %v181_v26 = vld.sshfl [vmem:[#allocation1 + $0x30] sm:$0xff pattern:$0x75316420] }
  0x20   :  { %186 = vst [vmem:[#allocation1 + $0x20] ss:$2 sm:$0xff] %v160_v20  ;;  %v98_v27 = vld [vmem:[%s6086_s2 + $0x48] sm:$0xf]  ;;  %s6088_s26 = sld [smem:[#allocation13_spill]]  ;;  %vm108_vm2 = vcmask 261120  }
  0x21   :  { %187 = vst [vmem:[#allocation1 + $0x21] ss:$2 sm:$0xff] %v96_v22  ;;  %s6095_s7 = sld [smem:[#allocation16_spill]]  ;;  %v4678_v2 = vld [vmem:[%s6039_s11 + $0x18] sm:$0xff]  ;;  %v4684_v4 = vld [vmem:[%s6039_s11 + $0x10] sm:$0xff]  ;;  %v4690_v5 = vld [vmem:[%s6039_s11 + $0x8] sm:$0xff] }
  0x22   :  { %188 = vst [vmem:[#allocation1 + $0x30] ss:$2 sm:$0xff] %v161_v23  ;;  %s6096_s5 = sld [smem:[#allocation12_spill]]  ;;  %619 = vmatpush.msra.mxu0 %v4678_v2  ;;  %v4696_v6 = vld [vmem:[%s6039_s11] sm:$0xff]  ;;  %vm1279_vm3 = vcmask 1043456   ;;  %vm960_vm4 = vcmask 293888  }
  0x23   :  { %v190_v29 = vld.sshfl [vmem:[#allocation1] sm:$0xff pattern:$0x75316420]  ;;  %3880 = vmatmul.msk.f32.gmra.mxu1 %vm197_vm1, %v179_v21  ;;  %189 = vst [vmem:[#allocation1 + $0x31] ss:$2 sm:$0xff] %v97_v19  ;;  %s6097_s30 = sld [smem:[#allocation17_spill]] }
  0x24   :  { %194 = vst [vmem:[#allocation1] ss:$2 sm:$0xff] %v162_v25  ;;  %620 = vmatpush.msra.mxu0 %v4684_v4  ;;  %v4704_v9 = vld [vmem:[%s6036_s8] ss:$0 sm:$0xff]  ;;  %vm1009_vm5 = vcmask 64512   ;;  %vm1022_vm6 = vcmask 60416  }
  0x25   :  { %195 = vst [vmem:[#allocation1 + $0x1] ss:$2 sm:$0xff] %v98_v27  ;;  %v4707_v12 = vrot.slane %v4704_v9, 4  ;;  %s6120_s25 = sld [smem:[#allocation15_spill]]  ;;  %s3867_s2 = sshll.u32 %s6051_s23, 4  ;;  %s3868_s2 = int_to_ptr.hbm [resolvable:$true] %s3867_s2 }
  0x26   :  { %v4557_v28 = vld [vmem:[%s6088_s26 + $0x8] sm:$0xff]  ;;  %v4563_v30 = vld [vmem:[%s6088_s26 + $0x10] sm:$0xff]  ;;  %v4569_v32 = vld [vmem:[%s6088_s26] sm:$0xff]  ;;  %621 = vmatpush.msra.mxu0 %v4690_v5 }
  0x27   :  { %v6064_v31 = vrot.slane %v4557_v28, 4  ;;  %v191_v33 = vld.sshfl [vmem:[#allocation1 + $0x10] sm:$0xff pattern:$0x75316420]  ;;  %v6063_v34 = vrot.slane %v4563_v30, 4  ;;  %v4578_v36 = vld [vmem:[%s6088_s26 + $0x18] sm:$0xff] }
  0x28   :  { %286 = vst [vmem:[#allocation1 + $0x10] ss:$2 sm:$0xff] %v4557_v28  ;;  %v192_v35 = vld.sshfl [vmem:[#allocation1 + $0x20] sm:$0xff pattern:$0x75316420]  ;;  %v6061_v37 = vrot.slane %v4569_v32, 4  ;;  %622 = vmatpush.msra.mxu0 %v4696_v6 }
  0x29   :  { %288 = vst [vmem:[#allocation1 + $0x11] ss:$2 sm:$0xff] %v6064_v31  ;;  %v6062_v39 = vrot.slane %v4578_v36, 4  ;;  %v4597_v41 = vld [vmem:[%s6088_s26 + $0x20] sm:$0xf]  ;;  %v4602_v42 = vld [vmem:[%s6088_s26 + $0x28] sm:$0xff] }
  0x2a   :  { %290 = vst [vmem:[#allocation1 + $0x20] ss:$2 sm:$0xff] %v4563_v30  ;;  %v193_v40 = vld.sshfl [vmem:[#allocation1 + $0x30] sm:$0xff pattern:$0x75316420]  ;;  %v6060_v43 = vrot.slane %v4602_v42, 4 }
  0x2b   :  { %292 = vst [vmem:[#allocation1 + $0x21] ss:$2 sm:$0xff] %v6063_v34  ;;  %3881 = vmatmul.msk.f32.gmra.mxu1 %vm197_vm1, %v180_v24  ;;  %v4610_v45 = vld [vmem:[%s6088_s26 + $0x30] sm:$0xff]  ;;  %v4621_v49 = vld [vmem:[%s6088_s26 + $0x38] sm:$0xff]  ;;  %v4634_v52 = vld [vmem:[%s6088_s26 + $0x40] sm:$0xff] }
  0x2c   :  { %v196_v38 = vld.sshfl [vmem:[#allocation1] sm:$0xff pattern:$0x75316420]  ;;  %294 = vst [vmem:[#allocation1 + $0x30] ss:$2 sm:$0xff] %v4578_v36  ;;  %v6059_v47 = vrot.slane %v4610_v45, 4 }
  0x2d   :  { %3887 = vmatmul.msk.f32.vlgmr.msra.gmra.mxu2 %vm197_vm1, %v196_v38  ;;  %282 = vst [vmem:[#allocation1] ss:$2 sm:$0xff] %v4569_v32  ;;  %v6058_v50 = vrot.slane %v4621_v49, 4  ;;  %v4640_v53 = vld [vmem:[%s6088_s26 + $0x48] sm:$0xf]  ;;  %v6057_v54 = vrot.slane %v4634_v52, 4 }
  0x2e   :  { %284 = vst [vmem:[#allocation1 + $0x1] ss:$2 sm:$0xff] %v6061_v37  ;;  %v103_v56 = vld [vmem:[%s6095_s7 + $0x18] sm:$0xff]  ;;  %v102_v57 = vld [vmem:[%s6095_s7 + $0x10] sm:$0xff]  ;;  %v101_v58 = vld [vmem:[%s6095_s7 + $0x8] sm:$0xff] }
  0x2f   :  { %296 = vst [vmem:[#allocation1 + $0x31] ss:$2 sm:$0xff] %v6062_v39  ;;  %127 = vmatpush.msra.mxu3 %v103_v56  ;;  %v100_v59 = vld [vmem:[%s6095_s7] sm:$0xff]  ;;  %v78_v62 = vld [vmem:[%s6096_s5 + $0x8] sm:$0xff] }
  0x30   :  { %6089 = vst [vmem:[#allocation6_spill] sm:$0xff] %v4597_v41  ;;  %v298_v46 = vld.sshfl [vmem:[#allocation1 + $0x10] sm:$0xff pattern:$0x75316420]  ;;  %v77_v60 = vld [vmem:[%s6096_s5] sm:$0xff] }
  0x31   :  { %6090 = vst [vmem:[#allocation7_spill] sm:$0xff] %v4602_v42  ;;  %128 = vmatpush.msra.mxu3 %v102_v57 }
  0x32   :  { %6091 = vst [vmem:[#allocation8_spill] sm:$0xff] %v4610_v45  ;;  %v299_v48 = vld.sshfl [vmem:[#allocation1 + $0x20] sm:$0xff pattern:$0x75316420] }
  0x33   :  { %3882 = vmatmul.msk.f32.gmra.mxu1 %vm197_vm1, %v181_v26  ;;  %303 = vst [vmem:[#allocation1 + $0x10] ss:$2 sm:$0xff] %v6060_v43  ;;  %129 = vmatpush.msra.mxu3 %v101_v58 }
  0x34   :  { %304 = vst [vmem:[#allocation1 + $0x11] ss:$2 sm:$0xff] %v4610_v45 }
  0x35   :  { %v297_v44 = vld.sshfl [vmem:[#allocation1] sm:$0xff pattern:$0x75316420]  ;;  %6092 = vst [vmem:[#allocation9_spill] sm:$0xff] %v4621_v49  ;;  %130 = vmatpush.msra.mxu3 %v100_v59 }
  0x36   :  { %3888 = vmatmul.msk.f32.vlgmr.msrb.gmra.mxu2 %vm108_vm2, %v297_v44  ;;  %301 = vst [vmem:[#allocation1] ss:$2 sm:$0xff] %v4597_v41  ;;  %v300_v51 = vld.sshfl [vmem:[#allocation1 + $0x30] sm:$0xff pattern:$0x75316420]  ;;  %3876 = vmatmul.msk.f32.vlgmr.msra.gmra.mxu3 %vm108_vm2, %v77_v60 }
  0x37   :  { %302 = vst [vmem:[#allocation1 + $0x1] ss:$2 sm:$0xff] %v4602_v42 }
  0x38   :  { %305 = vst [vmem:[#allocation1 + $0x20] ss:$2 sm:$0xff] %v6059_v47 }
  0x39   :  { %306 = vst [vmem:[#allocation1 + $0x21] ss:$2 sm:$0xff] %v4621_v49 }
  0x3a   :  { %307 = vst [vmem:[#allocation1 + $0x30] ss:$2 sm:$0xff] %v6058_v50 }
  0x3b   :  { %3883 = vmatmul.msk.f32.gmra.mxu1 %vm197_vm1, %v190_v29  ;;  %6093 = vst [vmem:[#allocation10_spill] sm:$0xff] %v4634_v52  ;;  %v310_v61 = vld.sshfl [vmem:[#allocation1 + $0x10] sm:$0xff pattern:$0x75316420] }
  0x3c   :  { %6094 = vst [vmem:[#allocation11_spill] sm:$0xff] %v4640_v53 }
  0x3d   :  { %308 = vst [vmem:[#allocation1 + $0x31] ss:$2 sm:$0xff] %v4634_v52 }
  0x3e   :  { %3889 = vmatmul.msk.f32.gmra.mxu2 %vm108_vm2, %v298_v46  ;;  %v309_v55 = vld.sshfl [vmem:[#allocation1] sm:$0xff pattern:$0x75316420]  ;;  %3877 = vmatmul.msk.f32.gmra.mxu3 %vm108_vm2, %v78_v62 }
  0x3f   :  { %313 = vst [vmem:[#allocation1] ss:$2 sm:$0xff] %v6057_v54 }
  0x40   :  { %314 = vst [vmem:[#allocation1 + $0x1] ss:$2 sm:$0xff] %v4640_v53  ;;  %v311_v63 = vld.sshfl [vmem:[#allocation1 + $0x20] sm:$0xff pattern:$0x75316420] }
  0x43   :  { %3884 = vmatmul.msk.f32.gmra.mxu1 %vm197_vm1, %v191_v33 }
  0x44   :  { %v312_v0 = vld.sshfl [vmem:[#allocation1 + $0x30] sm:$0xff pattern:$0x75316420] }
  0x46   :  { %3890 = vmatmul.msk.f32.gmra.mxu2 %vm108_vm2, %v299_v48 }
  0x47   :  { %v315_v1 = vld.sshfl [vmem:[#allocation1] sm:$0xff pattern:$0x75316420] }
  0x4b   :  { %3885 = vmatmul.msk.f32.gmra.mxu1 %vm197_vm1, %v192_v35 }
  0x4e   :  { %3891 = vmatmul.msk.f32.gmra.mxu2 %vm108_vm2, %v300_v51 }
  0x53   :  { %3886 = vmatmul.msk.f32.gmra.mxu1 %vm197_vm1, %v193_v40 }
  0x56   :  { %3892 = vmatmul.msk.f32.gmra.mxu2 %vm108_vm2, %v309_v55 }
  0x5e   :  { %3893 = vmatmul.msk.f32.gmra.mxu2 %vm108_vm2, %v310_v61 }
  0x66   :  { %3894 = vmatmul.msk.f32.gmra.mxu2 %vm108_vm2, %v311_v63  ;;  %v4740_v63 = vld [vmem:[%s6097_s30] ss:$0 sm:$0xff] }
  0x6e   :  { %3895 = vmatmul.msk.f32.gmra.mxu2 %vm108_vm2, %v312_v0 }
  0x76   :  { %3896 = vmatmul.msk.f32.gmra.mxu2 %vm108_vm2, %v315_v1 }
  0x98   :  { %v237_v3 = vpop.f32.mrf.mxu1 }
  0xa0   :  { %v240_v8 = vpop.f32.mrf.mxu1 }
  0xa8   :  { %v243_v15 = vpop.f32.mrf.mxu1 }
  0xb0   :  { %v4699_v7 = vpop.f32.mrf.mxu2  ;;  %v246_v24 = vpop.f32.mrf.mxu1 }
  0xb8   :  { %v249_v46 = vpop.f32.mrf.mxu1 }
  0xb9   :  { %v351_v10 = vpop.f32.mrf.mxu2 }
  0xba   :  { %v352_v11 = vadd.f32 %v351_v10, %v237_v3 }
  0xbc   :  { %v387_v13 = vrot.slane %v352_v11, 4  ;;  %v411_v14 = vadd.f32 %v4704_v9, %v352_v11 }
  0xbe   :  { %v412_v16 = vadd.f32 %v4707_v12, %v387_v13  ;;  %4063 = vtanh.f32 %v411_v14 }
  0xc0   :  { %4065 = vtanh.f32 %v412_v16  ;;  %v252_v62 = vpop.f32.mrf.mxu1  ;;  %v4761_v16 = vld [vmem:[%s6037_s9 + $0x10] sm:$0xff] }
  0xc1   :  { %v354_v17 = vpop.f32.mrf.mxu2 }
  0xc2   :  { %v355_v18 = vadd.f32 %v354_v17, %v240_v8  ;;  %v132_v8 = vpop.f32.mrf.mxu3 }
  0xc3   :  { %v133_v10 = vadd.f32 %v4740_v63, %v132_v8 }
  0xc4   :  { %v4711_v19 = vpop.eup %4063  ;;  %v388_v20 = vrot.slane %v355_v18, 4  ;;  %v413_v21 = vadd.f32 %v4704_v9, %v355_v18 }
  0xc5   :  { %512 = vst [vmem:[#allocation1] ss:$2 sm:$0xff] %v4711_v19 }
  0xc6   :  { %v4715_v22 = vpop.eup %4065  ;;  %v414_v23 = vadd.f32 %v4707_v12, %v388_v20  ;;  %4067 = vtanh.f32 %v413_v21  ;;  %v4767_v20 = vld [vmem:[%s6037_s9 + $0x8] sm:$0xff] }
  0xc7   :  { %514 = vst [vmem:[#allocation1 + $0x1] ss:$2 sm:$0xff] %v4715_v22 }
  0xc8   :  { %4069 = vtanh.f32 %v414_v23 }
  0xc9   :  { %v357_v25 = vpop.f32.mrf.mxu2 }
  0xca   :  { %v358_v26 = vadd.f32 %v357_v25, %v243_v15  ;;  %v4753_v15 = vld [vmem:[%s6037_s9 + $0x18] sm:$0xff]  ;;  %v4776_v25 = vld [vmem:[%s6037_s9] sm:$0xff] }
  0xcb   :  { %478 = vmatpush.msrb.mxu3 %v4753_v15 }
  0xcc   :  { %v4719_v27 = vpop.eup %4067  ;;  %v389_v29 = vrot.slane %v358_v26, 4  ;;  %v415_v33 = vadd.f32 %v4704_v9, %v358_v26 }
  0xcd   :  { %516 = vst [vmem:[#allocation1 + $0x10] ss:$2 sm:$0xff] %v4719_v27  ;;  %479 = vmatpush.msrb.mxu3 %v4761_v16 }
  0xce   :  { %v4723_v35 = vpop.eup %4069  ;;  %v527_v38 = vld.sshfl [vmem:[#allocation1] sm:$0xff pattern:$0x75316420]  ;;  %v416_v40 = vadd.f32 %v4707_v12, %v389_v29  ;;  %4071 = vtanh.f32 %v415_v33  ;;  %v255_v29 = vpop.f32.mrf.mxu1 }
  0xcf   :  { %518 = vst [vmem:[#allocation1 + $0x11] ss:$2 sm:$0xff] %v4723_v35  ;;  %3899 = vmatmul.msk.f32.vlgmr.msra.gmra.mxu0 %vm108_vm2, %v527_v38  ;;  %480 = vmatpush.msrb.mxu3 %v4767_v20 }
  0xd0   :  { %4073 = vtanh.f32 %v416_v40 }
  0xd1   :  { %v360_v44 = vpop.f32.mrf.mxu2  ;;  %481 = vmatpush.msrb.mxu3 %v4776_v25 }
  0xd2   :  { %v361_v48 = vadd.f32 %v360_v44, %v246_v24 }
  0xd4   :  { %v4728_v51 = vpop.eup %4071  ;;  %v390_v55 = vrot.slane %v361_v48, 4  ;;  %v417_v56 = vadd.f32 %v4704_v9, %v361_v48 }
  0xd5   :  { %520 = vst [vmem:[#allocation1 + $0x20] ss:$2 sm:$0xff] %v4728_v51 }
  0xd6   :  { %v4732_v57 = vpop.eup %4073  ;;  %v528_v58 = vld.sshfl [vmem:[#allocation1 + $0x10] sm:$0xff pattern:$0x75316420]  ;;  %v418_v59 = vadd.f32 %v4707_v12, %v390_v55  ;;  %4075 = vtanh.f32 %v417_v56 }
  0xd7   :  { %522 = vst [vmem:[#allocation1 + $0x21] ss:$2 sm:$0xff] %v4732_v57  ;;  %3900 = vmatmul.msk.f32.gmra.mxu0 %vm108_vm2, %v528_v58 }
  0xd8   :  { %4077 = vtanh.f32 %v418_v59 }
  0xd9   :  { %v363_v60 = vpop.f32.mrf.mxu2 }
  0xda   :  { %v364_v61 = vadd.f32 %v363_v60, %v249_v46 }
  0xdc   :  { %v4742_v0 = vpop.eup %4075  ;;  %v391_v1 = vrot.slane %v364_v61, 4  ;;  %v419_v3 = vadd.f32 %v4704_v9, %v364_v61  ;;  %v258_v61 = vpop.f32.mrf.mxu1 }
  0xdd   :  { %524 = vst [vmem:[#allocation1 + $0x30] ss:$2 sm:$0xff] %v4742_v0 }
  0xde   :  { %v4747_v11 = vpop.eup %4077  ;;  %v529_v13 = vld.sshfl [vmem:[#allocation1 + $0x20] sm:$0xff pattern:$0x75316420]  ;;  %v420_v14 = vadd.f32 %v4704_v9, %v391_v1  ;;  %4079 = vtanh.f32 %v419_v3 }
  0xdf   :  { %526 = vst [vmem:[#allocation1 + $0x31] ss:$2 sm:$0xff] %v4747_v11  ;;  %3901 = vmatmul.msk.f32.gmra.mxu0 %vm108_vm2, %v529_v13  ;;  %4081 = vtanh.f32 %v133_v10  ;;  %v4801_v1 = vld [vmem:[%s6040_s12] ss:$0 sm:$0xff] }
  0xe0   :  { %4083 = vtanh.f32 %v420_v14 }
  0xe1   :  { %v366_v17 = vpop.f32.mrf.mxu2 }
  0xe2   :  { %v367_v18 = vadd.f32 %v366_v17, %v252_v62  ;;  %v4810_v17 = vrot.slane %v4801_v1, 4 }
  0xe4   :  { %v4770_v21 = vpop.eup %4079  ;;  %v392_v23 = vrot.slane %v367_v18, 4  ;;  %v421_v24 = vadd.f32 %v4707_v12, %v367_v18 }
  0xe5   :  { %v4778_v26 = vpop.eup %4081  ;;  %531 = vst [vmem:[#allocation1] ss:$2 sm:$0xff] %v4770_v21 }
  0xe6   :  { %v4782_v33 = vpop.eup %4083  ;;  %v530_v38 = vld.sshfl [vmem:[#allocation1 + $0x30] sm:$0xff pattern:$0x75316420]  ;;  %v422_v40 = vadd.f32 %v4704_v9, %v392_v23  ;;  %4085 = vtanh.f32 %v421_v24  ;;  %3897 = vmatmul.msk.f32.vlgmr.msrb.gmra.mxu3 %vm108_vm2, %v4778_v26  ;;  %v135_v24 = vpop.f32.mrf.mxu3 }
  0xe7   :  { %532 = vst [vmem:[#allocation1 + $0x1] ss:$2 sm:$0xff] %v4782_v33  ;;  %3902 = vmatmul.msk.f32.gmra.mxu0 %vm108_vm2, %v530_v38 }
  0xe8   :  { %4087 = vtanh.f32 %v422_v40 }
  0xe9   :  { %v369_v44 = vpop.f32.mrf.mxu2 }
  0xea   :  { %v370_v46 = vadd.f32 %v369_v44, %v255_v29  ;;  %v136_v29 = vadd.f32 %v4740_v63, %v135_v24 }
  0xec   :  { %v4789_v48 = vpop.eup %4085  ;;  %v393_v55 = vrot.slane %v370_v46, 4  ;;  %v423_v56 = vadd.f32 %v4707_v12, %v370_v46 }
  0xed   :  { %533 = vst [vmem:[#allocation1 + $0x10] ss:$2 sm:$0xff] %v4789_v48 }
  0xee   :  { %v4793_v58 = vpop.eup %4087  ;;  %v539_v59 = vld.sshfl [vmem:[#allocation1] sm:$0xff pattern:$0x75316420]  ;;  %v424_v60 = vadd.f32 %v4704_v9, %v393_v55  ;;  %4089 = vtanh.f32 %v423_v56 }
  0xef   :  { %534 = vst [vmem:[#allocation1 + $0x11] ss:$2 sm:$0xff] %v4793_v58  ;;  %3903 = vmatmul.msk.f32.gmra.mxu0 %vm108_vm2, %v539_v59 }
  0xf0   :  { %4091 = vtanh.f32 %v424_v60 }
  0xf1   :  { %v372_v62 = vpop.f32.mrf.mxu2 }
  0xf2   :  { %v373_v3 = vadd.f32 %v372_v62, %v258_v61 }
  0xf4   :  { %v4803_v8 = vpop.eup %4089  ;;  %v394_v10 = vrot.slane %v373_v3, 4  ;;  %v425_v13 = vadd.f32 %v4707_v12, %v373_v3 }
  0xf5   :  { %535 = vst [vmem:[#allocation1 + $0x20] ss:$2 sm:$0xff] %v4803_v8 }
  0xf6   :  { %v4807_v14 = vpop.eup %4091  ;;  %v540_v18 = vld.sshfl [vmem:[#allocation1 + $0x10] sm:$0xff pattern:$0x75316420]  ;;  %v426_v23 = vadd.f32 %v4704_v9, %v394_v10  ;;  %4093 = vtanh.f32 %v425_v13 }
  0xf7   :  { %550 = vst [vmem:[#allocation1 + $0x10] ss:$2 sm:$0xff] %v4801_v1  ;;  %3904 = vmatmul.msk.f32.gmra.mxu0 %vm108_vm2, %v540_v18 }
  0xf8   :  { %552 = vst [vmem:[#allocation1 + $0x11] ss:$2 sm:$0xff] %v4810_v17  ;;  %4095 = vtanh.f32 %v426_v23 }
  0xf9   :  { %536 = vst [vmem:[#allocation1 + $0x21] ss:$2 sm:$0xff] %v4807_v14  ;;  %v375_v38 = vpop.f32.mrf.mxu2  ;;  %4097 = vtanh.f32 %v136_v29 }
  0xfa   :  { %v376_v40 = vadd.f32 %v375_v38, %v4699_v7 }
  0xfc   :  { %v4819_v44 = vpop.eup %4093  ;;  %v395_v46 = vrot.slane %v376_v40, 4  ;;  %v427_v55 = vadd.f32 %v4707_v12, %v376_v40 }
  0xfd   :  { %537 = vst [vmem:[#allocation1 + $0x30] ss:$2 sm:$0xff] %v4819_v44 }
  0xfe   :  { %v4823_v56 = vpop.eup %4095  ;;  %v428_v63 = vadd.f32 %v4704_v9, %v395_v46  ;;  %4099 = vtanh.f32 %v427_v55 }
  0xff   :  { %v4826_v59 = vpop.eup %4097  ;;  %v562_v60 = vld.sshfl [vmem:[#allocation1 + $0x10] sm:$0xff pattern:$0x75316420]  ;;  %538 = vst [vmem:[#allocation1 + $0x31] ss:$2 sm:$0xff] %v4823_v56 }
 0x100   :  { %567 = vst [vmem:[#allocation1 + $0x10] ss:$2 sm:$0xff] %v4810_v17  ;;  %v541_v7 = vld.sshfl [vmem:[#allocation1 + $0x20] sm:$0xff pattern:$0x75316420]  ;;  %4101 = vtanh.f32 %v428_v63  ;;  %3898 = vmatmul.msk.f32.gmra.mxu3 %vm108_vm2, %v4826_v59 }
 0x101   :  { %568 = vst [vmem:[#allocation1 + $0x11] ss:$2 sm:$0xff] %v4801_v1  ;;  %3905 = vmatmul.msk.f32.gmra.mxu0 %vm108_vm2, %v541_v7 }
 0x102   :  { %554 = vst [vmem:[#allocation1 + $0x20] ss:$2 sm:$0xff] %v4801_v1 }
 0x103   :  { %556 = vst [vmem:[#allocation1 + $0x21] ss:$2 sm:$0xff] %v4810_v17 }
 0x104   :  { %v4836_v9 = vpop.eup %4099 }
 0x105   :  { %543 = vst [vmem:[#allocation1] ss:$2 sm:$0xff] %v4836_v9 }
 0x106   :  { %v4839_v12 = vpop.eup %4101  ;;  %v542_v61 = vld.sshfl [vmem:[#allocation1 + $0x30] sm:$0xff pattern:$0x75316420] }
 0x107   :  { %558 = vst [vmem:[#allocation1 + $0x30] ss:$2 sm:$0xff] %v4801_v1 }
 0x108   :  { %560 = vst [vmem:[#allocation1 + $0x31] ss:$2 sm:$0xff] %v4810_v17 }
 0x109   :  { %544 = vst [vmem:[#allocation1 + $0x1] ss:$2 sm:$0xff] %v4839_v12  ;;  %3906 = vmatmul.msk.f32.gmra.mxu0 %vm108_vm2, %v542_v61  ;;  %v574_v61 = vld.sshfl [vmem:[#allocation1 + $0x10] sm:$0xff pattern:$0x75316420] }
 0x10a   :  { %v563_v62 = vld.sshfl [vmem:[#allocation1 + $0x20] sm:$0xff pattern:$0x75316420] }
 0x10b   :  { %569 = vst [vmem:[#allocation1 + $0x20] ss:$2 sm:$0xff] %v4810_v17 }
 0x10c   :  { %570 = vst [vmem:[#allocation1 + $0x21] ss:$2 sm:$0xff] %v4801_v1 }
 0x10f   :  { %v564_v3 = vld.sshfl [vmem:[#allocation1 + $0x30] sm:$0xff pattern:$0x75316420] }
 0x110   :  { %571 = vst [vmem:[#allocation1 + $0x30] ss:$2 sm:$0xff] %v4810_v17  ;;  %v545_v10 = vld.sshfl [vmem:[#allocation1] sm:$0xff pattern:$0x75316420] }
 0x111   :  { %572 = vst [vmem:[#allocation1 + $0x31] ss:$2 sm:$0xff] %v4801_v1  ;;  %3907 = vmatmul.msk.f32.gmra.mxu0 %vm108_vm2, %v545_v10 }
 0x112   :  { %546 = vst [vmem:[#allocation1] ss:$2 sm:$0xff] %v4801_v1 }
 0x113   :  { %548 = vst [vmem:[#allocation1 + $0x1] ss:$2 sm:$0xff] %v4810_v17 }
 0x11a   :  { %v561_v13 = vld.sshfl [vmem:[#allocation1] sm:$0xff pattern:$0x75316420] }
 0x11b   :  { %565 = vst [vmem:[#allocation1] ss:$2 sm:$0xff] %v4801_v1 }
 0x11c   :  { %566 = vst [vmem:[#allocation1 + $0x1] ss:$2 sm:$0xff] %v4801_v1 }
 0x123   :  { %v573_v18 = vld.sshfl [vmem:[#allocation1] sm:$0xff pattern:$0x75316420] }
 0x124   :  { %577 = vst [vmem:[#allocation1] ss:$2 sm:$0xff] %v4810_v17 }
 0x125   :  { %578 = vst [vmem:[#allocation1 + $0x1] ss:$2 sm:$0xff] %v4801_v1 }
 0x12c   :  { %v4856_v38 = vld.sshfl [vmem:[#allocation1] sm:$0xff pattern:$0x75316420] }
 0x14c   :  { %v624_v23 = vpop.f32.mrf.mxu0 }
 0x14d   :  { %v625_v24 = vadd.f32 %v624_v23, %v561_v13 }
 0x14f   :  { %v660_v29 = vrot.slane %v625_v24, 4  ;;  %4103 = vtanh.f32 %v625_v24 }
 0x151   :  { %4105 = vtanh.f32 %v660_v29 }
 0x154   :  { %v627_v40 = vpop.f32.mrf.mxu0 }
 0x155   :  { %v4858_v46 = vpop.eup %4103  ;;  %v628_v55 = vadd.f32 %v627_v40, %v562_v60  ;;  %v575_v60 = vld.sshfl [vmem:[#allocation1 + $0x20] sm:$0xff pattern:$0x75316420] }
 0x156   :  { %705 = vst [vmem:[#allocation1] ss:$2 sm:$0xff] %v4858_v46 }
 0x157   :  { %v4861_v63 = vpop.eup %4105  ;;  %v661_v7 = vrot.slane %v628_v55, 4  ;;  %4107 = vtanh.f32 %v628_v55 }
 0x158   :  { %707 = vst [vmem:[#allocation1 + $0x1] ss:$2 sm:$0xff] %v4861_v63 }
 0x159   :  { %4109 = vtanh.f32 %v661_v7 }
 0x15c   :  { %v630_v10 = vpop.f32.mrf.mxu0 }
 0x15d   :  { %v4864_v13 = vpop.eup %4107  ;;  %v631_v23 = vadd.f32 %v630_v10, %v563_v62  ;;  %v576_v62 = vld.sshfl [vmem:[#allocation1 + $0x30] sm:$0xff pattern:$0x75316420] }
 0x15e   :  { %709 = vst [vmem:[#allocation1 + $0x10] ss:$2 sm:$0xff] %v4864_v13 }
 0x15f   :  { %v4867_v24 = vpop.eup %4109  ;;  %v662_v29 = vrot.slane %v631_v23, 4  ;;  %4111 = vtanh.f32 %v631_v23 }
 0x160   :  { %711 = vst [vmem:[#allocation1 + $0x11] ss:$2 sm:$0xff] %v4867_v24 }
 0x161   :  { %4113 = vtanh.f32 %v662_v29 }
 0x164   :  { %v633_v40 = vpop.f32.mrf.mxu0 }
 0x165   :  { %v4870_v55 = vpop.eup %4111  ;;  %v634_v54 = vadd.f32 %v633_v40, %v564_v3 }
 0x166   :  { %713 = vst [vmem:[#allocation1 + $0x20] ss:$2 sm:$0xff] %v4870_v55 }
 0x167   :  { %v4873_v7 = vpop.eup %4113  ;;  %v663_v50 = vrot.slane %v634_v54, 4  ;;  %4115 = vtanh.f32 %v634_v54  ;;  %v720_v54 = vld.sshfl [vmem:[#allocation1] sm:$0xff pattern:$0x75316420] }
 0x168   :  { %715 = vst [vmem:[#allocation1 + $0x21] ss:$2 sm:$0xff] %v4873_v7  ;;  %v721_v31 = vld.sshfl [vmem:[#allocation1 + $0x10] sm:$0xff pattern:$0x75316420] }
 0x169   :  { %4117 = vtanh.f32 %v663_v50 }
 0x16c   :  { %v636_v10 = vpop.f32.mrf.mxu0 }
 0x16d   :  { %v4876_v23 = vpop.eup %4115  ;;  %v637_v47 = vadd.f32 %v636_v10, %v573_v18 }
 0x16e   :  { %717 = vst [vmem:[#allocation1 + $0x30] ss:$2 sm:$0xff] %v4876_v23 }
 0x16f   :  { %v4879_v29 = vpop.eup %4117  ;;  %4119 = vtanh.f32 %v637_v47  ;;  %v664_v3 = vrot.slane %v637_v47, 4  ;;  %v722_v53 = vld.sshfl [vmem:[#allocation1 + $0x20] sm:$0xff pattern:$0x75316420] }
 0x170   :  { %719 = vst [vmem:[#allocation1 + $0x31] ss:$2 sm:$0xff] %v4879_v29 }
 0x171   :  { %4121 = vtanh.f32 %v664_v3 }
 0x174   :  { %v639_v40 = vpop.f32.mrf.mxu0 }
 0x175   :  { %v4882_v43 = vpop.eup %4119  ;;  %v640_v37 = vadd.f32 %v639_v40, %v574_v61 }
 0x176   :  { %724 = vst [vmem:[#allocation1] ss:$2 sm:$0xff] %v4882_v43 }
 0x177   :  { %v665_v50 = vrot.slane %v640_v37, 4  ;;  %4123 = vtanh.f32 %v640_v37  ;;  %v4885_v18 = vpop.eup %4121  ;;  %v4057_v37 = vld [vmem:[%s6038_s10] ss:$0 sm:$0xff]  ;;  %v723_v3 = vld.sshfl [vmem:[#allocation1 + $0x30] sm:$0xff pattern:$0x75316420] }
 0x179   :  { %4125 = vtanh.f32 %v665_v50  ;;  %v483_v50 = vpop.f32.mrf.mxu3 }
 0x17d   :  { %v4887_v10 = vpop.eup %4123  ;;  %v725_v39 = vld.sshfl [vmem:[#allocation1] sm:$0xff pattern:$0x75316420] }
 0x17e   :  { %768 = vst [vmem:[#allocation1] ss:$2 sm:$0xff] %v4885_v18  ;;  %v642_v34 = vpop.f32.mrf.mxu0  ;;  %3908 = vmatpush.xpose.msk.msra.mxu3 %vm108_vm2, %v725_v39  ;;  %v484_v39 = vadd.f32 %v4057_v37, %v483_v50 }
 0x17f   :  { %v4891_v47 = vpop.eup %4125  ;;  %770 = vst [vmem:[#allocation1 + $0x1] ss:$2 sm:$0xff] %v4887_v10  ;;  %v643_v61 = vadd.f32 %v642_v34, %v575_v60 }
 0x180   :  { %772 = vst [vmem:[#allocation1 + $0x10] ss:$2 sm:$0xff] %v4891_v47 }
 0x181   :  { %v666_v40 = vrot.slane %v643_v61, 4  ;;  %4127 = vtanh.f32 %v643_v61 }
 0x182   :  { %3909 = vmatpush.xpose.msk.msra.mxu3 %vm108_vm2, %v723_v3 }
 0x183   :  { %4129 = vtanh.f32 %v666_v40 }
 0x184   :  { %4131 = vtanh.f32 %v484_v39 }
 0x186   :  { %v645_v52 = vpop.f32.mrf.mxu0  ;;  %3910 = vmatpush.xpose.msk.msra.mxu3 %vm108_vm2, %v722_v53 }
 0x187   :  { %v4900_v49 = vpop.eup %4127  ;;  %v646_v34 = vadd.f32 %v645_v52, %v576_v62 }
 0x188   :  { %774 = vst [vmem:[#allocation1 + $0x11] ss:$2 sm:$0xff] %v4900_v49 }
 0x189   :  { %v4903_v60 = vpop.eup %4129  ;;  %v667_v45 = vrot.slane %v646_v34, 4  ;;  %4133 = vtanh.f32 %v646_v34 }
 0x18a   :  { %776 = vst [vmem:[#allocation1 + $0x20] ss:$2 sm:$0xff] %v4903_v60  ;;  %3911 = vmatpush.xpose.msk.msra.mxu3 %vm108_vm2, %v721_v31  ;;  %v4907_v61 = vpop.eup %4131  ;;  %v486_v31 = vpop.f32.mrf.mxu3 }
 0x18b   :  { %4135 = vtanh.f32 %v667_v45  ;;  %v487_v45 = vadd.f32 %v4057_v37, %v486_v31 }
 0x18e   :  { %v648_v3 = vpop.f32.mrf.mxu0  ;;  %3912 = vmatpush.xpose.msk.msra.mxu3 %vm108_vm2, %v720_v54 }
 0x18f   :  { %v4910_v53 = vpop.eup %4133  ;;  %v784_v52 = vld.sshfl [vmem:[#allocation1 + $0x10] sm:$0xff pattern:$0x75316420]  ;;  %v649_v62 = vadd.f32 %v648_v3, %v4856_v38  ;;  %v783_v3 = vld.sshfl [vmem:[#allocation1] sm:$0xff pattern:$0x75316420] }
 0x190   :  { %828 = vst [vmem:[#allocation1 + $0x10] ss:$2 sm:$0xff] %v4864_v13 }
 0x191   :  { %v4914_v40 = vpop.eup %4135  ;;  %830 = vst [vmem:[#allocation1 + $0x11] ss:$2 sm:$0xff] %v4867_v24  ;;  %v668_v50 = vrot.slane %v649_v62, 4  ;;  %4137 = vtanh.f32 %v649_v62  ;;  %3913 = vmatmul.msk.f32.vlgmr.msra.gmra.mxu3 %vm108_vm2, %v4907_v61 }
 0x192   :  { %778 = vst [vmem:[#allocation1 + $0x21] ss:$2 sm:$0xff] %v4910_v53 }
 0x193   :  { %780 = vst [vmem:[#allocation1 + $0x30] ss:$2 sm:$0xff] %v4914_v40  ;;  %4139 = vtanh.f32 %v668_v50 }
 0x194   :  { %4141 = vtanh.f32 %v487_v45 }
 0x197   :  { %v4138_v54 = vpop.eup %4137 }
 0x198   :  { %v4921_v38 = vld.sshfl [vmem:[#allocation1 + $0x10] sm:$0xff pattern:$0x75316420]  ;;  %782 = vst [vmem:[#allocation1 + $0x31] ss:$2 sm:$0xff] %v4138_v54 }
 0x199   :  { %891 = vst [vmem:[#allocation1 + $0x10] ss:$2 sm:$0xff] %v4891_v47  ;;  %v785_v39 = vld.sshfl [vmem:[#allocation1 + $0x20] sm:$0xff pattern:$0x75316420]  ;;  %v4924_v34 = vpop.eup %4139 }
 0x19a   :  { %893 = vst [vmem:[#allocation1 + $0x11] ss:$2 sm:$0xff] %v4900_v49  ;;  %v4142_v62 = vpop.eup %4141 }
 0x19b   :  { %832 = vst [vmem:[#allocation1 + $0x20] ss:$2 sm:$0xff] %v4870_v55  ;;  %3926 = vmatpush.xpose.msk.msrb.mxu1 %vm108_vm2, %v4142_v62 }
 0x19c   :  { %834 = vst [vmem:[#allocation1 + $0x21] ss:$2 sm:$0xff] %v4873_v7 }
 0x19d   :  { %787 = vst [vmem:[#allocation1] ss:$2 sm:$0xff] %v4924_v34 }
 0x19f   :  { %v786_v37 = vld.sshfl [vmem:[#allocation1 + $0x30] sm:$0xff pattern:$0x75316420]  ;;  %1646 = vmatpush.msra.mxu1 %v4678_v2 }
 0x1a0   :  { %836 = vst [vmem:[#allocation1 + $0x30] ss:$2 sm:$0xff] %v4876_v23 }
 0x1a1   :  { %v903_v50 = vld.sshfl [vmem:[#allocation1 + $0x10] sm:$0xff pattern:$0x75316420]  ;;  %838 = vst [vmem:[#allocation1 + $0x31] ss:$2 sm:$0xff] %v4879_v29  ;;  %1647 = vmatpush.msra.mxu1 %v4684_v4 }
 0x1a2   :  { %1255 = vst [vmem:[#allocation1 + $0x10] ss:$2 sm:$0xff] %v4864_v13 }
 0x1a3   :  { %1257 = vst [vmem:[#allocation1 + $0x11] ss:$2 sm:$0xff] %v4867_v24  ;;  %v841_v31 = vld.sshfl [vmem:[#allocation1 + $0x20] sm:$0xff pattern:$0x75316420]  ;;  %1648 = vmatpush.msra.mxu1 %v4690_v5 }
 0x1a4   :  { %895 = vst [vmem:[#allocation1 + $0x20] ss:$2 sm:$0xff] %v4903_v60  ;;  %v788_v45 = vld.sshfl [vmem:[#allocation1] sm:$0xff pattern:$0x75316420] }
 0x1a5   :  { %897 = vst [vmem:[#allocation1 + $0x21] ss:$2 sm:$0xff] %v4910_v53  ;;  %3914 = vmatpush.xpose.msk.msrb.mxu3 %vm108_vm2, %v788_v45  ;;  %1649 = vmatpush.msra.mxu1 %v4696_v6 }
 0x1a6   :  { %824 = vst [vmem:[#allocation1] ss:$2 sm:$0xff] %v4858_v46 }
 0x1a7   :  { %826 = vst [vmem:[#allocation1 + $0x1] ss:$2 sm:$0xff] %v4861_v63 }
 0x1a8   :  { %v842_v42 = vld.sshfl [vmem:[#allocation1 + $0x30] sm:$0xff pattern:$0x75316420] }
 0x1a9   :  { %899 = vst [vmem:[#allocation1 + $0x30] ss:$2 sm:$0xff] %v4914_v40  ;;  %3915 = vmatpush.xpose.msk.msrb.mxu3 %vm108_vm2, %v786_v37 }
 0x1aa   :  { %v1267_v13 = vld.sshfl [vmem:[#allocation1 + $0x10] sm:$0xff pattern:$0x75316420]  ;;  %901 = vst [vmem:[#allocation1 + $0x31] ss:$2 sm:$0xff] %v4138_v54 }
 0x1ab   :  { %1306 = vst [vmem:[#allocation1 + $0x10] ss:$2 sm:$0xff] %v4891_v47 }
 0x1ac   :  { %1308 = vst [vmem:[#allocation1 + $0x11] ss:$2 sm:$0xff] %v4900_v49  ;;  %v904_v24 = vld.sshfl [vmem:[#allocation1 + $0x20] sm:$0xff pattern:$0x75316420] }
 0x1ad   :  { %1259 = vst [vmem:[#allocation1 + $0x20] ss:$2 sm:$0xff] %v4870_v55  ;;  %3916 = vmatpush.xpose.msk.msrb.mxu3 %vm108_vm2, %v785_v39 }
 0x1ae   :  { %1261 = vst [vmem:[#allocation1 + $0x21] ss:$2 sm:$0xff] %v4873_v7  ;;  %v839_v45 = vld.sshfl [vmem:[#allocation1] sm:$0xff pattern:$0x75316420] }
 0x1af   :  { %843 = vst [vmem:[#allocation1] ss:$2 sm:$0xff] %v4882_v43 }
 0x1b1   :  { %v905_v41 = vld.sshfl [vmem:[#allocation1 + $0x30] sm:$0xff pattern:$0x75316420]  ;;  %3917 = vmatpush.xpose.msk.msrb.mxu3 %vm108_vm2, %v784_v52 }
 0x1b2   :  { %1263 = vst [vmem:[#allocation1 + $0x30] ss:$2 sm:$0xff] %v4876_v23 }
 0x1b3   :  { %1265 = vst [vmem:[#allocation1 + $0x31] ss:$2 sm:$0xff] %v4879_v29 }
 0x1b5   :  { %v1268_v47 = vld.sshfl [vmem:[#allocation1 + $0x20] sm:$0xff pattern:$0x75316420]  ;;  %3918 = vmatpush.xpose.msk.msrb.mxu3 %vm108_vm2, %v783_v3 }
 0x1b6   :  { %1310 = vst [vmem:[#allocation1 + $0x20] ss:$2 sm:$0xff] %v4903_v60  ;;  %v844_v49 = vld.sshfl [vmem:[#allocation1] sm:$0xff pattern:$0x75316420] }
 0x1b7   :  { %1312 = vst [vmem:[#allocation1 + $0x21] ss:$2 sm:$0xff] %v4910_v53 }
 0x1b8   :  { %887 = vst [vmem:[#allocation1] ss:$2 sm:$0xff] %v4885_v18  ;;  %3919 = vmatmul.msk.f32.vlgmr.msrb.gmra.mxu3 %vm108_vm2, %v4142_v62 }
 0x1b9   :  { %3920 = vmatpush.xpose.msk.msra.mxu3 %vm108_vm2, %v4907_v61  ;;  %889 = vst [vmem:[#allocation1 + $0x1] ss:$2 sm:$0xff] %v4887_v10 }
 0x1ba   :  { %v1269_v55 = vld.sshfl [vmem:[#allocation1 + $0x30] sm:$0xff pattern:$0x75316420] }
 0x1bb   :  { %1314 = vst [vmem:[#allocation1 + $0x30] ss:$2 sm:$0xff] %v4914_v40 }
 0x1bc   :  { %1316 = vst [vmem:[#allocation1 + $0x31] ss:$2 sm:$0xff] %v4138_v54 }
 0x1bd   :  { %1431 = vmatpush.msrb.mxu3 %v4142_v62 }
 0x1c0   :  { %v902_v7 = vld.sshfl [vmem:[#allocation1] sm:$0xff pattern:$0x75316420]  ;;  %3921 = vmatmul.msk.f32.vlgmr.msra.gmra.mxu3 %vm108_vm2, %v839_v45 }
 0x1c1   :  { %906 = vst [vmem:[#allocation1] ss:$2 sm:$0xff] %v4924_v34  ;;  %3927 = vmatmul.msk.f32.vlgmr.msrb.gmra.mxu1 %vm108_vm2, %v902_v7 }
 0x1c2   :  { %2695 = vmatpush.msrb.mxu1 %v4678_v2 }
 0x1c4   :  { %2696 = vmatpush.msrb.mxu1 %v4684_v4  ;;  %v1319_v4 = vld.sshfl [vmem:[#allocation1 + $0x20] sm:$0xff pattern:$0x75316420] }
 0x1c6   :  { %2697 = vmatpush.msrb.mxu1 %v4690_v5  ;;  %v1318_v5 = vld.sshfl [vmem:[#allocation1 + $0x10] sm:$0xff pattern:$0x75316420] }
 0x1c8   :  { %v907_v23 = vld.sshfl [vmem:[#allocation1] sm:$0xff pattern:$0x75316420]  ;;  %3922 = vmatmul.msk.f32.gmra.mxu3 %vm108_vm2, %v4921_v38  ;;  %2698 = vmatpush.msrb.mxu1 %v4696_v6 }
 0x1c9   :  { %1251 = vst [vmem:[#allocation1] ss:$2 sm:$0xff] %v4858_v46  ;;  %3928 = vmatmul.msk.f32.gmra.mxu1 %vm108_vm2, %v903_v50 }
 0x1ca   :  { %1253 = vst [vmem:[#allocation1 + $0x1] ss:$2 sm:$0xff] %v4861_v63 }
 0x1d0   :  { %3923 = vmatmul.msk.f32.gmra.mxu3 %vm108_vm2, %v841_v31 }
 0x1d1   :  { %v1266_v29 = vld.sshfl [vmem:[#allocation1] sm:$0xff pattern:$0x75316420]  ;;  %3929 = vmatmul.msk.f32.gmra.mxu1 %vm108_vm2, %v904_v24 }
 0x1d2   :  { %1270 = vst [vmem:[#allocation1] ss:$2 sm:$0xff] %v4882_v43 }
 0x1d8   :  { %3924 = vmatmul.msk.f32.gmra.mxu3 %vm108_vm2, %v842_v42  ;;  %v1320_v42 = vld.sshfl [vmem:[#allocation1 + $0x30] sm:$0xff pattern:$0x75316420] }
 0x1d9   :  { %v1271_v2 = vld.sshfl [vmem:[#allocation1] sm:$0xff pattern:$0x75316420]  ;;  %3930 = vmatmul.msk.f32.gmra.mxu1 %vm108_vm2, %v905_v41 }
 0x1da   :  { %1302 = vst [vmem:[#allocation1] ss:$2 sm:$0xff] %v4885_v18  ;;  %3932 = vmatpush.msk.msrb.mxu0 %vm1279_vm3, %v1271_v2 }
 0x1db   :  { %1304 = vst [vmem:[#allocation1 + $0x1] ss:$2 sm:$0xff] %v4887_v10 }
 0x1dc   :  { %1294 = vmatpush.msrb.mxu0 %v1269_v55 }
 0x1de   :  { %1295 = vmatpush.msrb.mxu0 %v1268_v47 }
 0x1e0   :  { %1296 = vmatpush.msrb.mxu0 %v1267_v13  ;;  %3925 = vmatmul.msk.f32.gmra.mxu3 %vm108_vm2, %v844_v49 }
 0x1e1   :  { %3931 = vmatmul.msk.f32.gmra.mxu1 %vm108_vm2, %v907_v23 }
 0x1e2   :  { %v1317_v43 = vld.sshfl [vmem:[#allocation1] sm:$0xff pattern:$0x75316420]  ;;  %1297 = vmatpush.msrb.mxu0 %v1266_v29 }
 0x1e3   :  { %1321 = vst [vmem:[#allocation1] ss:$2 sm:$0xff] %v4924_v34 }
 0x1e4   :  { %1384 = vmatpush.msra.mxu0 %v4907_v61 }
 0x1ea   :  { %v1322_v41 = vld.sshfl [vmem:[#allocation1] sm:$0xff pattern:$0x75316420] }
 0x1eb   :  { %3934 = vmatpush.msk.msra.mxu2 %vm1279_vm3, %v1322_v41 }
 0x1ed   :  { %1344 = vmatpush.msra.mxu2 %v1320_v42 }
 0x1ef   :  { %1345 = vmatpush.msra.mxu2 %v1319_v4 }
 0x1f1   :  { %1346 = vmatpush.msra.mxu2 %v1318_v5 }
 0x1f3   :  { %1347 = vmatpush.msra.mxu2 %v1317_v43 }
 0x1f5   :  { %1508 = vmatpush.msrb.mxu2 %v4753_v15 }
 0x1f7   :  { %1509 = vmatpush.msrb.mxu2 %v4761_v16 }
 0x1f9   :  { %1510 = vmatpush.msrb.mxu2 %v4767_v20 }
 0x1fb   :  { %1511 = vmatpush.msrb.mxu2 %v4776_v25 }
 0x214   :  { %v756_v6 = vpop.f32.mrf.mxu3 }
 0x215   :  { %v822_v46 = vmul.f32 0.17677669, %v756_v6 }
 0x217   :  { %v961_v63 = vsel %vm960_vm4, %v822_v46, -inf }
 0x218   :  { %962 = vmax.xlane.f32.xlu0 %v961_v63 }
 0x23b   :  { %v4994_v18 = vpop.f32.mrf.mxu3 }
 0x23e   :  { %v935_v10 = vpop.f32.mrf.mxu1 }
 0x23f   :  { %v955_v31 = vmul.f32 0.17677669, %v935_v10 }
 0x241   :  { %v1026_v49 = vsel %vm1009_vm5, %v955_v31, -inf }
 0x243   :  { %v872_v60 = vpop.f32.mrf.mxu3 }
 0x244   :  { %v950_v61 = vmul.f32 0.17677669, %v872_v60 }
 0x246   :  { %v1010_v15 = vsel %vm1009_vm5, %v950_v61, -inf  ;;  %v938_v16 = vpop.f32.mrf.mxu1 }
 0x247   :  { %1011 = vmax.xlane.f32.xlu0 %v1010_v15  ;;  %v956_v39 = vmul.f32 0.17677669, %v938_v16 }
 0x249   :  { %v1029_v62 = vsel %vm1009_vm5, %v956_v39, -inf }
 0x24b   :  { %v875_v53 = vpop.f32.mrf.mxu3 }
 0x24c   :  { %v951_v20 = vmul.f32 0.17677669, %v875_v53 }
 0x24e   :  { %v1013_v25 = vsel %vm1009_vm5, %v951_v20, -inf  ;;  %v941_v54 = vpop.f32.mrf.mxu1 }
 0x24f   :  { %1014 = vmax.xlane.f32.xlu1 %v1013_v25  ;;  %v957_v7 = vmul.f32 0.17677669, %v941_v54 }
 0x251   :  { %v1032_v23 = vsel %vm1009_vm5, %v957_v7, -inf }
 0x253   :  { %v878_v52 = vpop.f32.mrf.mxu3 }
 0x254   :  { %v952_v40 = vmul.f32 0.17677669, %v878_v52 }
 0x256   :  { %v1016_v38 = vsel %vm1009_vm5, %v952_v40, -inf  ;;  %v944_v50 = vpop.f32.mrf.mxu1 }
 0x257   :  { %1017 = vmax.xlane.f32.xlu1 %v1016_v38  ;;  %v5001_v13 = vmul.f32 0.17677669, %v944_v50 }
 0x259   :  { %v1035_v47 = vsel %vm1009_vm5, %v5001_v13, -inf }
 0x25b   :  { %v881_v34 = vpop.f32.mrf.mxu3 }
 0x25c   :  { %v953_v3 = vmul.f32 0.17677669, %v881_v34 }
 0x25e   :  { %v1019_v37 = vsel %vm1009_vm5, %v953_v3, -inf  ;;  %v947_v29 = vpop.f32.mrf.mxu1 }
 0x25f   :  { %1030 = vmax.xlane.f32.xlu1 %v1029_v62  ;;  %1020 = vmax.xlane.f32.xlu2 %v1019_v37  ;;  %v5008_v2 = vmul.f32 0.17677669, %v947_v29 }
 0x261   :  { %v1038_v43 = vsel %vm1022_vm6, %v5008_v2, -inf }
 0x263   :  { %v884_v24 = vpop.f32.mrf.mxu3 }
 0x264   :  { %v954_v45 = vmul.f32 0.17677669, %v884_v24 }
 0x266   :  { %v1023_v55 = vsel %vm1022_vm6, %v954_v45, -inf }
 0x267   :  { %1036 = vmax.xlane.f32.xlu1 %v1035_v47  ;;  %1027 = vmax.xlane.f32.xlu2 %v1026_v49 }
 0x268   :  { %1024 = vmax.xlane.f32.xlu0 %v1023_v55 }
 0x270   :  { %1033 = vmax.xlane.f32.xlu0 %v1032_v23 }
 0x278   :  { %1039 = vmax.xlane.f32.xlu0 %v1038_v43 }
 0x28b   :  { %v963_v41 = vpop.xlane.xlu0 %962 }
 0x28c   :  { %v967_v42 = vsub.f32 %v822_v46, %v963_v41 }
 0x28e   :  { %v969_v4 = vmul.f32 1.442695, %v967_v42 }
 0x290   :  { %4143 = vpow2.f32 %v969_v4 }
 0x296   :  { %v5012_v5 = vpop.eup %4143 }
 0x297   :  { %v973_v6 = vsel %vm960_vm4, %v5012_v5, 0.0 }
 0x298   :  { %974 = vadd.xlane.f32.xlu2 %v973_v6 }
 0x2ba   :  { %v1012_v63 = vpop.xlane.xlu0 %1011 }
 0x2bb   :  { %v1041_v10 = vsub.f32 %v950_v61, %v1012_v63 }
 0x2bd   :  { %v1051_v60 = vmul.f32 1.442695, %v1041_v10 }
 0x2bf   :  { %4145 = vpow2.f32 %v1051_v60 }
 0x2c2   :  { %v1015_v15 = vpop.xlane.xlu1 %1014 }
 0x2c3   :  { %v1042_v16 = vsub.f32 %v951_v20, %v1015_v15 }
 0x2c5   :  { %v5016_v53 = vpop.eup %4145  ;;  %v1053_v25 = vmul.f32 1.442695, %v1042_v16 }
 0x2c6   :  { %v1071_v46 = vsel %vm1009_vm5, %v5016_v53, 0.0 }
 0x2c7   :  { %4147 = vpow2.f32 %v1053_v25  ;;  %1072 = vadd.xlane.f32.xlu2 %v1071_v46 }
 0x2ca   :  { %v1018_v52 = vpop.xlane.xlu1 %1017 }
 0x2cb   :  { %v1043_v54 = vsub.f32 %v952_v40, %v1018_v52 }
 0x2cd   :  { %v5020_v38 = vpop.eup %4147  ;;  %v1055_v34 = vmul.f32 1.442695, %v1043_v54 }
 0x2ce   :  { %v1074_v61 = vsel %vm1009_vm5, %v5020_v38, 0.0 }
 0x2cf   :  { %4149 = vpow2.f32 %v1055_v34  ;;  %1075 = vadd.xlane.f32.xlu1 %v1074_v61 }
 0x2d2   :  { %v1031_v62 = vpop.xlane.xlu1 %1030  ;;  %v1021_v20 = vpop.xlane.xlu2 %1020 }
 0x2d3   :  { %v1044_v37 = vsub.f32 %v953_v3, %v1021_v20  ;;  %v1047_v47 = vsub.f32 %v956_v39, %v1031_v62 }
 0x2d5   :  { %v5024_v50 = vpop.eup %4149  ;;  %v1057_v24 = vmul.f32 1.442695, %v1044_v37  ;;  %v1063_v40 = vmul.f32 1.442695, %v1047_v47 }
 0x2d6   :  { %v1077_v49 = vsel %vm1009_vm5, %v5024_v50, 0.0 }
 0x2d7   :  { %1078 = vadd.xlane.f32.xlu2 %v1077_v49  ;;  %4151 = vpow2.f32 %v1057_v24 }
 0x2d8   :  { %4153 = vpow2.f32 %v1063_v40 }
 0x2da   :  { %v1028_v55 = vpop.xlane.xlu2 %1027  ;;  %v1037_v23 = vpop.xlane.xlu1 %1036 }
 0x2db   :  { %v1046_v29 = vsub.f32 %v955_v31, %v1028_v55  ;;  %v1025_v43 = vpop.xlane.xlu0 %1024  ;;  %v1049_v3 = vsub.f32 %v5001_v13, %v1037_v23 }
 0x2dc   :  { %v1045_v41 = vsub.f32 %v954_v45, %v1025_v43 }
 0x2dd   :  { %v1061_v42 = vmul.f32 1.442695, %v1046_v29  ;;  %v5028_v4 = vpop.eup %4151  ;;  %v1067_v63 = vmul.f32 1.442695, %v1049_v3 }
 0x2de   :  { %v1059_v6 = vmul.f32 1.442695, %v1045_v41  ;;  %v1080_v39 = vsel %vm1009_vm5, %v5028_v4, 0.0  ;;  %v5033_v60 = vpop.eup %4153 }
 0x2df   :  { %4155 = vpow2.f32 %v1061_v42  ;;  %1081 = vadd.xlane.f32.xlu0 %v1080_v39  ;;  %v1089_v25 = vsel %vm1009_vm5, %v5033_v60, 0.0 }
 0x2e0   :  { %4157 = vpow2.f32 %v1059_v6 }
 0x2e1   :  { %4159 = vpow2.f32 %v1067_v63 }
 0x2e3   :  { %v1034_v10 = vpop.xlane.xlu0 %1033 }
 0x2e4   :  { %v1048_v31 = vsub.f32 %v957_v7, %v1034_v10  ;;  %v5046_v7 = vmul.f32 0.17677669, %v4994_v18 }
 0x2e5   :  { %v5035_v15 = vpop.eup %4155 }
 0x2e6   :  { %v1065_v45 = vmul.f32 1.442695, %v1048_v31  ;;  %v5037_v16 = vpop.eup %4157  ;;  %v1086_v13 = vsel %vm1009_vm5, %v5035_v15, 0.0  ;;  %v964_v24 = vsel %vm960_vm4, %v5046_v7, -inf }
 0x2e7   :  { %1087 = vadd.xlane.f32.xlu1 %v1086_v13  ;;  %1090 = vadd.xlane.f32.xlu0 %v1089_v25  ;;  %v1083_v46 = vsel %vm1022_vm6, %v5037_v16, 0.0  ;;  %v5048_v54 = vpop.eup %4159 }
 0x2e8   :  { %4161 = vpow2.f32 %v1065_v45  ;;  %1084 = vadd.xlane.f32.xlu2 %v1083_v46  ;;  %v1095_v20 = vsel %vm1009_vm5, %v5048_v54, 0.0 }
 0x2eb   :  { %v1040_v52 = vpop.xlane.xlu0 %1039 }
 0x2ec   :  { %v1050_v34 = vsub.f32 %v5008_v2, %v1040_v52 }
 0x2ee   :  { %v5051_v61 = vpop.eup %4161  ;;  %v1069_v62 = vmul.f32 1.442695, %v1050_v34 }
 0x2ef   :  { %v1092_v37 = vsel %vm1009_vm5, %v5051_v61, 0.0  ;;  %1096 = vadd.xlane.f32.xlu0 %v1095_v20  ;;  %965 = vmax.xlane.f32.xlu1 %v964_v24 }
 0x2f0   :  { %4163 = vpow2.f32 %v1069_v62  ;;  %1093 = vadd.xlane.f32.xlu2 %v1092_v37 }
 0x2f6   :  { %v5059_v18 = vpop.eup %4163 }
 0x2f7   :  { %v1098_v2 = vsel %vm1022_vm6, %v5059_v18, 0.0 }
 0x2f8   :  { %1099 = vadd.xlane.f32.xlu1 %v1098_v2 }
 0x30b   :  { %v975_v47 = vpop.xlane.xlu2 %974 }
 0x30c   :  { %4165 = vrcp.f32 %v975_v47  ;;  %v990_v23 = vand.u32 2147483648, %v975_v47  ;;  %v988_v43 = vand.u32 2147483647, %v975_v47  ;;  %vm984_vm8 = vweird.f32 %v975_v47 }
 0x30e   :  { %v991_v42 = vor.u32 1.1754944e-38, %v990_v23  ;;  %vm989_vm10 = vcmp.eq.f32.partialorder %v988_v43, 8.507059e+37 }
 0x312   :  { %v4166_v49 = vpop.eup %4165 }
 0x313   :  { %v980_v40 = vmul.f32 %v4166_v49, %v975_v47  ;;  %vm985_vm7 = vweird.f32 %v4166_v49 }
 0x314   :  { %vm986_vm9 = vmor %vm984_vm8, %vm985_vm7 }
 0x315   :  { %v981_v55 = vsub.f32 1.0, %v980_v40 }
 0x317   :  { %v982_v29 = vmul.f32 %v4166_v49, %v981_v55 }
 0x319   :  { %v983_v41 = vadd.f32 %v4166_v49, %v982_v29 }
 0x31b   :  { %v987_v3 = vsel %vm986_vm9, %v4166_v49, %v983_v41 }
 0x31c   :  { %v992_v6 = vsel %vm989_vm10, %v991_v42, %v987_v3 }
 0x31d   :  { %v993_v39 = vmul.f32 %v5012_v5, %v992_v6 }
 0x31f   :  { %3933 = vmatmul.msk.f32.vlgmr.msrb.gmra.mxu0 %vm960_vm4, %v993_v39 }
 0x33a   :  { %v1073_v63 = vpop.xlane.xlu2 %1072 }
 0x33b   :  { %4167 = vrcp.f32 %v1073_v63  ;;  %v1112_v25 = vand.u32 2147483648, %v1073_v63  ;;  %v1110_v52 = vand.u32 2147483647, %v1073_v63  ;;  %vm1106_vm12 = vweird.f32 %v1073_v63 }
 0x33d   :  { %v1113_v20 = vor.u32 1.1754944e-38, %v1112_v25  ;;  %vm1111_vm14 = vcmp.eq.f32.partialorder %v1110_v52, 8.507059e+37 }
 0x341   :  { %v4168_v10 = vpop.eup %4167 }
 0x342   :  { %v1102_v31 = vmul.f32 %v4168_v10, %v1073_v63  ;;  %v1076_v45 = vpop.xlane.xlu1 %1075  ;;  %vm1107_vm11 = vweird.f32 %v4168_v10 }
 0x343   :  { %4169 = vrcp.f32 %v1076_v45  ;;  %vm1108_vm13 = vmor %vm1106_vm12, %vm1107_vm11  ;;  %v1127_v40 = vand.u32 2147483648, %v1076_v45  ;;  %v1125_v23 = vand.u32 2147483647, %v1076_v45  ;;  %vm1121_vm0 = vweird.f32 %v1076_v45 }
 0x344   :  { %v1103_v13 = vsub.f32 1.0, %v1102_v31 }
 0x345   :  { %v1128_v41 = vor.u32 1.1754944e-38, %v1127_v40  ;;  %vm1126_vm7 = vcmp.eq.f32.partialorder %v1125_v23, 8.507059e+37 }
 0x346   :  { %v1104_v46 = vmul.f32 %v4168_v10, %v1103_v13 }
 0x348   :  { %v1105_v34 = vadd.f32 %v4168_v10, %v1104_v46 }
 0x349   :  { %v4170_v62 = vpop.eup %4169 }
 0x34a   :  { %v1109_v37 = vsel %vm1108_vm13, %v4168_v10, %v1105_v34  ;;  %v1117_v5 = vmul.f32 %v4170_v62, %v1076_v45  ;;  %v1079_v24 = vpop.xlane.xlu2 %1078  ;;  %vm1122_vm15 = vweird.f32 %v4170_v62 }
 0x34b   :  { %v1114_v2 = vsel %vm1111_vm14, %v1113_v20, %v1109_v37  ;;  %4171 = vrcp.f32 %v1079_v24  ;;  %vm1123_vm1 = vmor %vm1121_vm0, %vm1122_vm15  ;;  %v1142_v31 = vand.u32 2147483648, %v1079_v24  ;;  %v1140_v13 = vand.u32 2147483647, %v1079_v24 }
 0x34c   :  { %v1118_v47 = vsub.f32 1.0, %v1117_v5  ;;  %v1115_v49 = vmul.f32 %v5016_v53, %v1114_v2  ;;  %vm1136_vm9 = vweird.f32 %v1079_v24 }
 0x34d   :  { %v1143_v46 = vor.u32 1.1754944e-38, %v1142_v31  ;;  %vm1141_vm11 = vcmp.eq.f32.partialorder %v1140_v13, 8.507059e+37 }
 0x34e   :  { %v1119_v55 = vmul.f32 %v4170_v62, %v1118_v47  ;;  %3936 = vmatmul.msk.f32.vlgmr.msra.gmra.mxu0 %vm1009_vm5, %v1115_v49 }
 0x350   :  { %v1120_v29 = vadd.f32 %v4170_v62, %v1119_v55 }
 0x351   :  { %v4172_v43 = vpop.eup %4171 }
 0x352   :  { %v1132_v42 = vmul.f32 %v4172_v43, %v1079_v24  ;;  %v1124_v3 = vsel %vm1123_vm1, %v4170_v62, %v1120_v29  ;;  %v1082_v6 = vpop.xlane.xlu0 %1081  ;;  %vm1137_vm8 = vweird.f32 %v4172_v43 }
 0x353   :  { %v1129_v39 = vsel %vm1126_vm7, %v1128_v41, %v1124_v3  ;;  %4173 = vrcp.f32 %v1082_v6  ;;  %vm1138_vm10 = vmor %vm1136_vm9, %vm1137_vm8  ;;  %v1157_v2 = vand.u32 2147483648, %v1082_v6  ;;  %v1155_v49 = vand.u32 2147483647, %v1082_v6 }
 0x354   :  { %v1133_v63 = vsub.f32 1.0, %v1132_v42  ;;  %v1130_v53 = vmul.f32 %v5020_v38, %v1129_v39  ;;  %vm1151_vm13 = vweird.f32 %v1082_v6 }
 0x355   :  { %v1158_v29 = vor.u32 1.1754944e-38, %v1157_v2  ;;  %vm5083_vm15 = vcmp.eq.f32.partialorder %v1155_v49, 8.507059e+37 }
 0x356   :  { %v1134_v10 = vmul.f32 %v4172_v43, %v1133_v63  ;;  %3937 = vmatmul.msk.f32.gmra.mxu0 %vm1009_vm5, %v1130_v53 }
 0x358   :  { %v1135_v45 = vadd.f32 %v4172_v43, %v1134_v10 }
 0x359   :  { %v4174_v25 = vpop.eup %4173 }
 0x35a   :  { %v1139_v52 = vsel %vm1138_vm10, %v4172_v43, %v1135_v45  ;;  %v1147_v34 = vmul.f32 %v4174_v25, %v1082_v6  ;;  %v1088_v62 = vpop.xlane.xlu1 %1087  ;;  %v5069_v20 = vpop.xlane.xlu0 %1090  ;;  %vm1152_vm12 = vweird.f32 %v4174_v25 }
 0x35b   :  { %4175 = vrcp.f32 %v1088_v62  ;;  %v5071_v37 = vpop.xlane.xlu2 %1084  ;;  %v1144_v38 = vsel %vm1141_vm11, %v1143_v46, %v1139_v52  ;;  %vm5079_vm14 = vmor %vm1151_vm13, %vm1152_vm12  ;;  %vm1181_vm0 = vweird.f32 %v1088_v62  ;;  %v1185_v63 = vand.u32 2147483647, %v1088_v62 }
 0x35c   :  { %v1148_v5 = vsub.f32 1.0, %v1147_v34  ;;  %4177 = vrcp.f32 %v5071_v37  ;;  %v1145_v47 = vmul.f32 %v5024_v50, %v1144_v38  ;;  %v1187_v13 = vand.u32 2147483648, %v1088_v62 }
 0x35d   :  { %4179 = vrcp.f32 %v5069_v20  ;;  %vm1166_vm1 = vweird.f32 %v5071_v37  ;;  %vm1186_vm10 = vcmp.eq.f32.partialorder %v1185_v63, 8.507059e+37  ;;  %vm1196_vm11 = vweird.f32 %v5069_v20 }
 0x35e   :  { %v1149_v24 = vmul.f32 %v4174_v25, %v1148_v5  ;;  %3938 = vmatmul.msk.f32.gmra.mxu0 %vm1009_vm5, %v1145_v47  ;;  %v1202_v63 = vand.u32 2147483648, %v5069_v20 }
 0x360   :  { %v1150_v40 = vadd.f32 %v4174_v25, %v1149_v24  ;;  %v1172_v24 = vand.u32 2147483648, %v5071_v37 }
 0x361   :  { %v4176_v55 = vpop.eup %4175 }
 0x362   :  { %v4178_v23 = vpop.eup %4177  ;;  %v1177_v43 = vmul.f32 %v4176_v55, %v1088_v62  ;;  %v5077_v41 = vpop.xlane.xlu0 %1096  ;;  %v1154_v10 = vsel %vm5079_vm14, %v4174_v25, %v1150_v40  ;;  %vm1182_vm7 = vweird.f32 %v4176_v55  ;;  %v1173_v62 = vor.u32 1.1754944e-38, %v1172_v24 }
 0x363   :  { %v966_v42 = vpop.xlane.xlu1 %965  ;;  %v5087_v50 = vpop.eup %4179  ;;  %v1162_v6 = vmul.f32 %v4178_v23, %v5071_v37  ;;  %v1159_v25 = vsel %vm5083_vm15, %v1158_v29, %v1154_v10  ;;  %vm1167_vm8 = vweird.f32 %v4178_v23  ;;  %vm1183_vm9 = vmor %vm1181_vm0, %vm1182_vm7 }
 0x364   :  { %v5090_v53 = vpop.xlane.xlu2 %1093  ;;  %v1178_v31 = vsub.f32 1.0, %v1177_v43  ;;  %v1192_v45 = vmul.f32 %v5087_v50, %v5069_v20  ;;  %v968_v52 = vsub.f32 %v5046_v7, %v966_v42  ;;  %v1160_v47 = vmul.f32 %v5028_v4, %v1159_v25  ;;  %vm1168_vm13 = vmor %vm1166_vm1, %vm1167_vm8 }
 0x365   :  { %4181 = vrcp.f32 %v5090_v53  ;;  %v1163_v46 = vsub.f32 1.0, %v1162_v6  ;;  %v1170_v43 = vand.u32 2147483647, %v5071_v37  ;;  %v1188_v7 = vor.u32 1.1754944e-38, %v1187_v13 }
 0x366   :  { %4183 = vrcp.f32 %v5077_v41  ;;  %v1179_v34 = vmul.f32 %v4176_v55, %v1178_v31  ;;  %v1193_v38 = vsub.f32 1.0, %v1192_v45  ;;  %v971_v2 = vmul.f32 1.442695, %v968_v52  ;;  %3939 = vmatmul.msk.f32.gmra.mxu0 %vm1009_vm5, %v1160_v47 }
 0x367   :  { %v1164_v5 = vmul.f32 %v4178_v23, %v1163_v46  ;;  %vm1197_vm12 = vweird.f32 %v5087_v50  ;;  %vm1171_vm14 = vcmp.eq.f32.partialorder %v1170_v43, 8.507059e+37  ;;  %v1200_v45 = vand.u32 2147483647, %v5069_v20 }
 0x368   :  { %v1180_v49 = vadd.f32 %v4176_v55, %v1179_v34  ;;  %v1194_v40 = vmul.f32 %v5087_v50, %v1193_v38  ;;  %4185 = vpow2.f32 %v971_v2  ;;  %vm1198_vm15 = vmor %vm1196_vm11, %vm1197_vm12  ;;  %v1217_v47 = vand.u32 2147483648, %v5090_v53 }
 0x369   :  { %v1165_v29 = vadd.f32 %v4178_v23, %v1164_v5  ;;  %vm1201_vm0 = vcmp.eq.f32.partialorder %v1200_v45, 8.507059e+37  ;;  %vm1211_vm7 = vweird.f32 %v5090_v53  ;;  %vm1226_vm11 = vweird.f32 %v5077_v41 }
 0x36a   :  { %v1184_v3 = vsel %vm1183_vm9, %v4176_v55, %v1180_v49  ;;  %v1195_v4 = vadd.f32 %v5087_v50, %v1194_v40  ;;  %v1215_v49 = vand.u32 2147483647, %v5090_v53 }
 0x36b   :  { %v4182_v42 = vpop.eup %4181  ;;  %v5109_v39 = vpop.xlane.xlu1 %1099  ;;  %v1189_v10 = vsel %vm1186_vm10, %v1188_v7, %v1184_v3  ;;  %v1169_v55 = vsel %vm1168_vm13, %v4178_v23, %v1165_v29  ;;  %v1218_v29 = vor.u32 1.1754944e-38, %v1217_v47 }
 0x36c   :  { %v4184_v6 = vpop.eup %4183  ;;  %v1207_v31 = vmul.f32 %v4182_v42, %v5090_v53  ;;  %v1190_v13 = vmul.f32 %v5035_v15, %v1189_v10  ;;  %4187 = vrcp.f32 %v5109_v39  ;;  %v1174_v52 = vsel %vm1171_vm14, %v1173_v62, %v1169_v55 }
 0x36d   :  { %v1222_v34 = vmul.f32 %v4184_v6, %v5077_v41  ;;  %v1175_v38 = vmul.f32 %v5037_v16, %v1174_v52  ;;  %v1199_v37 = vsel %vm1198_vm15, %v5087_v50, %v1195_v4  ;;  %v1203_v15 = vor.u32 1.1754944e-38, %v1202_v63 }
 0x36e   :  { %v1208_v46 = vsub.f32 1.0, %v1207_v31  ;;  %3941 = vmatmul.msk.f32.vlgmr.msrb.gmra.mxu3 %vm1009_vm5, %v1190_v13  ;;  %v5127_v23 = vpop.eup %4185  ;;  %vm1212_vm1 = vweird.f32 %v4182_v42  ;;  %vm1216_vm9 = vcmp.eq.f32.partialorder %v1215_v49, 8.507059e+37  ;;  %vm1227_vm10 = vweird.f32 %v4184_v6 }
 0x36f   :  { %v976_v5 = vsel %vm960_vm4, %v5127_v23, 0.0  ;;  %3940 = vmatmul.msk.f32.gmra.mxu0 %vm1009_vm5, %v1175_v38  ;;  %v1204_v20 = vsel %vm1201_vm0, %v1203_v15, %v1199_v37  ;;  %v1223_v24 = vsub.f32 1.0, %v1222_v34  ;;  %vm1213_vm8 = vmor %vm1211_vm7, %vm1212_vm1  ;;  %v1232_v62 = vand.u32 2147483648, %v5077_v41 }
 0x370   :  { %v1209_v25 = vmul.f32 %v4182_v42, %v1208_v46  ;;  %977 = vadd.xlane.f32.xlu2 %v976_v5  ;;  %v1205_v50 = vmul.f32 %v5033_v60, %v1204_v20  ;;  %v1230_v53 = vand.u32 2147483647, %v5077_v41  ;;  %vm1228_vm12 = vmor %vm1226_vm11, %vm1227_vm10  ;;  %v1247_v45 = vand.u32 2147483648, %v5109_v39 }
 0x371   :  { %v1224_v40 = vmul.f32 %v4184_v6, %v1223_v24  ;;  %vm1241_vm15 = vweird.f32 %v5109_v39 }
 0x372   :  { %v1210_v2 = vadd.f32 %v4182_v42, %v1209_v25  ;;  %v4188_v16 = vpop.eup %4187  ;;  %vm1231_vm13 = vcmp.eq.f32.partialorder %v1230_v53, 8.507059e+37  ;;  %v1248_v52 = vor.u32 1.1754944e-38, %v1247_v45 }
 0x373   :  { %v1237_v43 = vmul.f32 %v4188_v16, %v5109_v39  ;;  %v1225_v10 = vadd.f32 %v4184_v6, %v1224_v40  ;;  %vm1242_vm14 = vweird.f32 %v4188_v16 }
 0x374   :  { %v1214_v7 = vsel %vm1213_vm8, %v4182_v42, %v1210_v2  ;;  %v1233_v42 = vor.u32 1.1754944e-38, %v1232_v62  ;;  %vm1243_vm0 = vmor %vm1241_vm15, %vm1242_vm14 }
 0x375   :  { %v1219_v3 = vsel %vm1216_vm9, %v1218_v29, %v1214_v7  ;;  %v1238_v4 = vsub.f32 1.0, %v1237_v43  ;;  %v1229_v31 = vsel %vm1228_vm12, %v4184_v6, %v1225_v10 }
 0x376   :  { %3942 = vmatmul.msk.f32.gmra.mxu3 %vm1009_vm5, %v1205_v50  ;;  %v1220_v60 = vmul.f32 %v5051_v61, %v1219_v3  ;;  %v1234_v55 = vsel %vm1231_vm13, %v1233_v42, %v1229_v31  ;;  %v1245_v61 = vand.u32 2147483647, %v5109_v39 }
 0x377   :  { %v1239_v63 = vmul.f32 %v4188_v16, %v1238_v4  ;;  %v1235_v46 = vmul.f32 %v5048_v54, %v1234_v55 }
 0x378   :  { %vm1246_vm1 = vcmp.eq.f32.partialorder %v1245_v61, 8.507059e+37 }
 0x379   :  { %v1240_v13 = vadd.f32 %v4188_v16, %v1239_v63 }
 0x37b   :  { %v1244_v41 = vsel %vm1243_vm0, %v4188_v16, %v1240_v13 }
 0x37c   :  { %v1249_v6 = vsel %vm1246_vm1, %v1248_v52, %v1244_v41 }
 0x37d   :  { %v1250_v34 = vmul.f32 %v5059_v18, %v1249_v6 }
 0x37e   :  { %3943 = vmatmul.msk.f32.gmra.mxu3 %vm1009_vm5, %v1220_v60 }
 0x386   :  { %3944 = vmatmul.msk.f32.gmra.mxu3 %vm1009_vm5, %v1235_v46 }
 0x38e   :  { %3945 = vmatmul.msk.f32.gmra.mxu3 %vm1009_vm5, %v1250_v34 }
 0x39c   :  { %v5150_v38 = vpop.f32.mrf.mxu0 }
 0x3cb   :  { %v1386_v37 = vpop.f32.mrf.mxu0 }
 0x3cc   :  { %v1456_v15 = vrot.slane %v1386_v37, 4  ;;  %v5153_v25 = vadd.f32 %v4711_v19, %v1386_v37 }
 0x3ce   :  { %v5156_v54 = vadd.f32 %v4715_v22, %v1456_v15  ;;  %1539 = vst [vmem:[#allocation1] ss:$2 sm:$0xff] %v5153_v25 }
 0x3d0   :  { %1541 = vst [vmem:[#allocation1 + $0x1] ss:$2 sm:$0xff] %v5156_v54 }
 0x3d3   :  { %v1389_v39 = vpop.f32.mrf.mxu0 }
 0x3d4   :  { %v1457_v5 = vrot.slane %v1389_v39, 4  ;;  %v5161_v18 = vadd.f32 %v4719_v27, %v1389_v39 }
 0x3d6   :  { %v5164_v24 = vadd.f32 %v4723_v35, %v1457_v5  ;;  %1543 = vst [vmem:[#allocation1 + $0x10] ss:$2 sm:$0xff] %v5161_v18 }
 0x3d7   :  { %v1554_v20 = vld.sshfl [vmem:[#allocation1] sm:$0xff pattern:$0x75316420] }
 0x3d8   :  { %3948 = vmatmul.msk.f32.vlgmr.msra.gmra.mxu1 %vm108_vm2, %v1554_v20  ;;  %1545 = vst [vmem:[#allocation1 + $0x11] ss:$2 sm:$0xff] %v5164_v24 }
 0x3db   :  { %v1392_v19 = vpop.f32.mrf.mxu0 }
 0x3dc   :  { %v1458_v22 = vrot.slane %v1392_v19, 4  ;;  %v5170_v2 = vadd.f32 %v4728_v51, %v1392_v19 }
 0x3de   :  { %v5173_v47 = vadd.f32 %v4732_v57, %v1458_v22  ;;  %1547 = vst [vmem:[#allocation1 + $0x20] ss:$2 sm:$0xff] %v5170_v2 }
 0x3df   :  { %v1555_v16 = vld.sshfl [vmem:[#allocation1 + $0x10] sm:$0xff pattern:$0x75316420] }
 0x3e0   :  { %3949 = vmatmul.msk.f32.gmra.mxu1 %vm108_vm2, %v1555_v16  ;;  %1549 = vst [vmem:[#allocation1 + $0x21] ss:$2 sm:$0xff] %v5173_v47 }
 0x3e3   :  { %v978_v27 = vpop.xlane.xlu2 %977  ;;  %v1395_v35 = vpop.f32.mrf.mxu0 }
 0x3e4   :  { %4189 = vrcp.f32 %v978_v27  ;;  %v1459_v50 = vrot.slane %v1395_v35, 4  ;;  %v5179_v49 = vadd.f32 %v4742_v0, %v1395_v35  ;;  %v1005_v3 = vand.u32 2147483648, %v978_v27 }
 0x3e5   :  { %v1003_v10 = vand.u32 2147483647, %v978_v27  ;;  %vm999_vm8 = vweird.f32 %v978_v27 }
 0x3e6   :  { %v5182_v51 = vadd.f32 %v4747_v11, %v1459_v50  ;;  %1551 = vst [vmem:[#allocation1 + $0x30] ss:$2 sm:$0xff] %v5179_v49  ;;  %v1006_v31 = vor.u32 1.1754944e-38, %v1005_v3 }
 0x3e7   :  { %v1556_v40 = vld.sshfl [vmem:[#allocation1 + $0x20] sm:$0xff pattern:$0x75316420]  ;;  %vm1004_vm10 = vcmp.eq.f32.partialorder %v1003_v10, 8.507059e+37 }
 0x3e8   :  { %3950 = vmatmul.msk.f32.gmra.mxu1 %vm108_vm2, %v1556_v40  ;;  %1553 = vst [vmem:[#allocation1 + $0x31] ss:$2 sm:$0xff] %v5182_v51 }
 0x3ea   :  { %v4190_v57 = vpop.eup %4189 }
 0x3eb   :  { %v995_v43 = vmul.f32 %v4190_v57, %v978_v27  ;;  %vm1000_vm7 = vweird.f32 %v4190_v57 }
 0x3ec   :  { %v1398_v29 = vpop.f32.mrf.mxu0  ;;  %vm1001_vm9 = vmor %vm999_vm8, %vm1000_vm7 }
 0x3ed   :  { %v996_v7 = vsub.f32 1.0, %v995_v43  ;;  %v5188_v4 = vadd.f32 %v4770_v21, %v1398_v29 }
 0x3ef   :  { %v997_v0 = vmul.f32 %v4190_v57, %v996_v7  ;;  %1558 = vst [vmem:[#allocation1] ss:$2 sm:$0xff] %v5188_v4  ;;  %v1557_v60 = vld.sshfl [vmem:[#allocation1 + $0x30] sm:$0xff pattern:$0x75316420] }
 0x3f0   :  { %3951 = vmatmul.msk.f32.gmra.mxu1 %vm108_vm2, %v1557_v60 }
 0x3f1   :  { %v1433_v11 = vpop.f32.mrf.mxu3  ;;  %v998_v62 = vadd.f32 %v4190_v57, %v997_v0 }
 0x3f2   :  { %v1460_v53 = vrot.slane %v1433_v11, 4  ;;  %v5192_v63 = vadd.f32 %v4782_v33, %v1433_v11 }
 0x3f3   :  { %v1002_v42 = vsel %vm1001_vm9, %v4190_v57, %v998_v62 }
 0x3f4   :  { %v5196_v21 = vadd.f32 %v4789_v48, %v1460_v53  ;;  %1559 = vst [vmem:[#allocation1 + $0x1] ss:$2 sm:$0xff] %v5192_v63  ;;  %v1007_v55 = vsel %vm1004_vm10, %v1006_v31, %v1002_v42  ;;  %v5212_v48 = vadd.f32 %v4778_v26, %v5150_v38 }
 0x3f5   :  { %v1008_v13 = vmul.f32 %v5127_v23, %v1007_v55 }
 0x3f6   :  { %1560 = vst [vmem:[#allocation1 + $0x10] ss:$2 sm:$0xff] %v5196_v21 }
 0x3f7   :  { %3935 = vmatmul.msk.f32.vlgmr.msra.gmra.mxu2 %vm960_vm4, %v1008_v13 }
 0x3f9   :  { %v1436_v33 = vpop.f32.mrf.mxu3 }
 0x3fa   :  { %v1461_v45 = vrot.slane %v1436_v33, 4  ;;  %v5203_v46 = vadd.f32 %v4793_v58, %v1436_v33 }
 0x3fb   :  { %v1566_v61 = vld.sshfl [vmem:[#allocation1] sm:$0xff pattern:$0x75316420] }
 0x3fc   :  { %v5206_v41 = vadd.f32 %v4803_v8, %v1461_v45  ;;  %1561 = vst [vmem:[#allocation1 + $0x11] ss:$2 sm:$0xff] %v5203_v46  ;;  %3952 = vmatmul.msk.f32.gmra.mxu1 %vm108_vm2, %v1566_v61 }
 0x3fe   :  { %1562 = vst [vmem:[#allocation1 + $0x20] ss:$2 sm:$0xff] %v5206_v41 }
 0x3ff   :  { %3946 = vmatmul.msk.f32.vlgmr.msrb.gmra.mxu2 %vm108_vm2, %v5212_v48 }
 0x401   :  { %v1439_v23 = vpop.f32.mrf.mxu3 }
 0x402   :  { %v1462_v58 = vrot.slane %v1439_v23, 4  ;;  %v5218_v52 = vadd.f32 %v4807_v14, %v1439_v23 }
 0x403   :  { %v1567_v8 = vld.sshfl [vmem:[#allocation1 + $0x10] sm:$0xff pattern:$0x75316420] }
 0x404   :  { %1577 = vst [vmem:[#allocation1 + $0x10] ss:$2 sm:$0xff] %v4801_v1  ;;  %v5222_v6 = vadd.f32 %v4819_v44, %v1462_v58  ;;  %3953 = vmatmul.msk.f32.gmra.mxu1 %vm108_vm2, %v1567_v8 }
 0x405   :  { %1579 = vst [vmem:[#allocation1 + $0x11] ss:$2 sm:$0xff] %v4810_v17 }
 0x406   :  { %1563 = vst [vmem:[#allocation1 + $0x21] ss:$2 sm:$0xff] %v5218_v52 }
 0x407   :  { %1564 = vst [vmem:[#allocation1 + $0x30] ss:$2 sm:$0xff] %v5222_v6 }
 0x409   :  { %v1442_v34 = vpop.f32.mrf.mxu3 }
 0x40a   :  { %v1463_v38 = vrot.slane %v1442_v34, 4  ;;  %v5229_v37 = vadd.f32 %v4823_v56, %v1442_v34 }
 0x40c   :  { %v1589_v14 = vld.sshfl [vmem:[#allocation1 + $0x10] sm:$0xff pattern:$0x75316420]  ;;  %1565 = vst [vmem:[#allocation1 + $0x31] ss:$2 sm:$0xff] %v5229_v37  ;;  %v5234_v15 = vadd.f32 %v4836_v9, %v1463_v38 }
 0x40d   :  { %1594 = vst [vmem:[#allocation1 + $0x10] ss:$2 sm:$0xff] %v4810_v17  ;;  %v1568_v44 = vld.sshfl [vmem:[#allocation1 + $0x20] sm:$0xff pattern:$0x75316420] }
 0x40e   :  { %1595 = vst [vmem:[#allocation1 + $0x11] ss:$2 sm:$0xff] %v4801_v1  ;;  %3954 = vmatmul.msk.f32.gmra.mxu1 %vm108_vm2, %v1568_v44 }
 0x40f   :  { %1581 = vst [vmem:[#allocation1 + $0x20] ss:$2 sm:$0xff] %v4801_v1 }
 0x410   :  { %1583 = vst [vmem:[#allocation1 + $0x21] ss:$2 sm:$0xff] %v4810_v17 }
 0x411   :  { %1570 = vst [vmem:[#allocation1] ss:$2 sm:$0xff] %v5234_v15  ;;  %v1445_v56 = vpop.f32.mrf.mxu3 }
 0x412   :  { %v5242_v39 = vadd.f32 %v4839_v12, %v1445_v56 }
 0x413   :  { %v1569_v5 = vld.sshfl [vmem:[#allocation1 + $0x30] sm:$0xff pattern:$0x75316420] }
 0x414   :  { %1585 = vst [vmem:[#allocation1 + $0x30] ss:$2 sm:$0xff] %v4801_v1 }
 0x415   :  { %1587 = vst [vmem:[#allocation1 + $0x31] ss:$2 sm:$0xff] %v4810_v17  ;;  %v1601_v3 = vld.sshfl [vmem:[#allocation1 + $0x10] sm:$0xff pattern:$0x75316420] }
 0x416   :  { %1571 = vst [vmem:[#allocation1 + $0x1] ss:$2 sm:$0xff] %v5242_v39  ;;  %3955 = vmatmul.msk.f32.gmra.mxu1 %vm108_vm2, %v1569_v5 }
 0x417   :  { %v1590_v9 = vld.sshfl [vmem:[#allocation1 + $0x20] sm:$0xff pattern:$0x75316420] }
 0x418   :  { %1596 = vst [vmem:[#allocation1 + $0x20] ss:$2 sm:$0xff] %v4810_v17 }
 0x419   :  { %1597 = vst [vmem:[#allocation1 + $0x21] ss:$2 sm:$0xff] %v4801_v1 }
 0x41c   :  { %v1591_v20 = vld.sshfl [vmem:[#allocation1 + $0x30] sm:$0xff pattern:$0x75316420] }
 0x41d   :  { %1598 = vst [vmem:[#allocation1 + $0x30] ss:$2 sm:$0xff] %v4810_v17  ;;  %v1572_v19 = vld.sshfl [vmem:[#allocation1] sm:$0xff pattern:$0x75316420] }
 0x41e   :  { %1599 = vst [vmem:[#allocation1 + $0x31] ss:$2 sm:$0xff] %v4801_v1  ;;  %3956 = vmatmul.msk.f32.gmra.mxu1 %vm108_vm2, %v1572_v19 }
 0x41f   :  { %1573 = vst [vmem:[#allocation1] ss:$2 sm:$0xff] %v4801_v1 }
 0x420   :  { %1575 = vst [vmem:[#allocation1 + $0x1] ss:$2 sm:$0xff] %v4810_v17  ;;  %v1602_v53 = vld.sshfl [vmem:[#allocation1 + $0x20] sm:$0xff pattern:$0x75316420] }
 0x425   :  { %v1603_v45 = vld.sshfl [vmem:[#allocation1 + $0x30] sm:$0xff pattern:$0x75316420] }
 0x427   :  { %v1588_v12 = vld.sshfl [vmem:[#allocation1] sm:$0xff pattern:$0x75316420] }
 0x428   :  { %1592 = vst [vmem:[#allocation1] ss:$2 sm:$0xff] %v4801_v1 }
 0x429   :  { %1593 = vst [vmem:[#allocation1 + $0x1] ss:$2 sm:$0xff] %v4801_v1 }
 0x430   :  { %v1600_v22 = vld.sshfl [vmem:[#allocation1] sm:$0xff pattern:$0x75316420] }
 0x431   :  { %1604 = vst [vmem:[#allocation1] ss:$2 sm:$0xff] %v4810_v17 }
 0x432   :  { %1605 = vst [vmem:[#allocation1 + $0x1] ss:$2 sm:$0xff] %v4801_v1 }
 0x439   :  { %v5259_v50 = vld.sshfl [vmem:[#allocation1] sm:$0xff pattern:$0x75316420] }
 0x455   :  { %v1651_v16 = vpop.f32.mrf.mxu1 }
 0x456   :  { %v1652_v27 = vadd.f32 %v1651_v16, %v1588_v12 }
 0x458   :  { %v1687_v35 = vrot.slane %v1652_v27, 4  ;;  %4191 = vtanh.f32 %v1652_v27 }
 0x45a   :  { %4193 = vtanh.f32 %v1687_v35 }
 0x45d   :  { %v1654_v57 = vpop.f32.mrf.mxu1 }
 0x45e   :  { %v5261_v40 = vpop.eup %4191  ;;  %v1655_v43 = vadd.f32 %v1654_v57, %v1589_v14 }
 0x45f   :  { %1732 = vst [vmem:[#allocation1] ss:$2 sm:$0xff] %v5261_v40 }
 0x460   :  { %v5264_v7 = vpop.eup %4193  ;;  %v1688_v29 = vrot.slane %v1655_v43, 4  ;;  %4195 = vtanh.f32 %v1655_v43 }
 0x461   :  { %1734 = vst [vmem:[#allocation1 + $0x1] ss:$2 sm:$0xff] %v5264_v7 }
 0x462   :  { %4197 = vtanh.f32 %v1688_v29 }
 0x465   :  { %v1657_v10 = vpop.f32.mrf.mxu1 }
 0x466   :  { %v5267_v0 = vpop.eup %4195  ;;  %v1658_v62 = vadd.f32 %v1657_v10, %v1590_v9  ;;  %v5307_v10 = vld [vmem:[%s6038_s10] ss:$0 sm:$0xff] }
 0x467   :  { %1736 = vst [vmem:[#allocation1 + $0x10] ss:$2 sm:$0xff] %v5267_v0 }
 0x468   :  { %v5270_v11 = vpop.eup %4197  ;;  %v1689_v60 = vrot.slane %v1658_v62, 4  ;;  %4199 = vtanh.f32 %v1658_v62  ;;  %v1747_v9 = vld.sshfl [vmem:[#allocation1] sm:$0xff pattern:$0x75316420] }
 0x469   :  { %1738 = vst [vmem:[#allocation1 + $0x11] ss:$2 sm:$0xff] %v5270_v11 }
 0x46a   :  { %4201 = vtanh.f32 %v1689_v60 }
 0x46d   :  { %v1660_v42 = vpop.f32.mrf.mxu1 }
 0x46e   :  { %v5273_v31 = vpop.eup %4199  ;;  %v1661_v55 = vadd.f32 %v1660_v42, %v1591_v20 }
 0x46f   :  { %1740 = vst [vmem:[#allocation1 + $0x20] ss:$2 sm:$0xff] %v5273_v31 }
 0x470   :  { %v5276_v13 = vpop.eup %4201  ;;  %v1690_v33 = vrot.slane %v1661_v55, 4  ;;  %4203 = vtanh.f32 %v1661_v55  ;;  %v1748_v57 = vld.sshfl [vmem:[#allocation1 + $0x10] sm:$0xff pattern:$0x75316420] }
 0x471   :  { %1742 = vst [vmem:[#allocation1 + $0x21] ss:$2 sm:$0xff] %v5276_v13 }
 0x472   :  { %4205 = vtanh.f32 %v1690_v33 }
 0x476   :  { %v5279_v61 = vpop.eup %4203 }
 0x477   :  { %1744 = vst [vmem:[#allocation1 + $0x30] ss:$2 sm:$0xff] %v5279_v61 }
 0x478   :  { %v5282_v8 = vpop.eup %4205  ;;  %v1749_v60 = vld.sshfl [vmem:[#allocation1 + $0x20] sm:$0xff pattern:$0x75316420] }
 0x479   :  { %v1663_v23 = vpop.f32.mrf.mxu1  ;;  %1746 = vst [vmem:[#allocation1 + $0x31] ss:$2 sm:$0xff] %v5282_v8 }
 0x47a   :  { %v1664_v58 = vadd.f32 %v1663_v23, %v1600_v22  ;;  %v1349_v34 = vpop.f32.mrf.mxu2 }
 0x47b   :  { %v5286_v38 = vadd.f32 %v4826_v59, %v1349_v34 }
 0x47c   :  { %4207 = vtanh.f32 %v1664_v58  ;;  %v1691_v14 = vrot.slane %v1664_v58, 4 }
 0x47d   :  { %3947 = vmatmul.msk.f32.gmra.mxu2 %vm108_vm2, %v5286_v38 }
 0x47e   :  { %4209 = vtanh.f32 %v1691_v14 }
 0x481   :  { %v1666_v44 = vpop.f32.mrf.mxu1 }
 0x482   :  { %v5290_v56 = vpop.eup %4207  ;;  %v1667_v5 = vadd.f32 %v1666_v44, %v1601_v3  ;;  %v1513_v43 = vpop.f32.mrf.mxu2  ;;  %v1750_v3 = vld.sshfl [vmem:[#allocation1 + $0x30] sm:$0xff pattern:$0x75316420] }
 0x483   :  { %1751 = vst [vmem:[#allocation1] ss:$2 sm:$0xff] %v5290_v56  ;;  %v1514_v62 = vadd.f32 %v5307_v10, %v1513_v43 }
 0x484   :  { %v1692_v20 = vrot.slane %v1667_v5, 4  ;;  %4211 = vtanh.f32 %v1667_v5  ;;  %v5293_v19 = vpop.eup %4209 }
 0x486   :  { %4213 = vtanh.f32 %v1692_v20 }
 0x48a   :  { %v5295_v12 = vpop.eup %4211  ;;  %v1752_v22 = vld.sshfl [vmem:[#allocation1] sm:$0xff pattern:$0x75316420] }
 0x48b   :  { %v1669_v16 = vpop.f32.mrf.mxu1  ;;  %3957 = vmatpush.xpose.msk.msra.mxu2 %vm108_vm2, %v1752_v22  ;;  %1795 = vst [vmem:[#allocation1] ss:$2 sm:$0xff] %v5293_v19 }
 0x48c   :  { %v1670_v27 = vadd.f32 %v1669_v16, %v1602_v53  ;;  %1797 = vst [vmem:[#allocation1 + $0x1] ss:$2 sm:$0xff] %v5295_v12  ;;  %v5300_v35 = vpop.eup %4213 }
 0x48d   :  { %1799 = vst [vmem:[#allocation1 + $0x10] ss:$2 sm:$0xff] %v5300_v35 }
 0x48e   :  { %v1693_v29 = vrot.slane %v1670_v27, 4  ;;  %4215 = vtanh.f32 %v1670_v27 }
 0x48f   :  { %3958 = vmatpush.xpose.msk.msra.mxu2 %vm108_vm2, %v1750_v3 }
 0x490   :  { %4217 = vtanh.f32 %v1693_v29 }
 0x491   :  { %4219 = vtanh.f32 %v1514_v62 }
 0x493   :  { %v1672_v53 = vpop.f32.mrf.mxu1  ;;  %3959 = vmatpush.xpose.msk.msra.mxu2 %vm108_vm2, %v1749_v60  ;;  %v1810_v16 = vld.sshfl [vmem:[#allocation1] sm:$0xff pattern:$0x75316420] }
 0x494   :  { %v4216_v42 = vpop.eup %4215  ;;  %v1673_v55 = vadd.f32 %v1672_v53, %v1603_v45 }
 0x495   :  { %1801 = vst [vmem:[#allocation1 + $0x11] ss:$2 sm:$0xff] %v4216_v42 }
 0x496   :  { %v5311_v33 = vpop.eup %4217  ;;  %v1694_v23 = vrot.slane %v1673_v55, 4  ;;  %4221 = vtanh.f32 %v1673_v55 }
 0x497   :  { %1803 = vst [vmem:[#allocation1 + $0x20] ss:$2 sm:$0xff] %v5311_v33  ;;  %3960 = vmatpush.xpose.msk.msra.mxu2 %vm108_vm2, %v1748_v57  ;;  %v5315_v58 = vpop.eup %4219 }
 0x498   :  { %4223 = vtanh.f32 %v1694_v23 }
 0x49b   :  { %v1675_v34 = vpop.f32.mrf.mxu1  ;;  %3961 = vmatpush.xpose.msk.msra.mxu2 %vm108_vm2, %v1747_v9 }
 0x49c   :  { %v4222_v14 = vpop.eup %4221  ;;  %v1676_v44 = vadd.f32 %v1675_v34, %v5259_v50  ;;  %v1811_v45 = vld.sshfl [vmem:[#allocation1 + $0x10] sm:$0xff pattern:$0x75316420] }
 0x49d   :  { %1805 = vst [vmem:[#allocation1 + $0x21] ss:$2 sm:$0xff] %v4222_v14 }
 0x49e   :  { %v4224_v5 = vpop.eup %4223  ;;  %v1695_v20 = vrot.slane %v1676_v44, 4  ;;  %4225 = vtanh.f32 %v1676_v44  ;;  %3962 = vmatmul.msk.f32.vlgmr.msra.gmra.mxu2 %vm108_vm2, %v5315_v58  ;;  %1855 = vst [vmem:[#allocation1 + $0x10] ss:$2 sm:$0xff] %v5267_v0 }
 0x49f   :  { %4036 = vmatpush.xpose.msk.msrb.mxu2 %vm108_vm2, %v5315_v58  ;;  %1807 = vst [vmem:[#allocation1 + $0x30] ss:$2 sm:$0xff] %v4224_v5 }
 0x4a0   :  { %4227 = vtanh.f32 %v1695_v20  ;;  %1857 = vst [vmem:[#allocation1 + $0x11] ss:$2 sm:$0xff] %v5270_v11 }
 0x4a4   :  { %v4226_v9 = vpop.eup %4225  ;;  %v1812_v22 = vld.sshfl [vmem:[#allocation1 + $0x20] sm:$0xff pattern:$0x75316420] }
 0x4a5   :  { %1809 = vst [vmem:[#allocation1 + $0x31] ss:$2 sm:$0xff] %v4226_v9 }
 0x4a6   :  { %v4228_v50 = vpop.eup %4227  ;;  %1859 = vst [vmem:[#allocation1 + $0x20] ss:$2 sm:$0xff] %v5273_v31 }
 0x4a7   :  { %1814 = vst [vmem:[#allocation1] ss:$2 sm:$0xff] %v4228_v50  ;;  %v5326_v27 = vld.sshfl [vmem:[#allocation1 + $0x10] sm:$0xff pattern:$0x75316420] }
 0x4a8   :  { %1861 = vst [vmem:[#allocation1 + $0x21] ss:$2 sm:$0xff] %v5276_v13 }
 0x4a9   :  { %1918 = vst [vmem:[#allocation1 + $0x10] ss:$2 sm:$0xff] %v5300_v35 }
 0x4aa   :  { %1920 = vst [vmem:[#allocation1 + $0x11] ss:$2 sm:$0xff] %v4216_v42 }
 0x4ac   :  { %v1813_v57 = vld.sshfl [vmem:[#allocation1 + $0x30] sm:$0xff pattern:$0x75316420] }
 0x4ad   :  { %1863 = vst [vmem:[#allocation1 + $0x30] ss:$2 sm:$0xff] %v5279_v61 }
 0x4ae   :  { %v1815_v43 = vld.sshfl [vmem:[#allocation1] sm:$0xff pattern:$0x75316420]  ;;  %1865 = vst [vmem:[#allocation1 + $0x31] ss:$2 sm:$0xff] %v5282_v8 }
 0x4af   :  { %3963 = vmatpush.xpose.msk.msrb.mxu0 %vm108_vm2, %v1815_v43  ;;  %1851 = vst [vmem:[#allocation1] ss:$2 sm:$0xff] %v5261_v40  ;;  %v5334_v29 = vld.sshfl [vmem:[#allocation1 + $0x20] sm:$0xff pattern:$0x75316420] }
 0x4b0   :  { %1853 = vst [vmem:[#allocation1 + $0x1] ss:$2 sm:$0xff] %v5264_v7 }
 0x4b1   :  { %1922 = vst [vmem:[#allocation1 + $0x20] ss:$2 sm:$0xff] %v5311_v33  ;;  %v5338_v3 = vld.sshfl [vmem:[#allocation1 + $0x10] sm:$0xff pattern:$0x75316420] }
 0x4b2   :  { %1924 = vst [vmem:[#allocation1 + $0x21] ss:$2 sm:$0xff] %v4222_v14 }
 0x4b3   :  { %3964 = vmatpush.xpose.msk.msrb.mxu0 %vm108_vm2, %v1813_v57  ;;  %2279 = vst [vmem:[#allocation1 + $0x10] ss:$2 sm:$0xff] %v5267_v0 }
 0x4b4   :  { %2281 = vst [vmem:[#allocation1 + $0x11] ss:$2 sm:$0xff] %v5270_v11 }
 0x4b5   :  { %v5343_v62 = vld.sshfl [vmem:[#allocation1 + $0x30] sm:$0xff pattern:$0x75316420] }
 0x4b6   :  { %1926 = vst [vmem:[#allocation1 + $0x30] ss:$2 sm:$0xff] %v4224_v5 }
 0x4b7   :  { %1928 = vst [vmem:[#allocation1 + $0x31] ss:$2 sm:$0xff] %v4226_v9  ;;  %3965 = vmatpush.xpose.msk.msrb.mxu0 %vm108_vm2, %v1812_v22  ;;  %v1866_v60 = vld.sshfl [vmem:[#allocation1] sm:$0xff pattern:$0x75316420] }
 0x4b8   :  { %1870 = vst [vmem:[#allocation1] ss:$2 sm:$0xff] %v5290_v56 }
 0x4b9   :  { %v5347_v53 = vld.sshfl [vmem:[#allocation1 + $0x20] sm:$0xff pattern:$0x75316420] }
 0x4ba   :  { %2283 = vst [vmem:[#allocation1 + $0x20] ss:$2 sm:$0xff] %v5273_v31 }
 0x4bb   :  { %3966 = vmatpush.xpose.msk.msrb.mxu0 %vm108_vm2, %v1811_v45  ;;  %2285 = vst [vmem:[#allocation1 + $0x21] ss:$2 sm:$0xff] %v5276_v13  ;;  %v2291_v0 = vld.sshfl [vmem:[#allocation1 + $0x10] sm:$0xff pattern:$0x75316420] }
 0x4bc   :  { %2329 = vst [vmem:[#allocation1 + $0x10] ss:$2 sm:$0xff] %v5300_v35 }
 0x4bd   :  { %2331 = vst [vmem:[#allocation1 + $0x11] ss:$2 sm:$0xff] %v4216_v42 }
 0x4be   :  { %v5353_v11 = vld.sshfl [vmem:[#allocation1 + $0x30] sm:$0xff pattern:$0x75316420] }
 0x4bf   :  { %3967 = vmatpush.xpose.msk.msrb.mxu0 %vm108_vm2, %v1810_v16  ;;  %v1871_v55 = vld.sshfl [vmem:[#allocation1] sm:$0xff pattern:$0x75316420]  ;;  %2287 = vst [vmem:[#allocation1 + $0x30] ss:$2 sm:$0xff] %v5279_v61 }
 0x4c0   :  { %3974 = vmatmul.msk.f32.vlgmr.msrb.gmra.mxu2 %vm108_vm2, %v1871_v55  ;;  %1914 = vst [vmem:[#allocation1] ss:$2 sm:$0xff] %v5293_v19 }
 0x4c1   :  { %1916 = vst [vmem:[#allocation1 + $0x1] ss:$2 sm:$0xff] %v5295_v12 }
 0x4c2   :  { %2289 = vst [vmem:[#allocation1 + $0x31] ss:$2 sm:$0xff] %v5282_v8  ;;  %v2292_v31 = vld.sshfl [vmem:[#allocation1 + $0x20] sm:$0xff pattern:$0x75316420] }
 0x4c3   :  { %3969 = vmatpush.xpose.msk.msra.mxu0 %vm108_vm2, %v5315_v58  ;;  %2333 = vst [vmem:[#allocation1 + $0x20] ss:$2 sm:$0xff] %v5311_v33 }
 0x4c4   :  { %2335 = vst [vmem:[#allocation1 + $0x21] ss:$2 sm:$0xff] %v4222_v14  ;;  %v2341_v45 = vld.sshfl [vmem:[#allocation1 + $0x10] sm:$0xff pattern:$0x75316420] }
 0x4c8   :  { %v1929_v13 = vld.sshfl [vmem:[#allocation1] sm:$0xff pattern:$0x75316420] }
 0x4c9   :  { %1933 = vst [vmem:[#allocation1] ss:$2 sm:$0xff] %v4228_v50  ;;  %v2293_v35 = vld.sshfl [vmem:[#allocation1 + $0x30] sm:$0xff pattern:$0x75316420] }
 0x4ca   :  { %2337 = vst [vmem:[#allocation1 + $0x30] ss:$2 sm:$0xff] %v4224_v5 }
 0x4cb   :  { %2339 = vst [vmem:[#allocation1 + $0x31] ss:$2 sm:$0xff] %v4226_v9  ;;  %v2342_v44 = vld.sshfl [vmem:[#allocation1 + $0x20] sm:$0xff pattern:$0x75316420] }
 0x4d0   :  { %v1934_v61 = vld.sshfl [vmem:[#allocation1] sm:$0xff pattern:$0x75316420] }
 0x4d1   :  { %2275 = vst [vmem:[#allocation1] ss:$2 sm:$0xff] %v5261_v40  ;;  %v4352_v40 = vld [vmem:[%s6037_s9 + $0x18] sm:$0xff] }
 0x4d2   :  { %2277 = vst [vmem:[#allocation1 + $0x1] ss:$2 sm:$0xff] %v5264_v7  ;;  %v4353_v7 = vld [vmem:[%s6037_s9 + $0x10] sm:$0xff] }
 0x4d9   :  { %v2290_v42 = vld.sshfl [vmem:[#allocation1] sm:$0xff pattern:$0x75316420] }
 0x4da   :  { %2294 = vst [vmem:[#allocation1] ss:$2 sm:$0xff] %v5290_v56  ;;  %v4354_v56 = vld [vmem:[%s6037_s9 + $0x8] sm:$0xff] }
 0x4e1   :  { %v2295_v23 = vld.sshfl [vmem:[#allocation1] sm:$0xff pattern:$0x75316420] }
 0x4e2   :  { %2325 = vst [vmem:[#allocation1] ss:$2 sm:$0xff] %v5293_v19  ;;  %v4355_v19 = vld [vmem:[%s6037_s9] sm:$0xff] }
 0x4e3   :  { %2327 = vst [vmem:[#allocation1 + $0x1] ss:$2 sm:$0xff] %v5295_v12 }
 0x4ea   :  { %v2340_v8 = vld.sshfl [vmem:[#allocation1] sm:$0xff pattern:$0x75316420] }
 0x4eb   :  { %2344 = vst [vmem:[#allocation1] ss:$2 sm:$0xff] %v4228_v50 }
 0x4f2   :  { %v2345_v12 = vld.sshfl [vmem:[#allocation1] sm:$0xff pattern:$0x75316420] }
 0x500   :  { %v1516_v33 = vpop.f32.mrf.mxu2 }
 0x501   :  { %v1517_v34 = vadd.f32 %v5307_v10, %v1516_v33  ;;  %v2343_v10 = vld.sshfl [vmem:[#allocation1 + $0x30] sm:$0xff pattern:$0x75316420] }
 0x503   :  { %4229 = vtanh.f32 %v1517_v34 }
 0x509   :  { %v4230_v14 = vpop.eup %4229 }
 0x50a   :  { %3968 = vmatmul.msk.f32.vlgmr.msrb.gmra.mxu0 %vm108_vm2, %v4230_v14  ;;  %3975 = vmatpush.xpose.msk.msra.mxu3 %vm108_vm2, %v4230_v14 }
 0x50b   :  { %3981 = vmatpush.msk.msrb.mxu0 %vm1279_vm3, %v2295_v23  ;;  %2454 = vmatpush.msra.mxu2 %v4230_v14 }
 0x50d   :  { %2317 = vmatpush.msrb.mxu0 %v2293_v35  ;;  %3976 = vmatmul.msk.f32.vlgmr.msra.gmra.mxu3 %vm108_vm2, %v1929_v13 }
 0x50e   :  { %2557 = vmatpush.msrb.mxu3 %v4352_v40 }
 0x50f   :  { %2318 = vmatpush.msrb.mxu0 %v2292_v31 }
 0x510   :  { %2558 = vmatpush.msrb.mxu3 %v4353_v7 }
 0x511   :  { %2319 = vmatpush.msrb.mxu0 %v2291_v0 }
 0x512   :  { %2559 = vmatpush.msrb.mxu3 %v4354_v56  ;;  %3970 = vmatmul.msk.f32.vlgmr.msra.gmra.mxu0 %vm108_vm2, %v1866_v60 }
 0x513   :  { %2320 = vmatpush.msrb.mxu0 %v2290_v42 }
 0x514   :  { %2560 = vmatpush.msrb.mxu3 %v4355_v19 }
 0x515   :  { %3983 = vmatpush.msk.msra.mxu0 %vm1279_vm3, %v2345_v12  ;;  %3977 = vmatmul.msk.f32.gmra.mxu3 %vm108_vm2, %v5338_v3 }
 0x517   :  { %2367 = vmatpush.msra.mxu0 %v2343_v10 }
 0x519   :  { %2368 = vmatpush.msra.mxu0 %v2342_v44 }
 0x51a   :  { %3971 = vmatmul.msk.f32.gmra.mxu0 %vm108_vm2, %v5326_v27 }
 0x51b   :  { %2369 = vmatpush.msra.mxu0 %v2341_v45 }
 0x51d   :  { %2370 = vmatpush.msra.mxu0 %v2340_v8  ;;  %3978 = vmatmul.msk.f32.gmra.mxu3 %vm108_vm2, %v5347_v53 }
 0x521   :  { %v1783_v5 = vpop.f32.mrf.mxu2 }
 0x522   :  { %v1849_v20 = vmul.f32 0.17677669, %v1783_v5  ;;  %3972 = vmatmul.msk.f32.gmra.mxu0 %vm108_vm2, %v5334_v29 }
 0x524   :  { %v1987_v9 = vsel %vm960_vm4, %v1849_v20, -inf }
 0x525   :  { %1988 = vmax.xlane.f32.xlu0 %v1987_v9  ;;  %3979 = vmatmul.msk.f32.gmra.mxu3 %vm108_vm2, %v5353_v11 }
 0x52a   :  { %3973 = vmatmul.msk.f32.gmra.mxu0 %vm108_vm2, %v5343_v62 }
 0x52d   :  { %3980 = vmatmul.msk.f32.gmra.mxu3 %vm108_vm2, %v1934_v61 }
 0x543   :  { %v1911_v61 = vpop.f32.mrf.mxu2 }
 0x544   :  { %v1981_v23 = vmul.f32 0.17677669, %v1911_v61 }
 0x546   :  { %v2047_v14 = vsel %vm1022_vm6, %v1981_v23, -inf }
 0x587   :  { %v1846_v22 = vpop.f32.mrf.mxu0 }
 0x588   :  { %v1850_v50 = vmul.f32 0.17677669, %v1846_v22 }
 0x58a   :  { %v1990_v16 = vsel %vm960_vm4, %v1850_v50, -inf }
 0x58b   :  { %1991 = vmax.xlane.f32.xlu1 %v1990_v16 }
 0x58f   :  { %v1899_v27 = vpop.f32.mrf.mxu0 }
 0x590   :  { %v1977_v57 = vmul.f32 0.17677669, %v1899_v27  ;;  %v1962_v53 = vpop.f32.mrf.mxu3 }
 0x591   :  { %v1982_v0 = vmul.f32 0.17677669, %v1962_v53 }
 0x592   :  { %v2035_v43 = vsel %vm1009_vm5, %v1977_v57, -inf }
 0x593   :  { %2036 = vmax.xlane.f32.xlu2 %v2035_v43  ;;  %v2050_v13 = vsel %vm1009_vm5, %v1982_v0, -inf }
 0x597   :  { %v1902_v29 = vpop.f32.mrf.mxu0 }
 0x598   :  { %v1978_v3 = vmul.f32 0.17677669, %v1902_v29  ;;  %v1989_v62 = vpop.xlane.xlu0 %1988  ;;  %v1965_v43 = vpop.f32.mrf.mxu3 }
 0x599   :  { %v1993_v31 = vsub.f32 %v1849_v20, %v1989_v62 }
 0x59a   :  { %v2038_v60 = vsel %vm1009_vm5, %v1978_v3, -inf }
 0x59b   :  { %2039 = vmax.xlane.f32.xlu0 %v2038_v60  ;;  %v1995_v42 = vmul.f32 1.442695, %v1993_v31 }
 0x59d   :  { %4231 = vpow2.f32 %v1995_v42 }
 0x59f   :  { %v1905_v11 = vpop.f32.mrf.mxu0 }
 0x5a0   :  { %v1979_v55 = vmul.f32 0.17677669, %v1905_v11  ;;  %v1968_v61 = vpop.f32.mrf.mxu3 }
 0x5a2   :  { %v2041_v35 = vsel %vm1009_vm5, %v1979_v55, -inf }
 0x5a3   :  { %2051 = vmax.xlane.f32.xlu0 %v2050_v13  ;;  %2042 = vmax.xlane.f32.xlu1 %v2041_v35  ;;  %v5409_v40 = vpop.eup %4231 }
 0x5a4   :  { %v1999_v7 = vsel %vm960_vm4, %v5409_v40, 0.0 }
 0x5a7   :  { %v1908_v8 = vpop.f32.mrf.mxu0 }
 0x5a8   :  { %v1980_v33 = vmul.f32 0.17677669, %v1908_v8 }
 0x5aa   :  { %v2044_v34 = vsel %vm1009_vm5, %v1980_v33, -inf }
 0x5ab   :  { %2045 = vmax.xlane.f32.xlu2 %v2044_v34  ;;  %2048 = vmax.xlane.f32.xlu1 %v2047_v14 }
 0x5b3   :  { %2000 = vadd.xlane.f32.xlu2 %v1999_v7 }
 0x5fe   :  { %v1992_v56 = vpop.xlane.xlu1 %1991 }
 0x5ff   :  { %v1994_v19 = vsub.f32 %v1850_v50, %v1992_v56 }
 0x601   :  { %v1997_v12 = vmul.f32 1.442695, %v1994_v19  ;;  %v5433_v19 = vmul.f32 0.17677669, %v1968_v61 }
 0x603   :  { %4233 = vpow2.f32 %v1997_v12  ;;  %v1971_v12 = vpop.f32.mrf.mxu3 }
 0x606   :  { %v2037_v10 = vpop.xlane.xlu2 %2036 }
 0x607   :  { %v2065_v44 = vsub.f32 %v1977_v57, %v2037_v10 }
 0x609   :  { %v5413_v45 = vpop.eup %4233  ;;  %v2075_v5 = vmul.f32 1.442695, %v2065_v44  ;;  %v2056_v44 = vsel %vm1009_vm5, %v5433_v19, -inf }
 0x60a   :  { %v2002_v20 = vsel %vm960_vm4, %v5413_v45, 0.0 }
 0x60b   :  { %4235 = vpow2.f32 %v2075_v5  ;;  %2003 = vadd.xlane.f32.xlu0 %v2002_v20 }
 0x60e   :  { %v2040_v9 = vpop.xlane.xlu0 %2039 }
 0x60f   :  { %v2066_v22 = vsub.f32 %v1978_v3, %v2040_v9 }
 0x611   :  { %v5417_v16 = vpop.eup %4235  ;;  %v2077_v27 = vmul.f32 1.442695, %v2066_v22  ;;  %v5445_v22 = vmul.f32 0.17677669, %v1965_v43 }
 0x612   :  { %v2095_v50 = vsel %vm1009_vm5, %v5417_v16, 0.0 }
 0x613   :  { %2096 = vadd.xlane.f32.xlu1 %v2095_v50  ;;  %4237 = vpow2.f32 %v2077_v27  ;;  %v5447_v50 = vmul.f32 0.17677669, %v1971_v12 }
 0x616   :  { %v2052_v57 = vpop.xlane.xlu0 %2051  ;;  %v2043_v29 = vpop.xlane.xlu1 %2042 }
 0x617   :  { %v2070_v60 = vsub.f32 %v1982_v0, %v2052_v57  ;;  %v2067_v53 = vsub.f32 %v1979_v55, %v2043_v29 }
 0x619   :  { %v5421_v62 = vpop.eup %4237  ;;  %v2085_v11 = vmul.f32 1.442695, %v2070_v60  ;;  %v2079_v31 = vmul.f32 1.442695, %v2067_v53 }
 0x61a   :  { %v2098_v3 = vsel %vm1009_vm5, %v5421_v62, 0.0 }
 0x61b   :  { %4239 = vpow2.f32 %v2085_v11  ;;  %2099 = vadd.xlane.f32.xlu2 %v2098_v3  ;;  %v2053_v11 = vsel %vm1009_vm5, %v5445_v22, -inf  ;;  %v2059_v3 = vsel %vm1009_vm5, %v5447_v50, -inf }
 0x61c   :  { %4241 = vpow2.f32 %v2079_v31  ;;  %v1974_v31 = vpop.f32.mrf.mxu3 }
 0x61e   :  { %v2046_v13 = vpop.xlane.xlu2 %2045  ;;  %v2049_v35 = vpop.xlane.xlu1 %2048 }
 0x61f   :  { %v2068_v42 = vsub.f32 %v1980_v33, %v2046_v13  ;;  %v2069_v8 = vsub.f32 %v1981_v23, %v2049_v35  ;;  %v5453_v35 = vmul.f32 0.17677669, %v1974_v31 }
 0x621   :  { %v5425_v34 = vpop.eup %4239  ;;  %v2081_v14 = vmul.f32 1.442695, %v2068_v42  ;;  %v2083_v0 = vmul.f32 1.442695, %v2069_v8 }
 0x622   :  { %v5427_v55 = vpop.eup %4241  ;;  %v2110_v7 = vsel %vm1009_vm5, %v5425_v34, 0.0 }
 0x623   :  { %4243 = vpow2.f32 %v2081_v14  ;;  %2111 = vadd.xlane.f32.xlu2 %v2110_v7  ;;  %v2101_v56 = vsel %vm1009_vm5, %v5427_v55, 0.0  ;;  %v2062_v14 = vsel %vm1022_vm6, %v5453_v35, -inf }
 0x624   :  { %4245 = vpow2.f32 %v2083_v0  ;;  %2102 = vadd.xlane.f32.xlu0 %v2101_v56 }
 0x626   :  { %v2001_v33 = vpop.xlane.xlu2 %2000 }
 0x627   :  { %4247 = vrcp.f32 %v2001_v33  ;;  %v2016_v29 = vand.u32 2147483648, %v2001_v33  ;;  %v2014_v53 = vand.u32 2147483647, %v2001_v33  ;;  %vm2010_vm12 = vweird.f32 %v2001_v33 }
 0x629   :  { %v5435_v23 = vpop.eup %4243  ;;  %v2017_v43 = vor.u32 1.1754944e-38, %v2016_v29  ;;  %vm2015_vm14 = vcmp.eq.f32.partialorder %v2014_v53, 8.507059e+37 }
 0x62a   :  { %v5437_v10 = vpop.eup %4245  ;;  %v2104_v5 = vsel %vm1009_vm5, %v5435_v23, 0.0 }
 0x62b   :  { %2057 = vmax.xlane.f32.xlu2 %v2056_v44  ;;  %2105 = vadd.xlane.f32.xlu1 %v2104_v5  ;;  %v2107_v20 = vsel %vm1022_vm6, %v5437_v10, 0.0 }
 0x62c   :  { %2108 = vadd.xlane.f32.xlu0 %v2107_v20 }
 0x62d   :  { %v4248_v9 = vpop.eup %4247 }
 0x62e   :  { %v2006_v27 = vmul.f32 %v4248_v9, %v2001_v33  ;;  %vm2011_vm11 = vweird.f32 %v4248_v9 }
 0x62f   :  { %vm2012_vm13 = vmor %vm2010_vm12, %vm2011_vm11 }
 0x630   :  { %v2007_v57 = vsub.f32 1.0, %v2006_v27 }
 0x632   :  { %v2008_v60 = vmul.f32 %v4248_v9, %v2007_v57 }
 0x633   :  { %2054 = vmax.xlane.f32.xlu1 %v2053_v11 }
 0x634   :  { %v2009_v13 = vadd.f32 %v4248_v9, %v2008_v60  ;;  %2060 = vmax.xlane.f32.xlu0 %v2059_v3 }
 0x636   :  { %v2013_v61 = vsel %vm2012_vm13, %v4248_v9, %v2009_v13 }
 0x637   :  { %v2018_v42 = vsel %vm2015_vm14, %v2017_v43, %v2013_v61 }
 0x638   :  { %v2019_v8 = vmul.f32 %v5409_v40, %v2018_v42 }
 0x63a   :  { %3982 = vmatmul.msk.f32.vlgmr.msrb.gmra.mxu0 %vm960_vm4, %v2019_v8 }
 0x63b   :  { %2407 = vmatpush.msrb.mxu0 %v5315_v58  ;;  %2063 = vmax.xlane.f32.xlu1 %v2062_v14 }
 0x67e   :  { %v2004_v0 = vpop.xlane.xlu0 %2003 }
 0x67f   :  { %4249 = vrcp.f32 %v2004_v0  ;;  %v2031_v44 = vand.u32 2147483648, %v2004_v0  ;;  %v2029_v20 = vand.u32 2147483647, %v2004_v0  ;;  %vm2025_vm0 = vweird.f32 %v2004_v0 }
 0x681   :  { %v2032_v27 = vor.u32 1.1754944e-38, %v2031_v44  ;;  %vm2030_vm7 = vcmp.eq.f32.partialorder %v2029_v20, 8.507059e+37 }
 0x685   :  { %v4250_v7 = vpop.eup %4249 }
 0x686   :  { %v2021_v56 = vmul.f32 %v4250_v7, %v2004_v0  ;;  %v2097_v33 = vpop.xlane.xlu1 %2096  ;;  %vm2026_vm15 = vweird.f32 %v4250_v7 }
 0x687   :  { %4251 = vrcp.f32 %v2097_v33  ;;  %vm2027_vm1 = vmor %vm2025_vm0, %vm2026_vm15  ;;  %v2136_v11 = vand.u32 2147483648, %v2097_v33  ;;  %v2134_v13 = vand.u32 2147483647, %v2097_v33  ;;  %vm2130_vm9 = vweird.f32 %v2097_v33 }
 0x688   :  { %v2022_v12 = vsub.f32 1.0, %v2021_v56 }
 0x689   :  { %v2137_v61 = vor.u32 1.1754944e-38, %v2136_v11  ;;  %vm2135_vm11 = vcmp.eq.f32.partialorder %v2134_v13, 8.507059e+37 }
 0x68a   :  { %v2023_v5 = vmul.f32 %v4250_v7, %v2022_v12 }
 0x68c   :  { %v2024_v40 = vadd.f32 %v4250_v7, %v2023_v5 }
 0x68d   :  { %v4252_v9 = vpop.eup %4251 }
 0x68e   :  { %v2028_v57 = vsel %vm2027_vm1, %v4250_v7, %v2024_v40  ;;  %v2126_v58 = vmul.f32 %v4252_v9, %v2097_v33  ;;  %v2100_v60 = vpop.xlane.xlu2 %2099  ;;  %vm2131_vm8 = vweird.f32 %v4252_v9 }
 0x68f   :  { %v2033_v29 = vsel %vm2030_vm7, %v2032_v27, %v2028_v57  ;;  %4253 = vrcp.f32 %v2100_v60  ;;  %vm2132_vm10 = vmor %vm2130_vm9, %vm2131_vm8  ;;  %v2151_v5 = vand.u32 2147483648, %v2100_v60  ;;  %vm2145_vm13 = vweird.f32 %v2100_v60 }
 0x690   :  { %v2127_v53 = vsub.f32 1.0, %v2126_v58  ;;  %v2034_v31 = vmul.f32 %v5413_v45, %v2033_v29  ;;  %v2149_v58 = vand.u32 2147483647, %v2100_v60 }
 0x691   :  { %v2152_v29 = vor.u32 1.1754944e-38, %v2151_v5 }
 0x692   :  { %v2128_v3 = vmul.f32 %v4252_v9, %v2127_v53  ;;  %3984 = vmatmul.msk.f32.vlgmr.msra.gmra.mxu0 %vm960_vm4, %v2034_v31  ;;  %vm2150_vm0 = vcmp.eq.f32.partialorder %v2149_v58, 8.507059e+37 }
 0x694   :  { %v2129_v43 = vadd.f32 %v4252_v9, %v2128_v3 }
 0x695   :  { %v4254_v42 = vpop.eup %4253 }
 0x696   :  { %v2133_v8 = vsel %vm2132_vm10, %v4252_v9, %v2129_v43  ;;  %v2141_v0 = vmul.f32 %v4254_v42, %v2100_v60  ;;  %v2112_v7 = vpop.xlane.xlu2 %2111  ;;  %vm2146_vm12 = vweird.f32 %v4254_v42 }
 0x697   :  { %v2138_v14 = vsel %vm2135_vm11, %v2137_v61, %v2133_v8  ;;  %4255 = vrcp.f32 %v2112_v7  ;;  %v2103_v56 = vpop.xlane.xlu0 %2102  ;;  %vm5470_vm14 = vmor %vm2145_vm13, %vm2146_vm12  ;;  %v2209_v13 = vand.u32 2147483647, %v2112_v7  ;;  %v2211_v60 = vand.u32 2147483648, %v2112_v7 }
 0x698   :  { %v2142_v12 = vsub.f32 1.0, %v2141_v0  ;;  %4257 = vrcp.f32 %v2103_v56  ;;  %v2139_v45 = vmul.f32 %v5417_v16, %v2138_v14  ;;  %v2164_v8 = vand.u32 2147483647, %v2103_v56 }
 0x699   :  { %v2166_v0 = vand.u32 2147483648, %v2103_v56  ;;  %vm2205_vm1 = vweird.f32 %v2112_v7  ;;  %vm2160_vm7 = vweird.f32 %v2103_v56  ;;  %vm2210_vm10 = vcmp.eq.f32.partialorder %v2209_v13, 8.507059e+37 }
 0x69a   :  { %v2143_v44 = vmul.f32 %v4254_v42, %v2142_v12  ;;  %3985 = vmatmul.msk.f32.vlgmr.msrb.gmra.mxu0 %vm1009_vm5, %v2139_v45  ;;  %vm5478_vm11 = vcmp.eq.f32.partialorder %v2164_v8, 8.507059e+37 }
 0x69b   :  { %v2167_v58 = vor.u32 1.1754944e-38, %v2166_v0 }
 0x69c   :  { %v2144_v20 = vadd.f32 %v4254_v42, %v2143_v44 }
 0x69d   :  { %v4256_v33 = vpop.eup %4255 }
 0x69e   :  { %v4258_v40 = vpop.eup %4257  ;;  %v2201_v9 = vmul.f32 %v4256_v33, %v2112_v7  ;;  %v2058_v27 = vpop.xlane.xlu2 %2057  ;;  %v2148_v43 = vsel %vm5470_vm14, %v4254_v42, %v2144_v20  ;;  %vm2206_vm15 = vweird.f32 %v4256_v33  ;;  %v2212_v42 = vor.u32 1.1754944e-38, %v2211_v60 }
 0x69f   :  { %v5464_v57 = vpop.xlane.xlu1 %2105  ;;  %v2156_v53 = vmul.f32 %v4258_v40, %v2103_v56  ;;  %v2072_v11 = vsub.f32 %v5433_v19, %v2058_v27  ;;  %v5467_v31 = vpop.xlane.xlu0 %2108  ;;  %v2153_v45 = vsel %vm2150_vm0, %v2152_v29, %v2148_v43  ;;  %vm2161_vm8 = vweird.f32 %v4258_v40  ;;  %vm2207_vm9 = vmor %vm2205_vm1, %vm2206_vm15 }
 0x6a0   :  { %4259 = vrcp.f32 %v5464_v57  ;;  %v2202_v3 = vsub.f32 1.0, %v2201_v9  ;;  %v2154_v5 = vmul.f32 %v5421_v62, %v2153_v45  ;;  %vm2162_vm12 = vmor %vm2160_vm7, %vm2161_vm8  ;;  %v2181_v13 = vand.u32 2147483648, %v5464_v57 }
 0x6a1   :  { %4261 = vrcp.f32 %v5467_v31  ;;  %v2157_v61 = vsub.f32 1.0, %v2156_v53  ;;  %v2089_v14 = vmul.f32 1.442695, %v2072_v11  ;;  %v2179_v11 = vand.u32 2147483647, %v5464_v57 }
 0x6a2   :  { %v2203_v19 = vmul.f32 %v4256_v33, %v2202_v3  ;;  %3986 = vmatmul.msk.f32.gmra.mxu0 %vm1009_vm5, %v2154_v5  ;;  %vm2175_vm14 = vweird.f32 %v5464_v57  ;;  %vm2190_vm7 = vweird.f32 %v5467_v31 }
 0x6a3   :  { %v2158_v12 = vmul.f32 %v4258_v40, %v2157_v61  ;;  %4263 = vpow2.f32 %v2089_v14  ;;  %vm2180_vm0 = vcmp.eq.f32.partialorder %v2179_v11, 8.507059e+37 }
 0x6a4   :  { %v2204_v44 = vadd.f32 %v4256_v33, %v2203_v19 }
 0x6a5   :  { %v2159_v20 = vadd.f32 %v4258_v40, %v2158_v12 }
 0x6a6   :  { %v4260_v9 = vpop.eup %4259  ;;  %v2208_v7 = vsel %vm2207_vm9, %v4256_v33, %v2204_v44 }
 0x6a7   :  { %v5482_v53 = vpop.eup %4261  ;;  %v2171_v29 = vmul.f32 %v4260_v9, %v5464_v57  ;;  %v2055_v62 = vpop.xlane.xlu1 %2054  ;;  %v2213_v16 = vsel %vm2210_vm10, %v2212_v42, %v2208_v7  ;;  %v2163_v8 = vsel %vm2162_vm12, %v4258_v40, %v2159_v20  ;;  %vm2176_vm13 = vweird.f32 %v4260_v9 }
 0x6a8   :  { %v2186_v3 = vmul.f32 %v5482_v53, %v5467_v31  ;;  %v2061_v43 = vpop.xlane.xlu0 %2060  ;;  %v2071_v33 = vsub.f32 %v5445_v22, %v2055_v62  ;;  %v2214_v14 = vmul.f32 %v5425_v34, %v2213_v16  ;;  %v2168_v12 = vsel %vm5478_vm11, %v2167_v58, %v2163_v8  ;;  %vm2177_vm15 = vmor %vm2175_vm14, %vm2176_vm13 }
 0x6a9   :  { %v2172_v60 = vsub.f32 1.0, %v2171_v29  ;;  %v2073_v61 = vsub.f32 %v5447_v50, %v2061_v43  ;;  %v5495_v19 = vpop.eup %4263  ;;  %v2169_v5 = vmul.f32 %v5427_v55, %v2168_v12  ;;  %v2182_v50 = vor.u32 1.1754944e-38, %v2181_v13 }
 0x6aa   :  { %v2187_v0 = vsub.f32 1.0, %v2186_v3  ;;  %v2087_v56 = vmul.f32 1.442695, %v2071_v33  ;;  %3990 = vmatmul.msk.f32.vlgmr.msra.gmra.mxu2 %vm1009_vm5, %v2214_v14  ;;  %v2116_v22 = vsel %vm1009_vm5, %v5495_v19, 0.0  ;;  %vm2191_vm1 = vweird.f32 %v5482_v53 }
 0x6ab   :  { %v2173_v45 = vmul.f32 %v4260_v9, %v2172_v60  ;;  %v2091_v44 = vmul.f32 1.442695, %v2073_v61  ;;  %2117 = vadd.xlane.f32.xlu0 %v2116_v22  ;;  %3987 = vmatmul.msk.f32.gmra.mxu0 %vm1009_vm5, %v2169_v5  ;;  %v2196_v16 = vand.u32 2147483648, %v5467_v31  ;;  %vm2192_vm8 = vmor %vm2190_vm7, %vm2191_vm1 }
 0x6ac   :  { %4265 = vpow2.f32 %v2087_v56  ;;  %v2188_v40 = vmul.f32 %v5482_v53, %v2187_v0 }
 0x6ad   :  { %v2174_v34 = vadd.f32 %v4260_v9, %v2173_v45  ;;  %4267 = vpow2.f32 %v2091_v44  ;;  %v2197_v3 = vor.u32 1.1754944e-38, %v2196_v16 }
 0x6ae   :  { %v2189_v57 = vadd.f32 %v5482_v53, %v2188_v40 }
 0x6af   :  { %v2064_v42 = vpop.xlane.xlu1 %2063  ;;  %v2178_v55 = vsel %vm2177_vm15, %v4260_v9, %v2174_v34  ;;  %v2194_v9 = vand.u32 2147483647, %v5467_v31 }
 0x6b0   :  { %v2074_v20 = vsub.f32 %v5453_v35, %v2064_v42  ;;  %v2183_v27 = vsel %vm2180_vm0, %v2182_v50, %v2178_v55 }
 0x6b1   :  { %v2184_v62 = vmul.f32 %v5435_v23, %v2183_v27  ;;  %v2193_v23 = vsel %vm2192_vm8, %v5482_v53, %v2189_v57  ;;  %vm2195_vm9 = vcmp.eq.f32.partialorder %v2194_v9, 8.507059e+37 }
 0x6b2   :  { %v5507_v7 = vpop.eup %4265  ;;  %v2093_v58 = vmul.f32 1.442695, %v2074_v20  ;;  %v2198_v60 = vsel %vm2195_vm9, %v2197_v3, %v2193_v23 }
 0x6b3   :  { %v5509_v29 = vpop.eup %4267  ;;  %v2113_v11 = vsel %vm1009_vm5, %v5507_v7, 0.0  ;;  %3988 = vmatmul.msk.f32.gmra.mxu0 %vm1009_vm5, %v2184_v62  ;;  %v2199_v61 = vmul.f32 %v5437_v10, %v2198_v60 }
 0x6b4   :  { %4269 = vpow2.f32 %v2093_v58  ;;  %v2119_v35 = vsel %vm1009_vm5, %v5509_v29, 0.0  ;;  %2114 = vadd.xlane.f32.xlu2 %v2113_v11 }
 0x6b5   :  { %2120 = vadd.xlane.f32.xlu1 %v2119_v35 }
 0x6b7   :  { %v2322_v13 = vpop.f32.mrf.mxu0 }
 0x6b8   :  { %v5524_v43 = vadd.f32 %v2322_v13, %v5212_v48 }
 0x6ba   :  { %v5526_v33 = vpop.eup %4269  ;;  %3995 = vmatmul.msk.f32.vlgmr.msrb.gmra.mxu3 %vm108_vm2, %v5524_v43  ;;  %v5540_v48 = vperm.slane %v5524_v43, 0 }
 0x6bb   :  { %v2122_v31 = vsel %vm1022_vm6, %v5526_v33, 0.0  ;;  %3989 = vmatmul.msk.f32.gmra.mxu0 %vm1009_vm5, %v2199_v61 }
 0x6bc   :  { %2123 = vadd.xlane.f32.xlu2 %v2122_v31  ;;  %v5545_v10 = vrot.slane %v5540_v48, 4 }
 0x70f   :  { %v2372_v53 = vpop.f32.mrf.mxu0 }
 0x710   :  { %v5535_v8 = vadd.f32 %v2372_v53, %v5286_v38 }
 0x712   :  { %3996 = vmatmul.msk.f32.gmra.mxu3 %vm108_vm2, %v5535_v8 }
 0x717   :  { %v2409_v14 = vpop.f32.mrf.mxu0 }
 0x718   :  { %v2479_v0 = vrot.slane %v2409_v14, 4  ;;  %v2495_v56 = vadd.f32 %v2409_v14, %v5153_v25 }
 0x71a   :  { %v2496_v12 = vadd.f32 %v2479_v0, %v5156_v54  ;;  %v2521_v45 = vadd.f32 %v5540_v48, %v2495_v56 }
 0x71c   :  { %v2522_v38 = vadd.f32 %v5545_v10, %v2496_v12  ;;  %2588 = vst [vmem:[#allocation1] ss:$2 sm:$0xff] %v2521_v45 }
 0x71e   :  { %v5549_v44 = vpop.xlane.xlu0 %2117  ;;  %2590 = vst [vmem:[#allocation1 + $0x1] ss:$2 sm:$0xff] %v2522_v38 }
 0x71f   :  { %4271 = vrcp.f32 %v5549_v44  ;;  %v2412_v5 = vpop.f32.mrf.mxu0  ;;  %vm2235_vm14 = vweird.f32 %v5549_v44 }
 0x720   :  { %v2480_v22 = vrot.slane %v2412_v5, 4  ;;  %v2497_v34 = vadd.f32 %v2412_v5, %v5161_v18  ;;  %v5565_v18 = vperm.slane %v5535_v8, 0 }
 0x722   :  { %v2498_v54 = vadd.f32 %v2480_v22, %v5164_v24  ;;  %v2523_v50 = vadd.f32 %v5540_v48, %v2497_v34  ;;  %v5576_v61 = vrot.slane %v5565_v18, 4 }
 0x724   :  { %v2524_v20 = vadd.f32 %v5545_v10, %v2498_v54  ;;  %2592 = vst [vmem:[#allocation1 + $0x10] ss:$2 sm:$0xff] %v2523_v50 }
 0x725   :  { %v5553_v25 = vpop.eup %4271  ;;  %v2603_v40 = vld.sshfl [vmem:[#allocation1] sm:$0xff pattern:$0x75316420] }
 0x726   :  { %3997 = vmatmul.msk.f32.vlgmr.msrb.gmra.mxu1 %vm108_vm2, %v2603_v40  ;;  %v2231_v27 = vmul.f32 %v5553_v25, %v5549_v44  ;;  %2594 = vst [vmem:[#allocation1 + $0x11] ss:$2 sm:$0xff] %v2524_v20  ;;  %vm2236_vm13 = vweird.f32 %v5553_v25 }
 0x727   :  { %v2115_v42 = vpop.xlane.xlu2 %2114  ;;  %vm2237_vm15 = vmor %vm2235_vm14, %vm2236_vm13 }
 0x728   :  { %4273 = vrcp.f32 %v2115_v42  ;;  %v5558_v55 = vpop.xlane.xlu1 %2120  ;;  %v2415_v24 = vpop.f32.mrf.mxu0  ;;  %v2232_v11 = vsub.f32 1.0, %v2231_v27  ;;  %v2224_v45 = vand.u32 2147483647, %v2115_v42  ;;  %vm2220_vm10 = vweird.f32 %v2115_v42 }
 0x729   :  { %4275 = vrcp.f32 %v5558_v55  ;;  %v2481_v58 = vrot.slane %v2415_v24, 4  ;;  %v2499_v57 = vadd.f32 %v2415_v24, %v5170_v2  ;;  %v2226_v2 = vand.u32 2147483648, %v2115_v42 }
 0x72a   :  { %vm2225_vm12 = vcmp.eq.f32.partialorder %v2224_v45, 8.507059e+37  ;;  %vm2250_vm7 = vweird.f32 %v5558_v55 }
 0x72b   :  { %v2500_v9 = vadd.f32 %v2481_v58, %v5173_v47  ;;  %v2525_v23 = vadd.f32 %v5540_v48, %v2499_v57  ;;  %v2233_v47 = vmul.f32 %v5553_v25, %v2232_v11  ;;  %v2227_v50 = vor.u32 1.1754944e-38, %v2226_v2 }
 0x72d   :  { %v2456_v16 = vpop.f32.mrf.mxu2  ;;  %v2526_v14 = vadd.f32 %v5545_v10, %v2500_v9  ;;  %2596 = vst [vmem:[#allocation1 + $0x20] ss:$2 sm:$0xff] %v2525_v23  ;;  %v2604_v12 = vld.sshfl [vmem:[#allocation1 + $0x10] sm:$0xff pattern:$0x75316420]  ;;  %v2234_v40 = vadd.f32 %v5553_v25, %v2233_v47 }
 0x72e   :  { %v4274_v62 = vpop.eup %4273  ;;  %v2483_v3 = vrot.slane %v2456_v16, 4  ;;  %v2504_v31 = vadd.f32 %v2456_v16, %v5192_v63  ;;  %3998 = vmatmul.msk.f32.gmra.mxu1 %vm108_vm2, %v2604_v12 }
 0x72f   :  { %v2216_v35 = vmul.f32 %v4274_v62, %v2115_v42  ;;  %v5570_v13 = vpop.xlane.xlu2 %2123  ;;  %v5572_v60 = vpop.eup %4275  ;;  %2598 = vst [vmem:[#allocation1 + $0x21] ss:$2 sm:$0xff] %v2526_v14  ;;  %vm2221_vm6 = vweird.f32 %v4274_v62  ;;  %v2241_v42 = vand.u32 2147483648, %v5549_v44  ;;  %v2256_v14 = vand.u32 2147483648, %v5558_v55 }
 0x730   :  { %v2505_v0 = vadd.f32 %v2483_v3, %v5196_v21  ;;  %v2530_v56 = vadd.f32 %v5565_v18, %v2504_v31  ;;  %4277 = vrcp.f32 %v5570_v13  ;;  %v2246_v63 = vmul.f32 %v5572_v60, %v5558_v55  ;;  %v2418_v21 = vpop.f32.mrf.mxu0  ;;  %vm2222_vm11 = vmor %vm2220_vm10, %vm2221_vm6 }
 0x731   :  { %v2217_v53 = vsub.f32 1.0, %v2216_v35  ;;  %v2482_v22 = vrot.slane %v2418_v21, 4  ;;  %v2501_v34 = vadd.f32 %v2418_v21, %v5179_v49  ;;  %v2239_v35 = vand.u32 2147483647, %v5549_v44 }
 0x732   :  { %v2531_v5 = vadd.f32 %v5576_v61, %v2505_v0  ;;  %2608 = vst [vmem:[#allocation1 + $0x1] ss:$2 sm:$0xff] %v2530_v56  ;;  %v2247_v20 = vsub.f32 1.0, %v2246_v63  ;;  %v2242_v3 = vor.u32 1.1754944e-38, %v2241_v42  ;;  %vm2251_vm1 = vweird.f32 %v5572_v60 }
 0x733   :  { %v2218_v38 = vmul.f32 %v4274_v62, %v2217_v53  ;;  %v2502_v27 = vadd.f32 %v2482_v22, %v5182_v51  ;;  %v2527_v24 = vadd.f32 %v5540_v48, %v2501_v34  ;;  %vm2240_vm0 = vcmp.eq.f32.partialorder %v2239_v35, 8.507059e+37  ;;  %vm2252_vm8 = vmor %vm2250_vm7, %vm2251_vm1 }
 0x734   :  { %2609 = vst [vmem:[#allocation1 + $0x10] ss:$2 sm:$0xff] %v2531_v5  ;;  %v2248_v51 = vmul.f32 %v5572_v60, %v2247_v20  ;;  %v2254_v0 = vand.u32 2147483647, %v5558_v55  ;;  %v2257_v56 = vor.u32 1.1754944e-38, %v2256_v14  ;;  %vm2265_vm10 = vweird.f32 %v5570_v13 }
 0x735   :  { %v2219_v54 = vadd.f32 %v4274_v62, %v2218_v38  ;;  %v2528_v49 = vadd.f32 %v5545_v10, %v2502_v27  ;;  %2600 = vst [vmem:[#allocation1 + $0x30] ss:$2 sm:$0xff] %v2527_v24  ;;  %v2271_v38 = vand.u32 2147483648, %v5570_v13  ;;  %v2269_v55 = vand.u32 2147483647, %v5570_v13 }
 0x736   :  { %v4278_v57 = vpop.eup %4277  ;;  %v2605_v9 = vld.sshfl [vmem:[#allocation1 + $0x20] sm:$0xff pattern:$0x75316420]  ;;  %v2249_v2 = vadd.f32 %v5572_v60, %v2248_v51  ;;  %vm2255_vm9 = vcmp.eq.f32.partialorder %v2254_v0, 8.507059e+37  ;;  %vm3373_vm1 = vcmask 257024   ;;  %vm3590_vm7 = vcmask 195712  }
 0x737   :  { %v2223_v58 = vsel %vm2222_vm11, %v4274_v62, %v2219_v54  ;;  %v2261_v23 = vmul.f32 %v4278_v57, %v5570_v13  ;;  %2602 = vst [vmem:[#allocation1 + $0x31] ss:$2 sm:$0xff] %v2528_v49  ;;  %3999 = vmatmul.msk.f32.gmra.mxu1 %vm108_vm2, %v2605_v9  ;;  %v2238_v62 = vsel %vm2237_vm15, %v5553_v25, %v2234_v40  ;;  %vm2266_vm6 = vweird.f32 %v4278_v57 }
 0x738   :  { %v2228_v11 = vsel %vm2225_vm12, %v2227_v50, %v2223_v58  ;;  %v2421_v10 = vpop.f32.mrf.mxu0  ;;  %vm2267_vm11 = vmor %vm2265_vm10, %vm2266_vm6  ;;  %v2272_v5 = vor.u32 1.1754944e-38, %v2271_v38  ;;  %vm2270_vm12 = vcmp.eq.f32.partialorder %v2269_v55, 8.507059e+37  ;;  %vm3611_vm6 = vcmask 287744  }
 0x739   :  { %v2229_v16 = vmul.f32 %v5507_v7, %v2228_v11  ;;  %v2503_v31 = vadd.f32 %v2421_v10, %v5188_v4  ;;  %v2243_v7 = vsel %vm2240_vm0, %v2242_v3, %v2238_v62  ;;  %v2262_v44 = vsub.f32 1.0, %v2261_v23 }
 0x73a   :  { %v2244_v25 = vmul.f32 %v5495_v19, %v2243_v7 }
 0x73b   :  { %3991 = vmatmul.msk.f32.gmra.mxu2 %vm1009_vm5, %v2229_v16  ;;  %v2529_v53 = vadd.f32 %v5540_v48, %v2503_v31  ;;  %v2263_v4 = vmul.f32 %v4278_v57, %v2262_v44  ;;  %v2253_v48 = vsel %vm2252_vm8, %v5572_v60, %v2249_v2  ;;  %vm3594_vm8 = vcmask 261312  }
 0x73c   :  { %v2258_v12 = vsel %vm2255_vm9, %v2257_v56, %v2253_v48  ;;  %vm3598_vm9 = vcmask 326912  }
 0x73d   :  { %2607 = vst [vmem:[#allocation1] ss:$2 sm:$0xff] %v2529_v53  ;;  %v2264_v45 = vadd.f32 %v4278_v57, %v2263_v4  ;;  %v2259_v19 = vmul.f32 %v5509_v29, %v2258_v12 }
 0x73e   :  { %v2606_v47 = vld.sshfl [vmem:[#allocation1 + $0x30] sm:$0xff pattern:$0x75316420] }
 0x73f   :  { %4000 = vmatmul.msk.f32.gmra.mxu1 %vm108_vm2, %v2606_v47  ;;  %v2268_v60 = vsel %vm2267_vm11, %v4278_v57, %v2264_v45 }
 0x740   :  { %v2273_v21 = vsel %vm2270_vm12, %v2272_v5, %v2268_v60 }
 0x741   :  { %v2274_v22 = vmul.f32 %v5526_v33, %v2273_v21 }
 0x743   :  { %3992 = vmatmul.msk.f32.gmra.mxu2 %vm1009_vm5, %v2244_v25 }
 0x744   :  { %v2615_v63 = vld.sshfl [vmem:[#allocation1] sm:$0xff pattern:$0x75316420] }
 0x747   :  { %4001 = vmatmul.msk.f32.gmra.mxu1 %vm108_vm2, %v2615_v63 }
 0x74b   :  { %3993 = vmatmul.msk.f32.gmra.mxu2 %vm1009_vm5, %v2259_v19 }
 0x753   :  { %3994 = vmatmul.msk.f32.gmra.mxu2 %vm1009_vm5, %v2274_v22  ;;  %vm3060_vm5 = vcmask 1041409  }
 0x7a3   :  { %v5625_v20 = vpop.f32.mrf.mxu1 }
 0x7be   :  { %v2459_v34 = vpop.f32.mrf.mxu2 }
 0x7bf   :  { %v2484_v54 = vrot.slane %v2459_v34, 4  ;;  %v2506_v29 = vadd.f32 %v2459_v34, %v5203_v46 }
 0x7c1   :  { %v2507_v13 = vadd.f32 %v2484_v54, %v5206_v41  ;;  %v2532_v50 = vadd.f32 %v5565_v18, %v2506_v29 }
 0x7c3   :  { %v2533_v40 = vadd.f32 %v5576_v61, %v2507_v13  ;;  %2610 = vst [vmem:[#allocation1 + $0x11] ss:$2 sm:$0xff] %v2532_v50 }
 0x7c5   :  { %2611 = vst [vmem:[#allocation1 + $0x20] ss:$2 sm:$0xff] %v2533_v40 }
 0x7c6   :  { %v2462_v27 = vpop.f32.mrf.mxu2 }
 0x7c7   :  { %v2485_v24 = vrot.slane %v2462_v27, 4  ;;  %v2508_v33 = vadd.f32 %v2462_v27, %v5218_v52  ;;  %v2703_v52 = vpop.f32.mrf.mxu1 }
 0x7c9   :  { %v2509_v58 = vadd.f32 %v2485_v24, %v5222_v6  ;;  %v2534_v57 = vadd.f32 %v5565_v18, %v2508_v33  ;;  %v5697_v24 = vld [vmem:[%s6038_s10] ss:$0 sm:$0xff] }
 0x7ca   :  { %v2616_v42 = vld.sshfl [vmem:[#allocation1 + $0x10] sm:$0xff pattern:$0x75316420] }
 0x7cb   :  { %v2535_v46 = vadd.f32 %v5576_v61, %v2509_v58  ;;  %2612 = vst [vmem:[#allocation1 + $0x21] ss:$2 sm:$0xff] %v2534_v57  ;;  %4002 = vmatmul.msk.f32.gmra.mxu1 %vm108_vm2, %v2616_v42 }
 0x7cc   :  { %2626 = vst [vmem:[#allocation1 + $0x10] ss:$2 sm:$0xff] %v4801_v1 }
 0x7cd   :  { %2613 = vst [vmem:[#allocation1 + $0x30] ss:$2 sm:$0xff] %v2535_v46 }
 0x7ce   :  { %2628 = vst [vmem:[#allocation1 + $0x11] ss:$2 sm:$0xff] %v4810_v17  ;;  %v2465_v41 = vpop.f32.mrf.mxu2 }
 0x7cf   :  { %v2486_v11 = vrot.slane %v2465_v41, 4  ;;  %v2510_v49 = vadd.f32 %v2465_v41, %v5229_v37  ;;  %v2706_v3 = vpop.f32.mrf.mxu1 }
 0x7d1   :  { %v2511_v6 = vadd.f32 %v2486_v11, %v5234_v15  ;;  %v2536_v16 = vadd.f32 %v5565_v18, %v2510_v49 }
 0x7d2   :  { %v2617_v35 = vld.sshfl [vmem:[#allocation1 + $0x20] sm:$0xff pattern:$0x75316420] }
 0x7d3   :  { %v2537_v9 = vadd.f32 %v5576_v61, %v2511_v6  ;;  %2614 = vst [vmem:[#allocation1 + $0x31] ss:$2 sm:$0xff] %v2536_v16  ;;  %4003 = vmatmul.msk.f32.gmra.mxu1 %vm108_vm2, %v2617_v35 }
 0x7d4   :  { %2630 = vst [vmem:[#allocation1 + $0x20] ss:$2 sm:$0xff] %v4801_v1 }
 0x7d5   :  { %2619 = vst [vmem:[#allocation1] ss:$2 sm:$0xff] %v2537_v9  ;;  %v2638_v51 = vld.sshfl [vmem:[#allocation1 + $0x10] sm:$0xff pattern:$0x75316420] }
 0x7d6   :  { %2632 = vst [vmem:[#allocation1 + $0x21] ss:$2 sm:$0xff] %v4810_v17  ;;  %v2468_v23 = vpop.f32.mrf.mxu2  ;;  %v2704_v62 = vadd.f32 %v2703_v52, %v2638_v51 }
 0x7d7   :  { %v2512_v37 = vadd.f32 %v2468_v23, %v5242_v39  ;;  %2643 = vst [vmem:[#allocation1 + $0x10] ss:$2 sm:$0xff] %v4810_v17  ;;  %v2709_v14 = vpop.f32.mrf.mxu1 }
 0x7d8   :  { %2644 = vst [vmem:[#allocation1 + $0x11] ss:$2 sm:$0xff] %v4801_v1  ;;  %v2737_v15 = vrot.slane %v2704_v62, 4  ;;  %4279 = vtanh.f32 %v2704_v62 }
 0x7d9   :  { %v2538_v61 = vadd.f32 %v5565_v18, %v2512_v37 }
 0x7da   :  { %v2618_v10 = vld.sshfl [vmem:[#allocation1 + $0x30] sm:$0xff pattern:$0x75316420]  ;;  %4281 = vtanh.f32 %v2737_v15 }
 0x7db   :  { %2620 = vst [vmem:[#allocation1 + $0x1] ss:$2 sm:$0xff] %v2538_v61  ;;  %4004 = vmatmul.msk.f32.gmra.mxu1 %vm108_vm2, %v2618_v10 }
 0x7dc   :  { %2634 = vst [vmem:[#allocation1 + $0x30] ss:$2 sm:$0xff] %v4801_v1 }
 0x7dd   :  { %2636 = vst [vmem:[#allocation1 + $0x31] ss:$2 sm:$0xff] %v4810_v17  ;;  %v2639_v31 = vld.sshfl [vmem:[#allocation1 + $0x20] sm:$0xff pattern:$0x75316420] }
 0x7de   :  { %v5648_v39 = vpop.eup %4279  ;;  %2645 = vst [vmem:[#allocation1 + $0x20] ss:$2 sm:$0xff] %v4810_v17  ;;  %v2707_v7 = vadd.f32 %v2706_v3, %v2639_v31 }
 0x7df   :  { %2646 = vst [vmem:[#allocation1 + $0x21] ss:$2 sm:$0xff] %v4801_v1  ;;  %v5652_v44 = vld.sshfl [vmem:[#allocation1 + $0x10] sm:$0xff pattern:$0x75316420]  ;;  %v2712_v5 = vpop.f32.mrf.mxu1 }
 0x7e0   :  { %v5654_v18 = vpop.eup %4281  ;;  %v2738_v53 = vrot.slane %v2707_v7, 4  ;;  %4283 = vtanh.f32 %v2707_v7  ;;  %2785 = vst [vmem:[#allocation1 + $0x10] ss:$2 sm:$0xff] %v5648_v39 }
 0x7e1   :  { %2787 = vst [vmem:[#allocation1 + $0x11] ss:$2 sm:$0xff] %v5654_v18 }
 0x7e2   :  { %v2621_v2 = vld.sshfl [vmem:[#allocation1] sm:$0xff pattern:$0x75316420]  ;;  %4285 = vtanh.f32 %v2738_v53 }
 0x7e3   :  { %4005 = vmatmul.msk.f32.gmra.mxu1 %vm108_vm2, %v2621_v2  ;;  %2622 = vst [vmem:[#allocation1] ss:$2 sm:$0xff] %v4801_v1 }
 0x7e4   :  { %2624 = vst [vmem:[#allocation1 + $0x1] ss:$2 sm:$0xff] %v4810_v17  ;;  %v2640_v25 = vld.sshfl [vmem:[#allocation1 + $0x30] sm:$0xff pattern:$0x75316420] }
 0x7e5   :  { %2647 = vst [vmem:[#allocation1 + $0x30] ss:$2 sm:$0xff] %v4810_v17  ;;  %v2710_v0 = vadd.f32 %v2709_v14, %v2640_v25 }
 0x7e6   :  { %v5662_v47 = vpop.eup %4283  ;;  %2648 = vst [vmem:[#allocation1 + $0x31] ss:$2 sm:$0xff] %v4801_v1  ;;  %v2651_v4 = vld.sshfl [vmem:[#allocation1 + $0x20] sm:$0xff pattern:$0x75316420] }
 0x7e7   :  { %v2739_v48 = vrot.slane %v2710_v0, 4  ;;  %4287 = vtanh.f32 %v2710_v0  ;;  %2789 = vst [vmem:[#allocation1 + $0x20] ss:$2 sm:$0xff] %v5662_v47 }
 0x7e8   :  { %v5666_v56 = vpop.eup %4285  ;;  %v2797_v58 = vld.sshfl [vmem:[#allocation1 + $0x10] sm:$0xff pattern:$0x75316420] }
 0x7e9   :  { %4289 = vtanh.f32 %v2739_v48  ;;  %2791 = vst [vmem:[#allocation1 + $0x21] ss:$2 sm:$0xff] %v5666_v56 }
 0x7eb   :  { %v2637_v12 = vld.sshfl [vmem:[#allocation1] sm:$0xff pattern:$0x75316420] }
 0x7ec   :  { %2641 = vst [vmem:[#allocation1] ss:$2 sm:$0xff] %v4801_v1  ;;  %v2701_v55 = vadd.f32 %v5625_v20, %v2637_v12  ;;  %v2562_v20 = vpop.f32.mrf.mxu3 }
 0x7ed   :  { %v5670_v45 = vpop.eup %4287  ;;  %2642 = vst [vmem:[#allocation1 + $0x1] ss:$2 sm:$0xff] %v4801_v1  ;;  %v2652_v38 = vld.sshfl [vmem:[#allocation1 + $0x30] sm:$0xff pattern:$0x75316420]  ;;  %v2563_v33 = vadd.f32 %v5697_v24, %v2562_v20 }
 0x7ee   :  { %2793 = vst [vmem:[#allocation1 + $0x30] ss:$2 sm:$0xff] %v5670_v45  ;;  %v2736_v60 = vrot.slane %v2701_v55, 4  ;;  %4291 = vtanh.f32 %v2701_v55 }
 0x7ef   :  { %v5674_v19 = vpop.eup %4289 }
 0x7f0   :  { %2795 = vst [vmem:[#allocation1 + $0x31] ss:$2 sm:$0xff] %v5674_v19  ;;  %4293 = vtanh.f32 %v2736_v60  ;;  %v2798_v27 = vld.sshfl [vmem:[#allocation1 + $0x20] sm:$0xff pattern:$0x75316420]  ;;  %v3056_v60 = vld [vmem:[%s6042_s14 + $0x10] sm:$0xff] }
 0x7f4   :  { %v2649_v63 = vld.sshfl [vmem:[#allocation1] sm:$0xff pattern:$0x75316420]  ;;  %v5680_v22 = vpop.eup %4291 }
 0x7f5   :  { %2653 = vst [vmem:[#allocation1] ss:$2 sm:$0xff] %v4810_v17  ;;  %v2713_v21 = vadd.f32 %v2712_v5, %v2649_v63 }
 0x7f6   :  { %2654 = vst [vmem:[#allocation1 + $0x1] ss:$2 sm:$0xff] %v4801_v1  ;;  %v5682_v54 = vpop.eup %4293 }
 0x7f7   :  { %4295 = vtanh.f32 %v2713_v21  ;;  %v2740_v29 = vrot.slane %v2713_v21, 4  ;;  %v2799_v40 = vld.sshfl [vmem:[#allocation1 + $0x30] sm:$0xff pattern:$0x75316420]  ;;  %v3055_v21 = vld [vmem:[%s6042_s14 + $0x8] sm:$0xff] }
 0x7f9   :  { %4297 = vtanh.f32 %v2740_v29  ;;  %v3059_v29 = vrot.slane %v4826_v59, 6 }
 0x7fa   :  { %4299 = vtanh.f32 %v2563_v33 }
 0x7fd   :  { %v2655_v34 = vld.sshfl [vmem:[#allocation1] sm:$0xff pattern:$0x75316420]  ;;  %v5686_v13 = vpop.eup %4295 }
 0x7fe   :  { %2781 = vst [vmem:[#allocation1] ss:$2 sm:$0xff] %v5680_v22 }
 0x7ff   :  { %2783 = vst [vmem:[#allocation1 + $0x1] ss:$2 sm:$0xff] %v5682_v54  ;;  %v5689_v1 = vpop.eup %4297 }
 0x800   :  { %v4300_v57 = vpop.eup %4299 }
 0x806   :  { %v2796_v17 = vld.sshfl [vmem:[#allocation1] sm:$0xff pattern:$0x75316420] }
 0x807   :  { %2800 = vst [vmem:[#allocation1] ss:$2 sm:$0xff] %v5686_v13 }
 0x80e   :  { %v2801_v50 = vld.sshfl [vmem:[#allocation1] sm:$0xff pattern:$0x75316420] }
 0x80f   :  { %4006 = vmatpush.xpose.msk.msra.mxu3 %vm108_vm2, %v2801_v50  ;;  %2844 = vst [vmem:[#allocation1] ss:$2 sm:$0xff] %v5689_v1 }
 0x813   :  { %4007 = vmatpush.xpose.msk.msra.mxu3 %vm108_vm2, %v2799_v40 }
 0x817   :  { %4008 = vmatpush.xpose.msk.msra.mxu3 %vm108_vm2, %v2798_v27  ;;  %v6110_v27 = vld [vmem:[#allocation6_spill] sm:$0xff] }
 0x81b   :  { %4009 = vmatpush.xpose.msk.msra.mxu3 %vm108_vm2, %v2797_v58 }
 0x81f   :  { %4010 = vmatpush.xpose.msk.msra.mxu3 %vm108_vm2, %v2796_v17 }
 0x822   :  { %4011 = vmatmul.msk.f32.vlgmr.msra.gmra.mxu3 %vm108_vm2, %v4300_v57 }
 0x848   :  { %v2715_v42 = vpop.f32.mrf.mxu1 }
 0x849   :  { %v2716_v46 = vadd.f32 %v2715_v42, %v5652_v44  ;;  %v6113_v42 = vld [vmem:[#allocation8_spill] sm:$0xff] }
 0x84b   :  { %v2741_v41 = vrot.slane %v2716_v46, 4  ;;  %4301 = vtanh.f32 %v2716_v46 }
 0x84d   :  { %4303 = vtanh.f32 %v2741_v41  ;;  %v6114_v41 = vrot.slane %v6113_v42, 4 }
 0x850   :  { %v2718_v11 = vpop.f32.mrf.mxu1 }
 0x851   :  { %v5705_v49 = vpop.eup %4301  ;;  %v2719_v52 = vadd.f32 %v2718_v11, %v2651_v4  ;;  %v6106_v4 = vrot.slane %v4557_v28, 4  ;;  %v6115_v11 = vld [vmem:[#allocation9_spill] sm:$0xff] }
 0x852   :  { %2846 = vst [vmem:[#allocation1 + $0x1] ss:$2 sm:$0xff] %v5705_v49 }
 0x853   :  { %v4304_v6 = vpop.eup %4303  ;;  %v2742_v16 = vrot.slane %v2719_v52, 4  ;;  %4305 = vtanh.f32 %v2719_v52  ;;  %v6116_v52 = vrot.slane %v6115_v11, 4 }
 0x854   :  { %2848 = vst [vmem:[#allocation1 + $0x10] ss:$2 sm:$0xff] %v4304_v6 }
 0x855   :  { %4307 = vtanh.f32 %v2742_v16 }
 0x858   :  { %v2721_v35 = vpop.f32.mrf.mxu1 }
 0x859   :  { %v4306_v9 = vpop.eup %4305  ;;  %v2722_v51 = vadd.f32 %v2721_v35, %v2652_v38  ;;  %v2859_v2 = vld.sshfl [vmem:[#allocation1] sm:$0xff pattern:$0x75316420]  ;;  %v6107_v38 = vrot.slane %v4563_v30, 4  ;;  %v6119_v35 = vld [vmem:[#allocation11_spill] sm:$0xff] }
 0x85a   :  { %2850 = vst [vmem:[#allocation1 + $0x11] ss:$2 sm:$0xff] %v4306_v9 }
 0x85b   :  { %v4308_v23 = vpop.eup %4307  ;;  %v2743_v62 = vrot.slane %v2722_v51, 4  ;;  %4309 = vtanh.f32 %v2722_v51 }
 0x85c   :  { %2852 = vst [vmem:[#allocation1 + $0x20] ss:$2 sm:$0xff] %v4308_v23 }
 0x85d   :  { %4311 = vtanh.f32 %v2743_v62 }
 0x860   :  { %v2724_v37 = vpop.f32.mrf.mxu1 }
 0x861   :  { %v4310_v15 = vpop.eup %4309  ;;  %v2725_v61 = vadd.f32 %v2724_v37, %v2655_v34  ;;  %v2860_v3 = vld.sshfl [vmem:[#allocation1 + $0x10] sm:$0xff pattern:$0x75316420]  ;;  %v3054_v34 = vld [vmem:[%s6042_s14] sm:$0xff] }
 0x862   :  { %2854 = vst [vmem:[#allocation1 + $0x21] ss:$2 sm:$0xff] %v4310_v15 }
 0x863   :  { %v4312_v10 = vpop.eup %4311  ;;  %v2744_v31 = vrot.slane %v2725_v61, 4  ;;  %4313 = vtanh.f32 %v2725_v61  ;;  %2952 = vst [vmem:[#allocation1 + $0x10] ss:$2 sm:$0xff] %v5648_v39 }
 0x864   :  { %2856 = vst [vmem:[#allocation1 + $0x30] ss:$2 sm:$0xff] %v4312_v10 }
 0x865   :  { %4315 = vtanh.f32 %v2744_v31  ;;  %2954 = vst [vmem:[#allocation1 + $0x11] ss:$2 sm:$0xff] %v5654_v18 }
 0x869   :  { %v4314_v7 = vpop.eup %4313  ;;  %v2861_v44 = vld.sshfl [vmem:[#allocation1 + $0x20] sm:$0xff pattern:$0x75316420] }
 0x86a   :  { %2858 = vst [vmem:[#allocation1 + $0x31] ss:$2 sm:$0xff] %v4314_v7 }
 0x86b   :  { %v5710_v53 = vpop.eup %4315  ;;  %2956 = vst [vmem:[#allocation1 + $0x20] ss:$2 sm:$0xff] %v5662_v47  ;;  %v2565_v47 = vpop.f32.mrf.mxu3 }
 0x86c   :  { %2863 = vst [vmem:[#allocation1] ss:$2 sm:$0xff] %v5710_v53  ;;  %v2964_v14 = vld.sshfl [vmem:[#allocation1 + $0x10] sm:$0xff pattern:$0x75316420] }
 0x86d   :  { %2958 = vst [vmem:[#allocation1 + $0x21] ss:$2 sm:$0xff] %v5666_v56  ;;  %v2566_v56 = vadd.f32 %v5697_v24, %v2565_v47  ;;  %v6111_v24 = vld [vmem:[#allocation7_spill] sm:$0xff] }
 0x86e   :  { %3002 = vst [vmem:[#allocation1 + $0x10] ss:$2 sm:$0xff] %v4304_v6  ;;  %v6112_v57 = vrot.slane %v6111_v24, 4  ;;  %v6117_v6 = vld [vmem:[#allocation10_spill] sm:$0xff] }
 0x86f   :  { %3004 = vst [vmem:[#allocation1 + $0x11] ss:$2 sm:$0xff] %v4306_v9  ;;  %4317 = vtanh.f32 %v2566_v56  ;;  %v6118_v16 = vrot.slane %v6117_v6, 4  ;;  %v3052_v56 = vld [vmem:[%s6041_s13 + $0x10] sm:$0xff] }
 0x871   :  { %v2862_v39 = vld.sshfl [vmem:[#allocation1 + $0x30] sm:$0xff pattern:$0x75316420] }
 0x872   :  { %2960 = vst [vmem:[#allocation1 + $0x30] ss:$2 sm:$0xff] %v5670_v45 }
 0x873   :  { %v2864_v25 = vld.sshfl [vmem:[#allocation1] sm:$0xff pattern:$0x75316420]  ;;  %2962 = vst [vmem:[#allocation1 + $0x31] ss:$2 sm:$0xff] %v5674_v19  ;;  %v3057_v19 = vld [vmem:[%s6042_s14 + $0x18] sm:$0xff] }
 0x874   :  { %4012 = vmatpush.xpose.msk.msra.mxu0 %vm108_vm2, %v2864_v25  ;;  %2948 = vst [vmem:[#allocation1] ss:$2 sm:$0xff] %v5680_v22  ;;  %v2965_v18 = vld.sshfl [vmem:[#allocation1 + $0x20] sm:$0xff pattern:$0x75316420]  ;;  %v6108_v22 = vrot.slane %v4578_v36, 4 }
 0x875   :  { %2950 = vst [vmem:[#allocation1 + $0x1] ss:$2 sm:$0xff] %v5682_v54  ;;  %v4318_v5 = vpop.eup %4317  ;;  %v3058_v54 = vrot.slane %v4778_v26, 7  ;;  %v6109_v26 = vrot.slane %v4569_v32, 4 }
 0x876   :  { %3006 = vst [vmem:[#allocation1 + $0x20] ss:$2 sm:$0xff] %v4308_v23  ;;  %v3014_v0 = vld.sshfl [vmem:[#allocation1 + $0x10] sm:$0xff pattern:$0x75316420] }
 0x877   :  { %3008 = vst [vmem:[#allocation1 + $0x21] ss:$2 sm:$0xff] %v4310_v15  ;;  %v5754_v17 = vsel %vm3060_vm5, %v3059_v29, %v3058_v54 }
 0x878   :  { %4013 = vmatpush.xpose.msk.msra.mxu0 %vm108_vm2, %v2862_v39  ;;  %3094 = vst [vmem:[#allocation1 + $0x10] ss:$2 sm:$0xff] %v4557_v28 }
 0x879   :  { %3096 = vst [vmem:[#allocation1 + $0x11] ss:$2 sm:$0xff] %v6106_v4 }
 0x87a   :  { %v2966_v48 = vld.sshfl [vmem:[#allocation1 + $0x30] sm:$0xff pattern:$0x75316420] }
 0x87b   :  { %3010 = vst [vmem:[#allocation1 + $0x30] ss:$2 sm:$0xff] %v4312_v10 }
 0x87c   :  { %4014 = vmatpush.xpose.msk.msra.mxu0 %vm108_vm2, %v2861_v44  ;;  %v2963_v12 = vld.sshfl [vmem:[#allocation1] sm:$0xff pattern:$0x75316420]  ;;  %3012 = vst [vmem:[#allocation1 + $0x31] ss:$2 sm:$0xff] %v4314_v7 }
 0x87d   :  { %2967 = vst [vmem:[#allocation1] ss:$2 sm:$0xff] %v5686_v13 }
 0x87e   :  { %v3015_v45 = vld.sshfl [vmem:[#allocation1 + $0x20] sm:$0xff pattern:$0x75316420] }
 0x87f   :  { %3098 = vst [vmem:[#allocation1 + $0x20] ss:$2 sm:$0xff] %v4563_v30 }
 0x880   :  { %4015 = vmatpush.xpose.msk.msra.mxu0 %vm108_vm2, %v2860_v3  ;;  %3100 = vst [vmem:[#allocation1 + $0x21] ss:$2 sm:$0xff] %v6107_v38  ;;  %v5768_v33 = vld.sshfl [vmem:[#allocation1 + $0x10] sm:$0xff pattern:$0x75316420] }
 0x881   :  { %3111 = vst [vmem:[#allocation1 + $0x10] ss:$2 sm:$0xff] %v6112_v57 }
 0x882   :  { %3112 = vst [vmem:[#allocation1 + $0x11] ss:$2 sm:$0xff] %v6113_v42 }
 0x883   :  { %v3016_v55 = vld.sshfl [vmem:[#allocation1 + $0x30] sm:$0xff pattern:$0x75316420] }
 0x884   :  { %4016 = vmatpush.xpose.msk.msra.mxu0 %vm108_vm2, %v2859_v2  ;;  %v2968_v63 = vld.sshfl [vmem:[#allocation1] sm:$0xff pattern:$0x75316420]  ;;  %3102 = vst [vmem:[#allocation1 + $0x30] ss:$2 sm:$0xff] %v4578_v36 }
 0x885   :  { %4018 = vmatpush.msk.msrb.mxu2 %vm1279_vm3, %v2968_v63  ;;  %2998 = vst [vmem:[#allocation1] ss:$2 sm:$0xff] %v5689_v1 }
 0x886   :  { %3000 = vst [vmem:[#allocation1 + $0x1] ss:$2 sm:$0xff] %v5705_v49 }
 0x887   :  { %2990 = vmatpush.msrb.mxu2 %v2966_v48  ;;  %4017 = vmatmul.msk.f32.vlgmr.msra.gmra.mxu0 %vm108_vm2, %v4318_v5  ;;  %3104 = vst [vmem:[#allocation1 + $0x31] ss:$2 sm:$0xff] %v6108_v22  ;;  %v5770_v58 = vld.sshfl [vmem:[#allocation1 + $0x20] sm:$0xff pattern:$0x75316420]  ;;  %v3053_v48 = vld [vmem:[%s6041_s13 + $0x18] sm:$0xff] }
 0x888   :  { %3076 = vmatpush.msrb.mxu0 %v3057_v19  ;;  %3113 = vst [vmem:[#allocation1 + $0x20] ss:$2 sm:$0xff] %v6114_v41 }
 0x889   :  { %2991 = vmatpush.msrb.mxu2 %v2965_v18  ;;  %3114 = vst [vmem:[#allocation1 + $0x21] ss:$2 sm:$0xff] %v6115_v11  ;;  %v5790_v23 = vld.sshfl [vmem:[#allocation1 + $0x10] sm:$0xff pattern:$0x75316420] }
 0x88a   :  { %3077 = vmatpush.msrb.mxu0 %v3056_v60 }
 0x88b   :  { %2992 = vmatpush.msrb.mxu2 %v2964_v14 }
 0x88c   :  { %3078 = vmatpush.msrb.mxu0 %v3055_v21 }
 0x88d   :  { %2993 = vmatpush.msrb.mxu2 %v2963_v12  ;;  %v3013_v13 = vld.sshfl [vmem:[#allocation1] sm:$0xff pattern:$0x75316420]  ;;  %v3051_v12 = vld [vmem:[%s6041_s13 + $0x8] sm:$0xff] }
 0x88e   :  { %3079 = vmatpush.msrb.mxu0 %v3054_v34  ;;  %3017 = vst [vmem:[#allocation1] ss:$2 sm:$0xff] %v5710_v53  ;;  %v5775_v46 = vld.sshfl [vmem:[#allocation1 + $0x30] sm:$0xff pattern:$0x75316420] }
 0x88f   :  { %4022 = vmatmul.msk.f32.vlgmr.msrb.gmra.mxu0 %vm108_vm2, %v5754_v17  ;;  %3115 = vst [vmem:[#allocation1 + $0x30] ss:$2 sm:$0xff] %v6116_v52  ;;  %3197 = vmatpush.msra.mxu2 %v3053_v48  ;;  %v4383_v52 = vmov 0  }
 0x890   :  { %3116 = vst [vmem:[#allocation1 + $0x31] ss:$2 sm:$0xff] %v6117_v6  ;;  %v5792_v37 = vld.sshfl [vmem:[#allocation1 + $0x20] sm:$0xff pattern:$0x75316420]  ;;  %4041 = vset.pattern.permute.xlu0 %v4383_v52 }
 0x891   :  { %3198 = vmatpush.msra.mxu2 %v3052_v56 }
 0x893   :  { %3199 = vmatpush.msra.mxu2 %v3051_v12 }
 0x895   :  { %v3018_v1 = vld.sshfl [vmem:[#allocation1] sm:$0xff pattern:$0x75316420] }
 0x896   :  { %4020 = vmatpush.msk.msrb.mxu3 %vm1279_vm3, %v3018_v1  ;;  %3090 = vst [vmem:[#allocation1] ss:$2 sm:$0xff] %v4569_v32 }
 0x897   :  { %3092 = vst [vmem:[#allocation1 + $0x1] ss:$2 sm:$0xff] %v6109_v26  ;;  %v5794_v3 = vld.sshfl [vmem:[#allocation1 + $0x30] sm:$0xff pattern:$0x75316420] }
 0x898   :  { %3040 = vmatpush.msrb.mxu3 %v3016_v55  ;;  %v5843_v26 = vld [vmem:[%s6043_s15] ss:$0 sm:$0xff] }
 0x89a   :  { %3041 = vmatpush.msrb.mxu3 %v3015_v45  ;;  %v3050_v45 = vld [vmem:[%s6041_s13] sm:$0xff] }
 0x89b   :  { %3200 = vmatpush.msra.mxu2 %v3050_v45 }
 0x89c   :  { %3042 = vmatpush.msrb.mxu3 %v3014_v0 }
 0x89e   :  { %3043 = vmatpush.msrb.mxu3 %v3013_v13  ;;  %v5764_v20 = vld.sshfl [vmem:[#allocation1] sm:$0xff pattern:$0x75316420] }
 0x89f   :  { %3109 = vst [vmem:[#allocation1] ss:$2 sm:$0xff] %v6110_v27 }
 0x8a0   :  { %3110 = vst [vmem:[#allocation1 + $0x1] ss:$2 sm:$0xff] %v6111_v24 }
 0x8a5   :  { %v2832_v59 = vpop.f32.mrf.mxu3 }
 0x8a6   :  { %v2898_v50 = vmul.f32 0.17677669, %v2832_v59 }
 0x8a7   :  { %v5780_v49 = vld.sshfl [vmem:[#allocation1] sm:$0xff pattern:$0x75316420] }
 0x8a8   :  { %v2900_v40 = vsel %vm960_vm4, %v2898_v50, -inf  ;;  %3121 = vst [vmem:[#allocation1] ss:$2 sm:$0xff] %v6118_v16 }
 0x8a9   :  { %2901 = vmax.xlane.f32.xlu0 %v2900_v40  ;;  %3122 = vst [vmem:[#allocation1 + $0x1] ss:$2 sm:$0xff] %v6119_v35 }
 0x8b0   :  { %v5796_v10 = vld.sshfl [vmem:[#allocation1] sm:$0xff pattern:$0x75316420] }
 0x904   :  { %v5788_v9 = vpop.f32.mrf.mxu0 }
 0x90c   :  { %v3081_v51 = vpop.f32.mrf.mxu0 }
 0x90d   :  { %v3086_v62 = vperm.slane %v3081_v51, 0  ;;  %v3085_v15 = vrot.slane %v3081_v51, 1 }
 0x90f   :  { %v3088_v61 = vrot.slane %v3086_v62, 4  ;;  %3128 = vst [vmem:[#allocation1 + $0x10] ss:$2 sm:$0xff] %v3086_v62  ;;  %v3087_v31 = vperm.slane %v3085_v15, 0 }
 0x910   :  { %3132 = vst [vmem:[#allocation1 + $0x20] ss:$2 sm:$0xff] %v3086_v62 }
 0x911   :  { %3130 = vst [vmem:[#allocation1 + $0x11] ss:$2 sm:$0xff] %v3088_v61  ;;  %v3089_v7 = vrot.slane %v3087_v31, 4 }
 0x912   :  { %3134 = vst [vmem:[#allocation1 + $0x21] ss:$2 sm:$0xff] %v3088_v61 }
 0x913   :  { %3136 = vst [vmem:[#allocation1 + $0x30] ss:$2 sm:$0xff] %v3086_v62 }
 0x914   :  { %3138 = vst [vmem:[#allocation1 + $0x31] ss:$2 sm:$0xff] %v3088_v61 }
 0x915   :  { %3124 = vst [vmem:[#allocation1] ss:$2 sm:$0xff] %v3086_v62 }
 0x916   :  { %3126 = vst [vmem:[#allocation1 + $0x1] ss:$2 sm:$0xff] %v3088_v61 }
 0x918   :  { %v5798_v44 = vld.sshfl [vmem:[#allocation1 + $0x10] sm:$0xff pattern:$0x75316420] }
 0x919   :  { %3145 = vst [vmem:[#allocation1 + $0x10] ss:$2 sm:$0xff] %v3089_v7  ;;  %v5800_v53 = vld.sshfl [vmem:[#allocation1 + $0x20] sm:$0xff pattern:$0x75316420] }
 0x91a   :  { %3146 = vst [vmem:[#allocation1 + $0x11] ss:$2 sm:$0xff] %v3087_v31 }
 0x91b   :  { %3147 = vst [vmem:[#allocation1 + $0x20] ss:$2 sm:$0xff] %v3089_v7  ;;  %v5802_v2 = vld.sshfl [vmem:[#allocation1 + $0x30] sm:$0xff pattern:$0x75316420] }
 0x91c   :  { %v2902_v14 = vpop.xlane.xlu0 %2901  ;;  %3148 = vst [vmem:[#allocation1 + $0x21] ss:$2 sm:$0xff] %v3087_v31 }
 0x91d   :  { %v2906_v39 = vsub.f32 %v2898_v50, %v2902_v14  ;;  %v3139_v25 = vld.sshfl [vmem:[#allocation1] sm:$0xff pattern:$0x75316420]  ;;  %3149 = vst [vmem:[#allocation1 + $0x30] ss:$2 sm:$0xff] %v3089_v7 }
 0x91e   :  { %3143 = vst [vmem:[#allocation1] ss:$2 sm:$0xff] %v3086_v62 }
 0x91f   :  { %v2908_v18 = vmul.f32 1.442695, %v2906_v39  ;;  %3144 = vst [vmem:[#allocation1 + $0x1] ss:$2 sm:$0xff] %v3087_v31 }
 0x920   :  { %3150 = vst [vmem:[#allocation1 + $0x31] ss:$2 sm:$0xff] %v3087_v31 }
 0x921   :  { %4319 = vpow2.f32 %v2908_v18  ;;  %v3152_v15 = vld.sshfl [vmem:[#allocation1 + $0x10] sm:$0xff pattern:$0x75316420] }
 0x923   :  { %v3153_v18 = vld.sshfl [vmem:[#allocation1 + $0x20] sm:$0xff pattern:$0x75316420] }
 0x926   :  { %v5804_v0 = vld.sshfl [vmem:[#allocation1] sm:$0xff pattern:$0x75316420] }
 0x927   :  { %v4320_v47 = vpop.eup %4319  ;;  %3155 = vst [vmem:[#allocation1] ss:$2 sm:$0xff] %v3089_v7 }
 0x928   :  { %v2912_v4 = vsel %vm960_vm4, %v4320_v47, 0.0  ;;  %3156 = vst [vmem:[#allocation1 + $0x1] ss:$2 sm:$0xff] %v3087_v31 }
 0x929   :  { %2913 = vadd.xlane.f32.xlu1 %v2912_v4 }
 0x99c   :  { %v2914_v38 = vpop.xlane.xlu1 %2913 }
 0x99d   :  { %4321 = vrcp.f32 %v2914_v38  ;;  %v2929_v60 = vand.u32 2147483648, %v2914_v38  ;;  %v2927_v21 = vand.u32 2147483647, %v2914_v38  ;;  %vm2923_vm14 = vweird.f32 %v2914_v38 }
 0x99f   :  { %v2930_v34 = vor.u32 1.1754944e-38, %v2929_v60  ;;  %vm2928_vm0 = vcmp.eq.f32.partialorder %v2927_v21, 8.507059e+37 }
 0x9a3   :  { %v4322_v19 = vpop.eup %4321 }
 0x9a4   :  { %v2919_v55 = vmul.f32 %v4322_v19, %v2914_v38  ;;  %vm2924_vm13 = vweird.f32 %v4322_v19 }
 0x9a5   :  { %vm2925_vm15 = vmor %vm2923_vm14, %vm2924_vm13 }
 0x9a6   :  { %v2920_v63 = vsub.f32 1.0, %v2919_v55  ;;  %v3154_v55 = vld.sshfl [vmem:[#allocation1 + $0x30] sm:$0xff pattern:$0x75316420] }
 0x9a8   :  { %v2921_v5 = vmul.f32 %v4322_v19, %v2920_v63 }
 0x9aa   :  { %v2922_v22 = vadd.f32 %v4322_v19, %v2921_v5 }
 0x9ac   :  { %v2926_v54 = vsel %vm2925_vm15, %v4322_v19, %v2922_v22 }
 0x9ad   :  { %v2931_v29 = vsel %vm2928_vm0, %v2930_v34, %v2926_v54 }
 0x9ae   :  { %v2932_v13 = vmul.f32 %v4320_v47, %v2931_v29 }
 0x9b0   :  { %4019 = vmatmul.msk.f32.vlgmr.msrb.gmra.mxu2 %vm960_vm4, %v2932_v13 }
 0x9b8   :  { %4023 = vmatmul.msk.f32.vlgmr.msra.gmra.mxu2 %vm108_vm2, %v5764_v20 }
 0x9c0   :  { %4024 = vmatmul.msk.f32.gmra.mxu2 %vm108_vm2, %v5768_v33  ;;  %v5846_v33 = vrot.slane %v5843_v26, 4 }
 0x9c8   :  { %4025 = vmatmul.msk.f32.gmra.mxu2 %vm108_vm2, %v5770_v58 }
 0x9d0   :  { %4026 = vmatmul.msk.f32.gmra.mxu2 %vm108_vm2, %v5775_v46  ;;  %v5849_v46 = vld.sshfl [vmem:[#allocation1] sm:$0xff pattern:$0x75316420] }
 0x9d8   :  { %4027 = vmatmul.msk.f32.gmra.mxu2 %vm108_vm2, %v5780_v49 }
 0x9e0   :  { %4028 = vmatmul.msk.f32.gmra.mxu2 %vm108_vm2, %v5790_v23 }
 0x9e8   :  { %4029 = vmatmul.msk.f32.gmra.mxu2 %vm108_vm2, %v5792_v37 }
 0x9f0   :  { %4030 = vmatmul.msk.f32.gmra.mxu2 %vm108_vm2, %v5794_v3 }
 0x9f8   :  { %4031 = vmatmul.msk.f32.gmra.mxu2 %vm108_vm2, %v5796_v10 }
 0xa33   :  { %v5838_v1 = vpop.f32.mrf.mxu2 }
 0xa3b   :  { %v3202_v59 = vpop.f32.mrf.mxu2 }
 0xa3c   :  { %v3203_v50 = vadd.f32 %v3202_v59, %v3139_v25 }
 0xa3e   :  { %v3238_v40 = vrot.slane %v3203_v50, 4  ;;  %v3256_v20 = vmax.f32 %v3203_v50, 0.0 }
 0xa40   :  { %v3257_v58 = vmax.f32 %v3238_v40, 0.0  ;;  %v3280_v57 = vmul.f32 %v5843_v26, %v3256_v20 }
 0xa42   :  { %v3281_v41 = vmul.f32 %v5846_v33, %v3257_v58  ;;  %3316 = vst [vmem:[#allocation1] ss:$2 sm:$0xff] %v3280_v57 }
 0xa43   :  { %v3205_v49 = vpop.f32.mrf.mxu2 }
 0xa44   :  { %3318 = vst [vmem:[#allocation1 + $0x1] ss:$2 sm:$0xff] %v3281_v41  ;;  %v3206_v16 = vadd.f32 %v3205_v49, %v5798_v44 }
 0xa46   :  { %v3239_v51 = vrot.slane %v3206_v16, 4  ;;  %v3258_v23 = vmax.f32 %v3206_v16, 0.0 }
 0xa48   :  { %v3259_v62 = vmax.f32 %v3239_v51, 0.0  ;;  %v3282_v37 = vmul.f32 %v5843_v26, %v3258_v23 }
 0xa4a   :  { %v3283_v61 = vmul.f32 %v5846_v33, %v3259_v62  ;;  %3320 = vst [vmem:[#allocation1 + $0x10] ss:$2 sm:$0xff] %v3282_v37 }
 0xa4b   :  { %v3208_v3 = vpop.f32.mrf.mxu2  ;;  %v3331_v10 = vld.sshfl [vmem:[#allocation1] sm:$0xff pattern:$0x75316420] }
 0xa4c   :  { %3322 = vst [vmem:[#allocation1 + $0x11] ss:$2 sm:$0xff] %v3283_v61  ;;  %v3209_v31 = vadd.f32 %v3208_v3, %v5800_v53  ;;  %v3361_v7 = vsel %vm108_vm2, %v3331_v10, 0.0 }
 0xa4d   :  { %3362 = vadd.xlane.f32.xlu0 %v3361_v7 }
 0xa4e   :  { %v3240_v14 = vrot.slane %v3209_v31, 4  ;;  %v3260_v39 = vmax.f32 %v3209_v31, 0.0 }
 0xa50   :  { %v3261_v44 = vmax.f32 %v3240_v14, 0.0  ;;  %v3284_v25 = vmul.f32 %v5843_v26, %v3260_v39 }
 0xa52   :  { %v3285_v47 = vmul.f32 %v5846_v33, %v3261_v44  ;;  %3324 = vst [vmem:[#allocation1 + $0x20] ss:$2 sm:$0xff] %v3284_v25  ;;  %v3460_v25 = vlaneseq }
 0xa53   :  { %v3211_v4 = vpop.f32.mrf.mxu2  ;;  %v3332_v48 = vld.sshfl [vmem:[#allocation1 + $0x10] sm:$0xff pattern:$0x75316420] }
 0xa54   :  { %3326 = vst [vmem:[#allocation1 + $0x21] ss:$2 sm:$0xff] %v3285_v47  ;;  %v3212_v56 = vadd.f32 %v3211_v4, %v5802_v2  ;;  %v3364_v12 = vsel %vm108_vm2, %v3332_v48, 0.0  ;;  %v4059_v2 = vld [vmem:[#allocation2] ss:$0 sm:$0xff] }
 0xa55   :  { %3365 = vadd.xlane.f32.xlu1 %v3364_v12 }
 0xa56   :  { %v3241_v53 = vrot.slane %v3212_v56, 4  ;;  %v3262_v45 = vmax.f32 %v3212_v56, 0.0 }
 0xa58   :  { %v3263_v38 = vmax.f32 %v3241_v53, 0.0  ;;  %v3286_v19 = vmul.f32 %v5843_v26, %v3262_v45 }
 0xa5a   :  { %v3287_v63 = vmul.f32 %v5846_v33, %v3263_v38  ;;  %3328 = vst [vmem:[#allocation1 + $0x30] ss:$2 sm:$0xff] %v3286_v19 }
 0xa5b   :  { %v3214_v60 = vpop.f32.mrf.mxu2  ;;  %v3333_v5 = vld.sshfl [vmem:[#allocation1 + $0x20] sm:$0xff pattern:$0x75316420] }
 0xa5c   :  { %3330 = vst [vmem:[#allocation1 + $0x31] ss:$2 sm:$0xff] %v3287_v63  ;;  %v3215_v21 = vadd.f32 %v3214_v60, %v5804_v0  ;;  %v3367_v22 = vsel %vm108_vm2, %v3333_v5, 0.0 }
 0xa5d   :  { %3368 = vadd.xlane.f32.xlu2 %v3367_v22 }
 0xa5e   :  { %v3242_v34 = vrot.slane %v3215_v21, 4  ;;  %v3264_v54 = vmax.f32 %v3215_v21, 0.0 }
 0xa60   :  { %v3265_v29 = vmax.f32 %v3242_v34, 0.0  ;;  %v3288_v13 = vmul.f32 %v5843_v26, %v3264_v54 }
 0xa61   :  { %3396 = vperm.xlu0 %4041, %v4059_v2  }
 0xa62   :  { %v3289_v59 = vmul.f32 %v5843_v26, %v3265_v29  ;;  %3335 = vst [vmem:[#allocation1] ss:$2 sm:$0xff] %v3288_v13 }
 0xa63   :  { %v3217_v50 = vpop.f32.mrf.mxu2  ;;  %v3334_v40 = vld.sshfl [vmem:[#allocation1 + $0x30] sm:$0xff pattern:$0x75316420] }
 0xa64   :  { %3337 = vst [vmem:[#allocation1 + $0x10] ss:$2 sm:$0xff] %v3289_v59  ;;  %v3218_v20 = vadd.f32 %v3217_v50, %v3152_v15  ;;  %v3370_v58 = vsel %vm108_vm2, %v3334_v40, 0.0 }
 0xa65   :  { %3371 = vadd.xlane.f32.xlu1 %v3370_v58 }
 0xa66   :  { %v3243_v0 = vrot.slane %v3218_v20, 4  ;;  %v3266_v57 = vmax.f32 %v3218_v20, 0.0 }
 0xa68   :  { %v3267_v41 = vmax.f32 %v3243_v0, 0.0  ;;  %v3290_v49 = vmul.f32 %v5846_v33, %v3266_v57 }
 0xa69   :  { %v3336_v16 = vld.sshfl [vmem:[#allocation1] sm:$0xff pattern:$0x75316420] }
 0xa6a   :  { %v3291_v51 = vmul.f32 %v5843_v26, %v3267_v41  ;;  %3338 = vst [vmem:[#allocation1 + $0x11] ss:$2 sm:$0xff] %v3290_v49  ;;  %v3374_v23 = vsel %vm3373_vm1, %v3336_v16, 0.0 }
 0xa6b   :  { %v3220_v62 = vpop.f32.mrf.mxu2  ;;  %3375 = vadd.xlane.f32.xlu2 %v3374_v23 }
 0xa6c   :  { %3339 = vst [vmem:[#allocation1 + $0x20] ss:$2 sm:$0xff] %v3291_v51  ;;  %v3221_v37 = vadd.f32 %v3220_v62, %v3153_v18  ;;  %v3461_v18 = vshrl.u32 %v3460_v25, 7 }
 0xa6e   :  { %v3244_v15 = vrot.slane %v3221_v37, 4  ;;  %v3268_v61 = vmax.f32 %v3221_v37, 0.0  ;;  %4042 = vset.pattern.permute.xlu1 %v3461_v18  ;;  %4044 = vset.pattern.permute.xlu0 %v3461_v18  ;;  %v3468_v13 = vadd.s32 8, %v3461_v18  ;;  %v3474_v59 = vadd.s32 16, %v3461_v18 }
 0xa6f   :  { %v3480_v40 = vadd.s32 24, %v3461_v18  ;;  %v3486_v20 = vadd.s32 32, %v3461_v18 }
 0xa70   :  { %v3269_v3 = vmax.f32 %v3244_v15, 0.0  ;;  %v3292_v10 = vmul.f32 %v5846_v33, %v3268_v61  ;;  %4043 = vset.pattern.permute.xlu2 %v3468_v13 }
 0xa71   :  { %v3343_v31 = vld.sshfl [vmem:[#allocation1 + $0x10] sm:$0xff pattern:$0x75316420] }
 0xa72   :  { %v3293_v7 = vmul.f32 %v5843_v26, %v3269_v3  ;;  %3340 = vst [vmem:[#allocation1 + $0x21] ss:$2 sm:$0xff] %v3292_v10  ;;  %v3377_v14 = vsel %vm108_vm2, %v3343_v31, 0.0 }
 0xa73   :  { %v3223_v39 = vpop.f32.mrf.mxu2  ;;  %3378 = vadd.xlane.f32.xlu2 %v3377_v14 }
 0xa74   :  { %3341 = vst [vmem:[#allocation1 + $0x30] ss:$2 sm:$0xff] %v3293_v7  ;;  %v3224_v44 = vadd.f32 %v3223_v39, %v3154_v55 }
 0xa76   :  { %v3245_v47 = vrot.slane %v3224_v44, 4  ;;  %v3270_v4 = vmax.f32 %v3224_v44, 0.0 }
 0xa78   :  { %v3271_v48 = vmax.f32 %v3245_v47, 0.0  ;;  %v3294_v56 = vmul.f32 %v5846_v33, %v3270_v4 }
 0xa79   :  { %v3344_v12 = vld.sshfl [vmem:[#allocation1 + $0x20] sm:$0xff pattern:$0x75316420] }
 0xa7a   :  { %v3295_v53 = vmul.f32 %v5843_v26, %v3271_v48  ;;  %3342 = vst [vmem:[#allocation1 + $0x31] ss:$2 sm:$0xff] %v3294_v56  ;;  %v3380_v45 = vsel %vm108_vm2, %v3344_v12, 0.0 }
 0xa7b   :  { %v3226_v38 = vpop.f32.mrf.mxu2  ;;  %3381 = vadd.xlane.f32.xlu2 %v3380_v45 }
 0xa7c   :  { %3346 = vst [vmem:[#allocation1] ss:$2 sm:$0xff] %v3295_v53  ;;  %v3227_v19 = vadd.f32 %v3226_v38, %v5849_v46 }
 0xa7e   :  { %v3246_v55 = vrot.slane %v3227_v19, 4  ;;  %v3272_v63 = vmax.f32 %v3227_v19, 0.0 }
 0xa80   :  { %v3273_v60 = vmax.f32 %v3246_v55, 0.0  ;;  %v3296_v5 = vmul.f32 %v5846_v33, %v3272_v63  ;;  %v99_v33 = vld [vmem:[%s6120_s25] sm:$0x3] }
 0xa81   :  { %v3345_v29 = vld.sshfl [vmem:[#allocation1 + $0x30] sm:$0xff pattern:$0x75316420]  ;;  %v3490_v50 = vperm.slane %v99_v33, 1 }
 0xa82   :  { %v3297_v21 = vmul.f32 %v5843_v26, %v3273_v60  ;;  %3347 = vst [vmem:[#allocation1 + $0x1] ss:$2 sm:$0xff] %v3296_v5  ;;  %v3383_v46 = vsel %vm108_vm2, %v3345_v29, 0.0  ;;  %v3459_v26 = vperm.slane %v99_v33, 0 }
 0xa83   :  { %3495 = vperm.xlu0 %4044, %v3490_v50  }
 0xa84   :  { %3348 = vst [vmem:[#allocation1 + $0x10] ss:$2 sm:$0xff] %v3297_v21 }
 0xa89   :  { %v3349_v22 = vld.sshfl [vmem:[#allocation1] sm:$0xff pattern:$0x75316420] }
 0xa8a   :  { %v3386_v2 = vsel %vm108_vm2, %v3349_v22, 0.0 }
 0xa8b   :  { %3387 = vadd.xlane.f32.xlu2 %v3386_v2  ;;  %v3350_v34 = vld.sshfl [vmem:[#allocation1 + $0x10] sm:$0xff pattern:$0x75316420]  ;;  %4046 = vset.pattern.permute.xlu0 %v3474_v59 }
 0xa8c   :  { %v3389_v54 = vsel %vm3373_vm1, %v3350_v34, 0.0 }
 0xa8d   :  { %3390 = vadd.xlane.f32.xlu1 %v3389_v54 }
 0xa93   :  { %3507 = vperm.xlu0 %4046, %v3490_v50  }
 0xa95   :  { %3384 = vadd.xlane.f32.xlu1 %v3383_v46 }
 0xa9b   :  { %4051 = vset.pattern.permute.xlu0 %v4383_v52 }
 0xaa3   :  { %3470 = vperm.xlu2 %4043, %v3459_v26  }
 0xaab   :  { %3501 = vperm.xlu2 %4043, %v3490_v50  }
 0xaae   :  { %3464 = vperm.xlu1 %4042, %v3459_v26  }
 0xab3   :  { %4047 = vset.pattern.permute.xlu2 %v3480_v40 }
 0xab6   :  { %4045 = vset.pattern.permute.xlu1 %v3474_v59 }
 0xabb   :  { %3482 = vperm.xlu2 %4047, %v3459_v26  }
 0xabe   :  { %3476 = vperm.xlu1 %4045, %v3459_v26  }
 0xac0   :  { %v3363_v16 = vpop.xlane.xlu0 %3362 }
 0xac3   :  { %4049 = vset.pattern.permute.xlu2 %v3486_v20 }
 0xac6   :  { %4048 = vset.pattern.permute.xlu1 %v3480_v40 }
 0xac8   :  { %v3366_v57 = vpop.xlane.xlu1 %3365 }
 0xacb   :  { %3488 = vperm.xlu2 %4049, %v3459_v26  }
 0xace   :  { %3513 = vperm.xlu1 %4048, %v3490_v50  }
 0xad0   :  { %v3369_v58 = vpop.xlane.xlu2 %3368 }
 0xad3   :  { %4052 = vset.pattern.permute.xlu2 %v4383_v52  ;;  %v3397_v62 = vpop.permute.xlu0 %3396 }
 0xad4   :  { %v3400_v10 = vadd.f32 %v3397_v62, %v3366_v57  ;;  %v3399_v7 = vadd.f32 %v3397_v62, %v3363_v16  ;;  %v3401_v47 = vadd.f32 %v3397_v62, %v3369_v58 }
 0xad6   :  { %4050 = vset.pattern.permute.xlu1 %v3486_v20 }
 0xad8   :  { %v3372_v49 = vpop.xlane.xlu1 %3371 }
 0xad9   :  { %v3402_v18 = vadd.f32 %v3397_v62, %v3372_v49 }
 0xade   :  { %3519 = vperm.xlu1 %4050, %v3490_v50   ;;  %v3376_v0 = vpop.xlane.xlu2 %3375 }
 0xadf   :  { %v5891_v37 = vadd.f32 %v3397_v62, %v3376_v0 }
 0xae1   :  { %v3409_v31 = vsel %vm1279_vm3, %v5891_v37, -inf }
 0xae2   :  { %v3410_v48 = vmax.f32 %v3399_v7, %v3409_v31 }
 0xae6   :  { %4053 = vset.pattern.permute.xlu1 %v4383_v52  ;;  %v3379_v41 = vpop.xlane.xlu2 %3378 }
 0xae7   :  { %v3404_v61 = vadd.f32 %v3397_v62, %v3379_v41 }
 0xae9   :  { %v3411_v14 = vmax.f32 %v3400_v10, %v3404_v61 }
 0xaee   :  { %v3382_v51 = vpop.xlane.xlu2 %3381 }
 0xaef   :  { %v3405_v39 = vadd.f32 %v3397_v62, %v3382_v51 }
 0xaf1   :  { %v3412_v53 = vmax.f32 %v3401_v47, %v3405_v39 }
 0xaf5   :  { %v3496_v49 = vpop.permute.xlu0 %3495 }
 0xafe   :  { %v3388_v3 = vpop.xlane.xlu2 %3387 }
 0xaff   :  { %v3407_v44 = vadd.f32 %v3397_v62, %v3388_v3 }
 0xb00   :  { %v3391_v23 = vpop.xlane.xlu1 %3390 }
 0xb01   :  { %v5893_v15 = vadd.f32 %v3397_v62, %v3391_v23  ;;  %v3414_v45 = vmax.f32 %v3410_v48, %v3407_v44 }
 0xb03   :  { %v3415_v52 = vsel %vm1279_vm3, %v5893_v15, -inf  ;;  %vm3586_vm3 = vcmask 130112  }
 0xb04   :  { %v3416_v56 = vmax.f32 %v3411_v14, %v3415_v52 }
 0xb06   :  { %v3417_v19 = vmax.f32 %v3414_v45, %v3416_v56  ;;  %v3471_v46 = vpop.permute.xlu2 %3470 }
 0xb08   :  { %v3385_v4 = vpop.xlane.xlu1 %3384 }
 0xb09   :  { %v3406_v12 = vadd.f32 %v3397_v62, %v3385_v4 }
 0xb0b   :  { %v3413_v38 = vmax.f32 %v3402_v18, %v3406_v12 }
 0xb0d   :  { %v3418_v55 = vmax.f32 %v3412_v53, %v3413_v38 }
 0xb0e   :  { %v3502_v23 = vpop.permute.xlu2 %3501 }
 0xb0f   :  { %v3419_v63 = vmax.f32 %v3417_v19, %v3418_v55 }
 0xb11   :  { %v3420_v60 = vrot.slane %v3419_v63, 4 }
 0xb13   :  { %v3421_v5 = vmax.f32 %v3419_v63, %v3420_v60 }
 0xb15   :  { %v3422_v21 = vrot.slane %v3421_v5, 2 }
 0xb16   :  { %v3483_v48 = vpop.permute.xlu2 %3482 }
 0xb17   :  { %v3423_v22 = vmax.f32 %v3421_v5, %v3422_v21 }
 0xb19   :  { %v3424_v2 = vrot.slane %v3423_v22, 1 }
 0xb1b   :  { %v3425_v34 = vmax.f32 %v3423_v22, %v3424_v2 }
 0xb1d   :  { %4037 = vpush %v3425_v34 }
 0xb20   :  { %v3465_v50 = vpop.permute.xlu1 %3464 }
 0xb25   :  { %v3489_v22 = vpop.permute.xlu2 %3488 }
 0xb30   :  { %v3477_v31 = vpop.permute.xlu1 %3476 }
 0xb40   :  { %v3514_v55 = vpop.permute.xlu1 %3513 }
 0xb4e   :  { %s4038_s5 = spop %4037 }
 0xb4f   :  { %v3427_v54 = vstv %s4038_s5 }
 0xb50   :  { %v3433_v29 = vsub.f32 %v3404_v61, %v3427_v54  ;;  %v3428_v13 = vsub.f32 %v3399_v7, %v3427_v54  ;;  %v3429_v26 = vsub.f32 %v3400_v10, %v3427_v54  ;;  %v3430_v59 = vsub.f32 %v3401_v47, %v3427_v54 }
 0xb51   :  { %v3435_v58 = vsub.f32 %v3406_v12, %v3427_v54  ;;  %v3434_v57 = vsub.f32 %v3405_v39, %v3427_v54  ;;  %v3436_v16 = vsub.f32 %v3407_v44, %v3427_v54  ;;  %v3432_v52 = vsub.f32 %v5891_v37, %v3427_v54 }
 0xb52   :  { %v3448_v33 = vmul.f32 1.442695, %v3433_v29  ;;  %v3438_v40 = vmul.f32 1.442695, %v3428_v13  ;;  %v3440_v20 = vmul.f32 1.442695, %v3429_v26  ;;  %v3431_v14 = vsub.f32 %v3402_v18, %v3427_v54  ;;  %v3508_v18 = vpop.permute.xlu0 %3507 }
 0xb53   :  { %v3442_v0 = vmul.f32 1.442695, %v3430_v59  ;;  %v3452_v62 = vmul.f32 1.442695, %v3435_v58  ;;  %v3450_v61 = vmul.f32 1.442695, %v3434_v57  ;;  %v3437_v19 = vsub.f32 %v5893_v15, %v3427_v54  ;;  %v3520_v54 = vpop.permute.xlu1 %3519 }
 0xb54   :  { %4323 = vpow2.f32 %v3448_v33  ;;  %v3454_v3 = vmul.f32 1.442695, %v3436_v16  ;;  %v3446_v56 = vmul.f32 1.442695, %v3432_v52  ;;  %v3444_v12 = vmul.f32 1.442695, %v3431_v14 }
 0xb55   :  { %4325 = vpow2.f32 %v3438_v40  ;;  %v3456_v5 = vmul.f32 1.442695, %v3437_v19  ;;  %v2899_v33 = vmul.f32 0.17677669, %v5788_v9 }
 0xb56   :  { %4327 = vpow2.f32 %v3440_v20 }
 0xb57   :  { %4329 = vpow2.f32 %v3442_v0  ;;  %v2903_v13 = vsel %vm960_vm4, %v2899_v33, -inf  ;;  %v3582_v0 = vand.u32 127, %v3460_v25 }
 0xb58   :  { %4331 = vpow2.f32 %v3452_v62 }
 0xb59   :  { %4333 = vpow2.f32 %v3450_v61  ;;  %v3588_v57 = vadd.s32 4294967280, %v3582_v0 }
 0xb5a   :  { %v4324_v41 = vpop.eup %4323  ;;  %4335 = vpow2.f32 %v3454_v3 }
 0xb5b   :  { %v5899_v51 = vmul.f32 %v4324_v41, %v3496_v49  ;;  %v4326_v10 = vpop.eup %4325  ;;  %4337 = vpow2.f32 %v3446_v56  ;;  %v3584_v41 = vadd.s32 4294967288, %v3582_v0 }
 0xb5c   :  { %v4328_v7 = vpop.eup %4327  ;;  %v5903_v39 = vmul.f32 %v4326_v10, %v3465_v50  ;;  %4339 = vpow2.f32 %v3444_v12  ;;  %v3596_v10 = vadd.s32 4294967264, %v3582_v0 }
 0xb5d   :  { %3567 = vperm.xlu1 %4053, %v5899_v51   ;;  %v4330_v44 = vpop.eup %4329  ;;  %v5905_v47 = vmul.f32 %v4328_v7, %v3471_v46  ;;  %4341 = vpow2.f32 %v3456_v5 }
 0xb5e   :  { %3552 = vperm.xlu0 %4051, %v5903_v39   ;;  %v5908_v4 = vmul.f32 %v4330_v44, %v3477_v31  ;;  %v4332_v37 = vpop.eup %4331 }
 0xb5f   :  { %3555 = vperm.xlu2 %4052, %v5905_v47   ;;  %v4334_v53 = vpop.eup %4333  ;;  %v5912_v38 = vmul.f32 %v4332_v37, %v3508_v18 }
 0xb60   :  { %v4336_v45 = vpop.eup %4335  ;;  %v5915_v63 = vmul.f32 %v4334_v53, %v3502_v23  ;;  %v3592_v23 = vadd.s32 4294967272, %v3582_v0 }
 0xb61   :  { %v5917_v60 = vmul.f32 %v4336_v45, %v3514_v55  ;;  %v4338_v21 = vpop.eup %4337 }
 0xb62   :  { %v4340_v2 = vpop.eup %4339  ;;  %v5922_v34 = vmul.f32 %v4338_v21, %v3489_v22 }
 0xb63   :  { %v5924_v29 = vmul.f32 %v4340_v2, %v3483_v48  ;;  %v4342_v15 = vpop.eup %4341 }
 0xb64   :  { %v5928_v46 = vmul.f32 %v4342_v15, %v3520_v54 }
 0xb65   :  { %3558 = vperm.xlu1 %4053, %v5908_v4  }
 0xb66   :  { %3573 = vperm.xlu0 %4051, %v5912_v38  }
 0xb67   :  { %3570 = vperm.xlu2 %4052, %v5915_v63  }
 0xb6d   :  { %3576 = vperm.xlu1 %4053, %v5917_v60  }
 0xb6e   :  { %3564 = vperm.xlu0 %4051, %v5922_v34  }
 0xb6f   :  { %3561 = vperm.xlu2 %4052, %v5924_v29  }
 0xb77   :  { %3579 = vperm.xlu2 %4052, %v5928_v46  }
 0xb98   :  { %2904 = vmax.xlane.f32.xlu0 %v2903_v13 }
 0xbb9   :  { %v3556_v26 = vpop.permute.xlu2 %3555 }
 0xbba   :  { %v3585_v7 = vperm.slane %v3556_v26, %v3584_v41 }
 0xbc1   :  { %v3571_v59 = vpop.permute.xlu2 %3570 }
 0xbc2   :  { %v3601_v61 = vperm.slane %v3571_v59, %v3584_v41 }
 0xbc9   :  { %v3562_v20 = vpop.permute.xlu2 %3561 }
 0xbca   :  { %v3593_v18 = vperm.slane %v3562_v20, %v3592_v23 }
 0xbcf   :  { %v3568_v50 = vpop.permute.xlu1 %3567 }
 0xbd0   :  { %v3553_v40 = vpop.permute.xlu0 %3552  ;;  %v3600_v49 = vperm.slane %v3568_v50, %v3582_v0 }
 0xbd1   :  { %v3583_v9 = vperm.slane %v3553_v40, %v3582_v0  ;;  %v3580_v44 = vpop.permute.xlu2 %3579 }
 0xbd2   :  { %v3602_v14 = vsel %vm3586_vm3, %v3601_v61, %v3600_v49  ;;  %v3607_v12 = vperm.slane %v3580_v44, %v3596_v10 }
 0xbd3   :  { %v3587_v25 = vsel %vm3586_vm3, %v3585_v7, %v3583_v9 }
 0xbd7   :  { %v3559_v58 = vpop.permute.xlu1 %3558 }
 0xbd8   :  { %v3574_v16 = vpop.permute.xlu0 %3573  ;;  %v3589_v31 = vperm.slane %v3559_v58, %v3588_v57 }
 0xbd9   :  { %v3603_v62 = vperm.slane %v3574_v16, %v3588_v57 }
 0xbda   :  { %v3591_v37 = vsel %vm3590_vm7, %v3589_v31, %v3587_v25 }
 0xbdb   :  { %v3604_v48 = vsel %vm3590_vm7, %v3603_v62, %v3602_v14  ;;  %v3595_v55 = vsel %vm3594_vm8, %v3593_v18, %v3591_v37 }
 0xbdf   :  { %v3577_v3 = vpop.permute.xlu1 %3576 }
 0xbe0   :  { %v3605_v52 = vperm.slane %v3577_v3, %v3592_v23  ;;  %v3565_v53 = vpop.permute.xlu0 %3564 }
 0xbe1   :  { %v3597_v45 = vperm.slane %v3565_v53, %v3596_v10 }
 0xbe2   :  { %v3606_v56 = vsel %vm3594_vm8, %v3605_v52, %v3604_v48 }
 0xbe3   :  { %v3608_v19 = vsel %vm3598_vm9, %v3607_v12, %v3606_v56  ;;  %v3599_v5 = vsel %vm3598_vm9, %v3597_v45, %v3595_v55 }
 0xbe4   :  { %v3609_v21 = vsel %vm3060_vm5, %v3608_v19, %v3599_v5 }
 0xbe5   :  { %v3612_v22 = vsel %vm3611_vm6, %v3609_v21, 0.0 }
 0xbe6   :  { %3613 = vadd.xlane.f32.xlu1 %v3612_v22 }
 0xc0b   :  { %v2905_v2 = vpop.xlane.xlu0 %2904 }
 0xc0c   :  { %v2907_v15 = vsub.f32 %v2899_v33, %v2905_v2 }
 0xc0e   :  { %v2910_v54 = vmul.f32 1.442695, %v2907_v15 }
 0xc10   :  { %4343 = vpow2.f32 %v2910_v54 }
 0xc16   :  { %v5935_v13 = vpop.eup %4343 }
 0xc17   :  { %v2915_v26 = vsel %vm960_vm4, %v5935_v13, 0.0 }
 0xc18   :  { %2916 = vadd.xlane.f32.xlu2 %v2915_v26 }
 0xc59   :  { %v3614_v59 = vpop.xlane.xlu1 %3613 }
 0xc5a   :  { %v3615_v50 = vadd.f32 1e-05, %v3614_v59 }
 0xc5c   :  { %v3617_v40 = vperm.slane %v3615_v50, 0  ;;  %v3618_v20 = vperm.slane %v3615_v50, 1 }
 0xc5e   :  { %4345 = vrcp.f32 %v3617_v40  ;;  %v3632_v33 = vand.u32 2147483648, %v3617_v40  ;;  %v3651_v62 = vand.u32 2147483648, %v3618_v20  ;;  %v3630_v61 = vand.u32 2147483647, %v3617_v40 }
 0xc5f   :  { %4347 = vrcp.f32 %v3618_v20  ;;  %v3649_v3 = vand.u32 2147483647, %v3618_v20  ;;  %vm3626_vm12 = vweird.f32 %v3617_v40  ;;  %vm3645_vm13 = vweird.f32 %v3618_v20 }
 0xc60   :  { %v3633_v31 = vor.u32 1.1754944e-38, %v3632_v33  ;;  %vm3631_vm15 = vcmp.eq.f32.partialorder %v3630_v61, 8.507059e+37  ;;  %v3652_v14 = vor.u32 1.1754944e-38, %v3651_v62 }
 0xc61   :  { %vm3650_vm3 = vcmp.eq.f32.partialorder %v3649_v3, 8.507059e+37 }
 0xc64   :  { %v4346_v58 = vpop.eup %4345 }
 0xc65   :  { %v4348_v0 = vpop.eup %4347  ;;  %v3622_v57 = vmul.f32 %v4346_v58, %v3617_v40  ;;  %vm3627_vm10 = vweird.f32 %v4346_v58 }
 0xc66   :  { %v3641_v41 = vmul.f32 %v4348_v0, %v3618_v20  ;;  %vm3646_vm11 = vweird.f32 %v4348_v0  ;;  %vm3628_vm14 = vmor %vm3626_vm12, %vm3627_vm10 }
 0xc67   :  { %v3623_v49 = vsub.f32 1.0, %v3622_v57  ;;  %vm3647_vm0 = vmor %vm3645_vm13, %vm3646_vm11 }
 0xc68   :  { %v3642_v16 = vsub.f32 1.0, %v3641_v41  ;;  %v3780_v41 = vld [vmem:[%s6047_s19 + $0x10] sm:$0xff] }
 0xc69   :  { %v3624_v23 = vmul.f32 %v4346_v58, %v3623_v49 }
 0xc6a   :  { %v3643_v9 = vmul.f32 %v4348_v0, %v3642_v16 }
 0xc6b   :  { %v3625_v10 = vadd.f32 %v4346_v58, %v3624_v23  ;;  %v3778_v23 = vld [vmem:[%s6047_s19] sm:$0xff] }
 0xc6c   :  { %v3644_v52 = vadd.f32 %v4348_v0, %v3643_v9 }
 0xc6d   :  { %v3629_v7 = vsel %vm3628_vm14, %v4346_v58, %v3625_v10 }
 0xc6e   :  { %v3634_v44 = vsel %vm3631_vm15, %v3633_v31, %v3629_v7  ;;  %v3648_v48 = vsel %vm3647_vm0, %v4348_v0, %v3644_v52  ;;  %v3781_v0 = vld [vmem:[%s6047_s19 + $0x18] sm:$0xff] }
 0xc6f   :  { %v3635_v25 = vmul.f32 %v3634_v44, %v5903_v39  ;;  %v3653_v56 = vsel %vm3650_vm3, %v3652_v14, %v3648_v48  ;;  %v3636_v12 = vmul.f32 %v3634_v44, %v5905_v47  ;;  %v3637_v45 = vmul.f32 %v3634_v44, %v5908_v4  ;;  %v3751_v47 = vld [vmem:[%s6045_s17 + $0x10] sm:$0xff]  ;;  %v3750_v4 = vld [vmem:[%s6045_s17 + $0x8] sm:$0xff]  ;;  %3803 = vmatpush.msra.mxu0 %v3781_v0 }
 0xc70   :  { %v3654_v37 = vmul.f32 %v3653_v56, %v5899_v51  ;;  %v3655_v18 = vmul.f32 %v3653_v56, %v5915_v63  ;;  %v3656_v53 = vmul.f32 %v3653_v56, %v5912_v38  ;;  %v3638_v19 = vmul.f32 %v3634_v44, %v5924_v29  ;;  %v3752_v51 = vld [vmem:[%s6045_s17 + $0x18] sm:$0xff]  ;;  %v3749_v38 = vld [vmem:[%s6045_s17] sm:$0xff] }
 0xc71   :  { %3661 = vperm.xlu1 %4053, %v3635_v25   ;;  %3666 = vperm.xlu2 %4052, %v3636_v12   ;;  %v3639_v39 = vmul.f32 %v3634_v44, %v5922_v34  ;;  %v3657_v63 = vmul.f32 %v3653_v56, %v5917_v60  ;;  %v3658_v34 = vmul.f32 %v3653_v56, %v5928_v46 }
 0xc72   :  { %3686 = vperm.xlu0 %4051, %v3654_v37   ;;  %3769 = vmatpush.msra.mxu3 %v3752_v51 }
 0xc73   :  { %3804 = vmatpush.msra.mxu0 %v3780_v41 }
 0xc74   :  { %3770 = vmatpush.msra.mxu3 %v3751_v47 }
 0xc76   :  { %3771 = vmatpush.msra.mxu3 %v3750_v4 }
 0xc78   :  { %3772 = vmatpush.msra.mxu3 %v3749_v38 }
 0xc79   :  { %3691 = vperm.xlu1 %4053, %v3655_v18   ;;  %3696 = vperm.xlu2 %4052, %v3656_v53  }
 0xc7a   :  { %3671 = vperm.xlu0 %4051, %v3637_v45  }
 0xc81   :  { %3676 = vperm.xlu1 %4053, %v3638_v19   ;;  %3681 = vperm.xlu2 %4052, %v3639_v39  }
 0xc82   :  { %3701 = vperm.xlu0 %4051, %v3657_v63  }
 0xc89   :  { %3706 = vperm.xlu1 %4053, %v3658_v34  }
 0xc8b   :  { %v2917_v29 = vpop.xlane.xlu2 %2916 }
 0xc8c   :  { %4349 = vrcp.f32 %v2917_v29  ;;  %v2944_v21 = vand.u32 2147483648, %v2917_v29  ;;  %v2942_v2 = vand.u32 2147483647, %v2917_v29  ;;  %vm2938_vm8 = vweird.f32 %v2917_v29 }
 0xc8e   :  { %v2945_v54 = vor.u32 1.1754944e-38, %v2944_v21  ;;  %vm2943_vm6 = vcmp.eq.f32.partialorder %v2942_v2, 8.507059e+37 }
 0xc92   :  { %v4350_v60 = vpop.eup %4349 }
 0xc93   :  { %v2934_v55 = vmul.f32 %v4350_v60, %v2917_v29  ;;  %vm2939_vm7 = vweird.f32 %v4350_v60 }
 0xc94   :  { %vm2940_vm9 = vmor %vm2938_vm8, %vm2939_vm7 }
 0xc95   :  { %v2935_v5 = vsub.f32 1.0, %v2934_v55 }
 0xc97   :  { %v2936_v22 = vmul.f32 %v4350_v60, %v2935_v5 }
 0xc99   :  { %v2937_v15 = vadd.f32 %v4350_v60, %v2936_v22 }
 0xc9b   :  { %v2941_v26 = vsel %vm2940_vm9, %v4350_v60, %v2937_v15  ;;  %v3825_v15 = vld [vmem:[%s6049_s21 + $0x10] sm:$0xff] }
 0xc9c   :  { %v2946_v59 = vsel %vm2943_vm6, %v2945_v54, %v2941_v26  ;;  %v3824_v54 = vld [vmem:[%s6049_s21 + $0x8] sm:$0xff]  ;;  %v3823_v26 = vld [vmem:[%s6049_s21] sm:$0xff] }
 0xc9d   :  { %v2947_v50 = vmul.f32 %v5935_v13, %v2946_v59 }
 0xc9f   :  { %4021 = vmatmul.msk.f32.vlgmr.msrb.gmra.mxu3 %vm960_vm4, %v2947_v50  ;;  %v4060_v50 = vld [vmem:[%s6046_s18] ss:$0 sm:$0xff]  ;;  %vm3821_vm4 = vcmask 1041408  }
 0xca7   :  { %4032 = vmatmul.msk.f32.vlgmr.msra.gmra.mxu3 %vm108_vm2, %v5754_v17  ;;  %v3779_v17 = vld [vmem:[%s6047_s19 + $0x8] sm:$0xff] }
 0xca8   :  { %3805 = vmatpush.msra.mxu0 %v3779_v17 }
 0xcaa   :  { %3806 = vmatpush.msra.mxu0 %v3778_v23 }
 0xccb   :  { %v3667_v46 = vpop.permute.xlu2 %3666 }
 0xccc   :  { %v3710_v33 = vmul.f32 %v3667_v46, %v4557_v28 }
 0xcce   :  { %v3720_v9 = vsel %vm108_vm2, %v3710_v33, 0.0  ;;  %v3048_v33 = vadd.f32 %v5838_v1, %v5524_v43 }
 0xcd3   :  { %v3697_v58 = vpop.permute.xlu2 %3696 }
 0xce3   :  { %v3662_v40 = vpop.permute.xlu1 %3661 }
 0xce4   :  { %v3687_v20 = vpop.permute.xlu0 %3686  ;;  %v3709_v13 = vmul.f32 %v3662_v40, %v4569_v32  ;;  %v3682_v32 = vpop.permute.xlu2 %3681  ;;  %v4061_v40 = vld [vmem:[%s6048_s20] ss:$0 sm:$0xff] }
 0xce5   :  { %v3714_v3 = vmul.f32 %v3687_v20, %v6111_v24 }
 0xce6   :  { %v3719_v62 = vsel %vm108_vm2, %v3709_v13, 0.0 }
 0xce7   :  { %v3721_v28 = vadd.f32 %v3720_v9, %v3719_v62  ;;  %v3734_v48 = vsel %vm108_vm2, %v3714_v3, 0.0 }
 0xceb   :  { %v3692_v57 = vpop.permute.xlu1 %3691 }
 0xcec   :  { %v3672_v49 = vpop.permute.xlu0 %3671  ;;  %v3715_v61 = vmul.f32 %v3692_v57, %v6113_v42  ;;  %v3716_v42 = vmul.f32 %v3697_v58, %v6115_v11 }
 0xced   :  { %v3711_v16 = vmul.f32 %v3672_v49, %v4563_v30  ;;  %v3713_v30 = vmul.f32 %v3682_v32, %v6110_v27 }
 0xcee   :  { %v3735_v52 = vsel %vm108_vm2, %v3715_v61, 0.0  ;;  %v3737_v27 = vsel %vm108_vm2, %v3716_v42, 0.0 }
 0xcef   :  { %v3722_v10 = vsel %vm108_vm2, %v3711_v16, 0.0  ;;  %v3736_v56 = vadd.f32 %v3735_v52, %v3734_v48  ;;  %v3726_v37 = vsel %vm3373_vm1, %v3713_v30, 0.0 }
 0xcf0   :  { %v3723_v44 = vadd.f32 %v3722_v10, %v3721_v28 }
 0xcf1   :  { %v3738_v45 = vadd.f32 %v3737_v27, %v3736_v56 }
 0xcf3   :  { %v3677_v31 = vpop.permute.xlu1 %3676 }
 0xcf4   :  { %v3712_v7 = vmul.f32 %v3677_v31, %v4578_v36  ;;  %v3702_v14 = vpop.permute.xlu0 %3701 }
 0xcf5   :  { %v3717_v24 = vmul.f32 %v3702_v14, %v6117_v6 }
 0xcf6   :  { %v3724_v25 = vsel %vm108_vm2, %v3712_v7, 0.0 }
 0xcf7   :  { %v3725_v12 = vadd.f32 %v3724_v25, %v3723_v44  ;;  %v3739_v53 = vsel %vm108_vm2, %v3717_v24, 0.0 }
 0xcf8   :  { %v3740_v51 = vadd.f32 %v3739_v53, %v3738_v45 }
 0xcf9   :  { %v3727_v18 = vadd.f32 %v3726_v37, %v3725_v12 }
 0xcfb   :  { %v3728_v36 = vrot.slane %v3727_v18, 4  ;;  %v3707_v19 = vpop.permute.xlu1 %3706 }
 0xcfc   :  { %v3718_v11 = vmul.f32 %v3707_v19, %v6119_v35  ;;  %v3826_v35 = vld [vmem:[%s6049_s21 + $0x18] sm:$0xff]  ;;  %s4384_s21 = smov [#allocation3]  }
 0xcfd   :  { %v3729_v39 = vadd.f32 %v3728_v36, %v3727_v18  ;;  %3846 = vmatpush.msrb.mxu3 %v3826_v35  ;;  %s3865_s10 = sshll.u32 %s4384_s21, 4  ;;  %s3866_s10 = int_to_ptr.vmem [resolvable:$true] %s3865_s10 }
 0xcfe   :  { %v3741_v47 = vsel %vm3373_vm1, %v3718_v11, 0.0  ;;  %vm3858_vm1 = vcmask 123904  }
 0xcff   :  { %v3730_v63 = vrot.slane %v3729_v39, 2  ;;  %v3742_v6 = vadd.f32 %v3741_v47, %v3740_v51  ;;  %3847 = vmatpush.msrb.mxu3 %v3825_v15 }
 0xd01   :  { %v3743_v4 = vrot.slane %v3742_v6, 4  ;;  %v3731_v38 = vadd.f32 %v3730_v63, %v3729_v39  ;;  %3848 = vmatpush.msrb.mxu3 %v3824_v54 }
 0xd03   :  { %v3744_v34 = vadd.f32 %v3743_v4, %v3742_v6  ;;  %v3732_v60 = vrot.slane %v3731_v38, 1  ;;  %3849 = vmatpush.msrb.mxu3 %v3823_v26 }
 0xd05   :  { %v3745_v29 = vrot.slane %v3744_v34, 2  ;;  %v3733_v21 = vadd.f32 %v3732_v60, %v3731_v38 }
 0xd07   :  { %v3746_v55 = vadd.f32 %v3745_v29, %v3744_v34 }
 0xd09   :  { %v3747_v5 = vrot.slane %v3746_v55, 1 }
 0xd0b   :  { %v3748_v22 = vadd.f32 %v3747_v5, %v3746_v55 }
 0xd0d   :  { %v3788_v2 = vsel %vm3060_vm5, %v3748_v22, %v3733_v21 }
 0xd0e   :  { %4033 = vmatmul.msk.f32.vlgmr.msra.gmra.mxu0 %vm108_vm2, %v3788_v2 }
 0xd22   :  { %v3045_v59 = vpop.f32.mrf.mxu3 }
 0xd23   :  { %v3049_v58 = vadd.f32 %v3045_v59, %v5535_v8  ;;  %v4062_v8 = vld [vmem:[%s6050_s22] ss:$0 sm:$0xff] }
 0xd25   :  { %v3815_v49 = vrot.slane %v3049_v58, 7 }
 0xd27   :  { %v3816_v23 = vsel %vm3060_vm5, %v3815_v49, %v3048_v33 }
 0xd2a   :  { %v3774_v46 = vpop.f32.mrf.mxu3 }
 0xd2b   :  { %v3775_v20 = vadd.f32 %v4060_v50, %v3774_v46 }
 0xd2d   :  { %v3777_v41 = vmax.f32 %v3775_v20, 0.0 }
 0xd8b   :  { %v3808_v0 = vpop.f32.mrf.mxu0 }
 0xd8c   :  { %v3809_v57 = vadd.f32 %v4061_v40, %v3808_v0 }
 0xd8e   :  { %v3811_v13 = vmax.f32 %v3809_v57, 0.0 }
 0xd90   :  { %v3812_v17 = vmul.f32 %v3811_v13, %v3777_v41 }
 0xd92   :  { %v3819_v16 = vrot.slane %v3812_v17, 6 }
 0xd94   :  { %v3822_v62 = vsel %vm3821_vm4, %v3816_v23, %v3819_v16 }
 0xd95   :  { %4034 = vmatmul.msk.f32.vlgmr.msrb.gmra.mxu3 %vm108_vm2, %v3822_v62 }
 0xe18   :  { %v3851_v61 = vpop.f32.mrf.mxu3 }
 0xe19   :  { %v3852_v32 = vadd.f32 %v4062_v8, %v3851_v61 }
 0xe1b   :  { %v3855_v43 = vrot.slane %v3852_v32, 2 }
 0xe1d   :  { %v3857_v1 = vadd.f32 %v3855_v43, %v3852_v32 }
 0xe1f   :  { %3859 = vst.msk [vmem:[#allocation3] sm:$0x3] %vm3858_vm1, %v3857_v1 }
 0xe20   :  { %3870 = dma.vmem_to_hbm [thread:$0]  %s3866_s10, 32, %s3868_s2, [#allocation4]  }
 0xe21   :  { %4381 = dma.done.wait [#allocation4], 32  }
 0xe22   :  { %4382 = vsyncadd [#allocation4], 4294967264 }
 0xe23   :  { %3875 = vsyncpa [#allocation4], 1 }

</bundles_post_ra>
